<compile_context>
chip_gen: v7x
topology: tpu7x:2x2x1
jax: 0.10.0
libtpu: 0.0.40
codegen_flags: <defaults>
</compile_context>

<pallas_src>
import functools

import jax
import jax.numpy as jnp
from jax.experimental import pallas as pl
from jax.experimental.pallas import tpu as pltpu

LATENT_DIM = 32
HIDDEN_DIM = 400
OUT_DIM = 28 * 28  # 784


def _decoder_kernel(x_ref, w3_ref, b3_ref, w4_ref, b4_ref, o_ref):
    # x_ref: (TB, 32) f32 | w3_ref: (32, 400) bf16 | b3_ref: (1, 400) f32
    # w4_ref: (400, 784) bf16 | b4_ref: (1, 784) f32 | o_ref: (TB, 784) f32
    x = x_ref[...].astype(jnp.bfloat16)

    # fc3 + ReLU  (bf16 MXU operands, f32 accumulation / elementwise)
    h = jnp.dot(x, w3_ref[...], preferred_element_type=jnp.float32)
    h = jnp.maximum(h + b3_ref[...], 0.0)

    # fc4 + Sigmoid
    y = jnp.dot(h.astype(jnp.bfloat16), w4_ref[...],
                preferred_element_type=jnp.float32)
    y = y + b4_ref[...]
    # sigmoid(y) = 1 / (1 + exp(-y)); exp and approx-reciprocal both issue on
    # the EUP slot, keeping the 784-wide epilogue off the VALU.
    o_ref[...] = pl.reciprocal(1.0 + jnp.exp(-y), approx=True).astype(o_ref.dtype)


@functools.partial(jax.jit, static_argnames=("tb",))
def decoder_forward(x, params, *, tb=256):
    """x: [B, 32] float32; params: ((W3[32,400], b3[1,400]), (W4[400,784], b4[1,784]))."""
    (w3, b3), (w4, b4) = params
    B = x.shape[0]
    n_tiles = pl.cdiv(B, tb)
    Bp = n_tiles * tb
    if Bp != B:
        x = jnp.pad(x, ((0, Bp - B), (0, 0)))

    # Pre-cast weights to bf16 once per call (not once per grid step).
    w3b = w3.astype(jnp.bfloat16)
    w4b = w4.astype(jnp.bfloat16)

    flops = 2 * Bp * (LATENT_DIM * HIDDEN_DIM + HIDDEN_DIM * OUT_DIM)
    bytes_accessed = (Bp * LATENT_DIM * 4 + Bp * OUT_DIM * 4
                      + LATENT_DIM * HIDDEN_DIM * 2 + HIDDEN_DIM * 4
                      + HIDDEN_DIM * OUT_DIM * 2 + OUT_DIM * 4)
    cost = pl.CostEstimate(flops=flops,
                           transcendentals=2 * Bp * OUT_DIM,  # exp + rcp
                           bytes_accessed=bytes_accessed)

    out = pl.pallas_call(
        _decoder_kernel,
        out_shape=jax.ShapeDtypeStruct((Bp, OUT_DIM), jnp.float32),
        grid_spec=pltpu.PrefetchScalarGridSpec(
            num_scalar_prefetch=0,
            grid=(n_tiles,),
            in_specs=[
                pl.BlockSpec((tb, LATENT_DIM), lambda i: (i, 0)),          # x tile
                pl.BlockSpec((LATENT_DIM, HIDDEN_DIM), lambda i: (0, 0)),  # W3 (resident)
                pl.BlockSpec((1, HIDDEN_DIM), lambda i: (0, 0)),           # b3 (resident)
                pl.BlockSpec((HIDDEN_DIM, OUT_DIM), lambda i: (0, 0)),     # W4 (resident)
                pl.BlockSpec((1, OUT_DIM), lambda i: (0, 0)),              # b4 (resident)
            ],
            out_specs=pl.BlockSpec((tb, OUT_DIM), lambda i: (i, 0)),
        ),
        compiler_params=pltpu.CompilerParams(
            dimension_semantics=("parallel",),
            vmem_limit_bytes=32 * 1024 * 1024,  # well under v7x's 64 MiB
        ),
        cost_estimate=cost,
    )(x, w3b, b3, w4b, b4)
    return out[:B]


def init_params(key):
    """PyTorch nn.Linear default init: uniform(-k, k), k = 1/sqrt(fan_in).
    Weights stored as [in, out]."""
    params = []
    for fan_in, fan_out in ((LATENT_DIM, HIDDEN_DIM), (HIDDEN_DIM, OUT_DIM)):
        key, kw, kb = jax.random.split(key, 3)
        bound = 1.0 / jnp.sqrt(fan_in)
        w = jax.random.uniform(kw, (fan_in, fan_out), jnp.float32,
                               minval=-bound, maxval=bound)
        b = jax.random.uniform(kb, (1, fan_out), jnp.float32,
                               minval=-bound, maxval=bound)
        params.append((w, b))
    return tuple(params)


def _reference_forward(x, params):
    (w3, b3), (w4, b4) = params
    h = jnp.maximum(x @ w3 + b3, 0.0)
    return jax.nn.sigmoid(h @ w4 + b4)


if __name__ == "__main__":
    key = jax.random.PRNGKey(0)
    key, kx = jax.random.split(key)

    # Small latent inputs; B=300 exercises both the batch grid (2 tiles of 256)
    # and the pad/slice path.
    B = 300
    x = jax.random.normal(kx, (B, LATENT_DIM), jnp.float32)
    params = init_params(key)

    out = decoder_forward(x, params)
    out = jax.block_until_ready(out)

    ref = _reference_forward(x, params)
    assert out.shape == (B, OUT_DIM)
    # bf16 MXU operands with f32 accumulation + approx reciprocal in the
    # sigmoid -> small deviation from the pure-f32 reference.
    assert jnp.allclose(out, ref, atol=2e-2, rtol=0.0), float(
        jnp.max(jnp.abs(out - ref)))

    print("KERNEL_OK")
</pallas_src>

<mosaic_0001>
module attributes {stable_mosaic.version = 11 : i64} {
  func.func @_decoder_kernel(%arg0: i32, %arg1: memref<256x32xf32, #tpu.memory_space<vmem>>, %arg2: memref<32x400xbf16, #tpu.memory_space<vmem>>, %arg3: memref<1x400xf32, #tpu.memory_space<vmem>>, %arg4: memref<400x784xbf16, #tpu.memory_space<vmem>>, %arg5: memref<1x784xf32, #tpu.memory_space<vmem>>, %arg6: memref<256x784xf32, #tpu.memory_space<vmem>>) attributes {dimension_semantics = [#tpu.dimension_semantics<parallel>], iteration_bounds = array<i64: 2>, scalar_prefetch = 0 : i64, scratch_operands = 0 : i64, tpu.core_type = #tpu.core_type<tc>, window_params = [{transform_indices = @transform_0, window_bounds = array<i64: 256, 32>}, {pipeline_mode = #tpu.pipeline_mode<synchronous>, transform_indices = @transform_1, window_bounds = array<i64: 32, 400>}, {pipeline_mode = #tpu.pipeline_mode<synchronous>, transform_indices = @transform_2, window_bounds = array<i64: 1, 400>}, {pipeline_mode = #tpu.pipeline_mode<synchronous>, transform_indices = @transform_3, window_bounds = array<i64: 400, 784>}, {pipeline_mode = #tpu.pipeline_mode<synchronous>, transform_indices = @transform_4, window_bounds = array<i64: 1, 784>}, {transform_indices = @transform_5, window_bounds = array<i64: 256, 784>}]} {
    %c0 = arith.constant 0 : index
    %c0_0 = arith.constant 0 : index
    %0 = vector.load %arg1[%c0, %c0_0] : memref<256x32xf32, #tpu.memory_space<vmem>>, vector<256x32xf32>
    %1 = arith.truncf %0 : vector<256x32xf32> to vector<256x32xbf16>
    %c0_1 = arith.constant 0 : index
    %c0_2 = arith.constant 0 : index
    %2 = vector.load %arg2[%c0_1, %c0_2] : memref<32x400xbf16, #tpu.memory_space<vmem>>, vector<32x400xbf16>
    %cst = arith.constant dense<0.000000e+00> : vector<256x400xf32>
    %3 = tpu.matmul %1, %2, %cst {dimension_numbers = #tpu.dot_dimension_numbers<[1], [0], [0], [1], [0, 0, 1, 1], [], []>} : vector<256x32xbf16>, vector<32x400xbf16>, vector<256x400xf32> -> vector<256x400xf32>
    %c0_3 = arith.constant 0 : index
    %c0_4 = arith.constant 0 : index
    %4 = vector.load %arg3[%c0_3, %c0_4] : memref<1x400xf32, #tpu.memory_space<vmem>>, vector<1x400xf32>
    %5 = vector.broadcast %4 : vector<1x400xf32> to vector<256x400xf32>
    %6 = arith.addf %3, %5 : vector<256x400xf32>
    %cst_5 = arith.constant 0.000000e+00 : f32
    %7 = vector.broadcast %cst_5 : f32 to vector<256x400xf32>
    %8 = arith.maximumf %6, %7 : vector<256x400xf32>
    %9 = arith.truncf %8 : vector<256x400xf32> to vector<256x400xbf16>
    %c0_6 = arith.constant 0 : index
    %c0_7 = arith.constant 0 : index
    %10 = vector.load %arg4[%c0_6, %c0_7] : memref<400x784xbf16, #tpu.memory_space<vmem>>, vector<400x784xbf16>
    %cst_8 = arith.constant dense<0.000000e+00> : vector<256x784xf32>
    %11 = tpu.matmul %9, %10, %cst_8 {dimension_numbers = #tpu.dot_dimension_numbers<[1], [0], [0], [1], [0, 0, 1, 1], [], []>} : vector<256x400xbf16>, vector<400x784xbf16>, vector<256x784xf32> -> vector<256x784xf32>
    %c0_9 = arith.constant 0 : index
    %c0_10 = arith.constant 0 : index
    %12 = vector.load %arg5[%c0_9, %c0_10] : memref<1x784xf32, #tpu.memory_space<vmem>>, vector<1x784xf32>
    %13 = vector.broadcast %12 : vector<1x784xf32> to vector<256x784xf32>
    %14 = arith.addf %11, %13 : vector<256x784xf32>
    %cst_11 = arith.constant 0.000000e+00 : f32
    %15 = vector.broadcast %cst_11 : f32 to vector<256x784xf32>
    %16 = arith.subf %15, %14 : vector<256x784xf32>
    %17 = math.exp %16 : vector<256x784xf32>
    %cst_12 = arith.constant 1.000000e+00 : f32
    %18 = vector.broadcast %cst_12 : f32 to vector<256x784xf32>
    %19 = arith.addf %18, %17 : vector<256x784xf32>
    %20 = tpu.reciprocal %19 {approx = true} : vector<256x784xf32> -> vector<256x784xf32>
    %c0_13 = arith.constant 0 : index
    %c0_14 = arith.constant 0 : index
    %21 = vector.load %arg6[%c0_13, %c0_14] : memref<256x784xf32, #tpu.memory_space<vmem>>, vector<256x784xf32>
    tpu.vector_store %arg6[%c0_13, %c0_14], %20 {strides = array<i32>} : memref<256x784xf32, #tpu.memory_space<vmem>>, vector<256x784xf32>,
    return
  }
  func.func @transform_0(%arg0: i32) -> (i32, i32) {
    %c0_i32 = arith.constant 0 : i32
    %c0_i32_0 = arith.constant 0 : i32
    return %arg0, %c0_i32 : i32, i32
  }
  func.func @transform_1(%arg0: i32) -> (i32, i32) {
    %c0_i32 = arith.constant 0 : i32
    %c0_i32_0 = arith.constant 0 : i32
    %c0_i32_1 = arith.constant 0 : i32
    return %c0_i32, %c0_i32_0 : i32, i32
  }
  func.func @transform_2(%arg0: i32) -> (i32, i32) {
    %c0_i32 = arith.constant 0 : i32
    %c0_i32_0 = arith.constant 0 : i32
    %c0_i32_1 = arith.constant 0 : i32
    return %c0_i32, %c0_i32_0 : i32, i32
  }
  func.func @transform_3(%arg0: i32) -> (i32, i32) {
    %c0_i32 = arith.constant 0 : i32
    %c0_i32_0 = arith.constant 0 : i32
    %c0_i32_1 = arith.constant 0 : i32
    return %c0_i32, %c0_i32_0 : i32, i32
  }
  func.func @transform_4(%arg0: i32) -> (i32, i32) {
    %c0_i32 = arith.constant 0 : i32
    %c0_i32_0 = arith.constant 0 : i32
    %c0_i32_1 = arith.constant 0 : i32
    return %c0_i32, %c0_i32_0 : i32, i32
  }
  func.func @transform_5(%arg0: i32) -> (i32, i32) {
    %c0_i32 = arith.constant 0 : i32
    %c0_i32_0 = arith.constant 0 : i32
    return %arg0, %c0_i32 : i32, i32
  }
}

</mosaic_0001>

<bundles_post_ra>
// kernel: decoder_forward.1
= control target key start
LH: loop header
LB: loop body
LE: loop exit
PB: predicated region body
PF: predicated region fallthrough
CT: control target
= control target key end

     0   :  { %s7038_s18 = smov 0   ;;  %s9507_s0 = inlined_call_operand.vmem [shape: f32[512,32], index: 0, kind: input, shape index: {}]   ;;  %s9508_s1 = inlined_call_operand.vmem [shape: bf16[32,400], index: 1, kind: input, shape index: {}]   ;;  %s9509_s2 = inlined_call_operand.vmem [shape: f32[1,400], index: 2, kind: input, shape index: {}]   ;;  %s9510_s3 = inlined_call_operand.vmem [shape: bf16[400,784], index: 3, kind: input, shape index: {}]   ;;  %s9511_s4 = inlined_call_operand.vmem [shape: f32[1,784], index: 4, kind: input, shape index: {}]   ;;  %s9512_s5 = inlined_call_operand.vmem [shape: f32[512,784], index: 5, kind: output, shape index: {}]  }
   0x1 LB: > { %s5044_s19 = sadd.s32 4294967295, %s7005_s18   ;;  %p5048_p0 = scmp.ge.s32.totalorder %s7005_s18, 1  ;;  %s7005_s18 = sphi %s7038_s18, %s15_s18  }
   0x2   : > { %p188_p1 = scmp.lt.s32.totalorder %s7005_s18, 3 }
   0x4   : > { %p189_p2 = pnand %p5048_p0, %p188_p1 }
   0x6   : > { %192 = sbr.rel (%p189_p2) target bundleno = 1067 (0x42b), region = 40 }
   0xd   : > { %v5840_v0 = vld [vmem:[%s9508_s1 + $0x4] ss:$16 sps:$4 sm:$0xff]   ;;  %s5049_s22 = sshll.u32 %s5044_s19, 5  ;;  %v5842_v1 = vld [vmem:[%s9508_s1] ss:$16 sps:$4 sm:$0xff]   ;;  %v9517_v2 = vmov 0  }
   0xe   : > { %430 = vmatprep.mubr.bf16.mxu0 %v9517_v2  ;;  %p218_p3 = scmp.lt.s32.totalorder %s5049_s22, 63  ;;  %623 = vmatprep.mubr.bf16.mxu1 %v9517_v2  ;;  %v5843_v3 = vld [vmem:[%s9508_s1 + $0x24] ss:$16 sps:$4 sm:$0xff]   ;;  %v5845_v4 = vld [vmem:[%s9508_s1 + $0x20] ss:$16 sps:$4 sm:$0xff]   ;;  %vm349_vm0 = vcmask 261120  }
   0xf   : > { %398 = vmatprep.subr.bf16.mxu0 %v5840_v0  ;;  %v5846_v5 = vld [vmem:[%s9508_s1 + $0xc] ss:$16 sps:$4 sm:$0xff]   ;;  %v5848_v6 = vld [vmem:[%s9508_s1 + $0x8] ss:$16 sps:$4 sm:$0xff]   ;;  %v5854_v9 = vld [vmem:[%s9510_s3 + $0x4] ss:$28 sps:$4 sm:$0xff]  }
  0x10   : > { %399 = vmatpush1.bf16.msra.mxu0 %v5842_v1  ;;  %s9709_s22 = smov (!%p218_p3, %s5049_s22), 63  ;;  %v5849_v7 = vld [vmem:[%s9508_s1 + $0x2c] ss:$16 sps:$4 sm:$0xff]   ;;  %591 = vmatprep.subr.bf16.mxu1 %v5846_v5  ;;  %v5851_v8 = vld [vmem:[%s9508_s1 + $0x28] ss:$16 sps:$4 sm:$0xff]   ;;  %vm2113_vm1 = vcmask 130048  }
  0x11   : > { %400 = vmatprep.subr.bf16.mxu0 %v5843_v3  ;;  %s5050_s10 = sshll.u32 %s9709_s22, 3  ;;  %592 = vmatpush1.bf16.msra.mxu1 %v5848_v6  ;;  %v5852_v12 = vld [vmem:[%s9510_s3] ss:$28 sps:$4 sm:$0xff]   ;;  %v5855_v17 = vld [vmem:[%s9510_s3 + $0x8] ss:$28 sps:$4 sm:$0xff]   ;;  %s5830_s7 = smul.u32 56, %s9709_s22 }
  0x12   : > { %s7075_s13 = scalar_lea.vmem %s9507_s0, %s5050_s10  ;;  %593 = vmatprep.subr.bf16.mxu1 %v5849_v7  ;;  %v5857_v18 = vld [vmem:[%s9510_s3 + $0xc] ss:$28 sps:$4 sm:$0xff]   ;;  %v5858_v19 = vld [vmem:[%s9510_s3 + $0x38] ss:$28 sps:$4 sm:$0xff]   ;;  %v5861_v21 = vld [vmem:[%s9510_s3 + $0x40] ss:$28 sps:$4 sm:$0xff]  }
  0x13   : > { %v231_v10 = vld [vmem:[%s7075_s13] sm:$0xff]  ;;  %v232_v11 = vld [vmem:[%s7075_s13 + $0x8] sm:$0xff]  ;;  %v233_v14 = vld [vmem:[%s7075_s13 + $0x10] sm:$0xff]  ;;  %s8268_s9 = scalar_lea.vmem %s9512_s5, %s5830_s7 }
  0x14   : > { %401 = vmatpush1.bf16.msra.mxu0 %v5845_v4  ;;  %v263_v13 = vpack.c.bf16 %v232_v11, %v231_v10  ;;  %v234_v15 = vld [vmem:[%s7075_s13 + $0x18] sm:$0xff]  ;;  %v235_v22 = vld [vmem:[%s7075_s13 + $0x20] sm:$0xff]  ;;  %v236_v23 = vld [vmem:[%s7075_s13 + $0x28] sm:$0xff] }
  0x15   : > { %2162 = vmatprep.subr.bf16.mxu0 %v5854_v9  ;;  %594 = vmatpush1.bf16.msra.mxu1 %v5851_v8  ;;  %v264_v16 = vpack.c.bf16 %v234_v15, %v233_v14  ;;  %v5860_v20 = vld [vmem:[%s9510_s3 + $0x3c] ss:$28 sps:$4 sm:$0xff]   ;;  %v5863_v24 = vld [vmem:[%s9510_s3 + $0x44] ss:$28 sps:$4 sm:$0xff]   ;;  %v5864_v25 = vld [vmem:[%s9510_s3 + $0x70] ss:$28 sps:$4 sm:$0xff]   ;;  %v265_v27 = vpack.c.bf16 %v236_v23, %v235_v22 }
  0x16   : > { %2548 = vmatprep.subr.bf16.mxu1 %v5857_v18  ;;  %v5866_v26 = vld [vmem:[%s9510_s3 + $0x74] ss:$28 sps:$4 sm:$0xff]   ;;  %v5869_v29 = vld [vmem:[%s9510_s3 + $0x7c] ss:$28 sps:$4 sm:$0xff]   ;;  %v5870_v30 = vld [vmem:[%s9510_s3 + $0xa8] ss:$28 sps:$4 sm:$0xff]  }
  0x17   : > { %5061 = vmatmul.mubr.msk.bf16.vlgmr.msra.gmra.mrb[0].mxu0 %vm349_vm0, %v263_v13  ;;  %v5867_v28 = vld [vmem:[%s9510_s3 + $0x78] ss:$28 sps:$4 sm:$0xff]   ;;  %v5872_v31 = vld [vmem:[%s9510_s3 + $0xac] ss:$28 sps:$4 sm:$0xff]   ;;  %v5878_v36 = vld [vmem:[%s9510_s3 + $0xe4] ss:$28 sps:$4 sm:$0xff]  }
  0x18   : > { %440 = vmatprep.mubr.bf16.mxu0 %v9517_v2  ;;  %2163 = vmatpush1.bf16.msra.mxu0 %v5852_v12  ;;  %v5875_v32 = vld [vmem:[%s9510_s3 + $0xb4] ss:$28 sps:$4 sm:$0xff]   ;;  %v238_v35 = vld [vmem:[%s7075_s13 + $0x38] sm:$0xff]  ;;  %v5881_v38 = vld [vmem:[%s9510_s3 + $0xec] ss:$28 sps:$4 sm:$0xff]  }
  0x19   : > { %5077 = vmatmul.mubr.msk.bf16.vlgmr.msra.gmra.mrb[0].mxu1 %vm349_vm0, %v263_v13  ;;  %2164 = vmatprep.subr.bf16.mxu0 %v5860_v20  ;;  %v237_v33 = vld [vmem:[%s7075_s13 + $0x30] sm:$0xff]  ;;  %v5876_v37 = vld [vmem:[%s9510_s3 + $0xe0] ss:$28 sps:$4 sm:$0xff]   ;;  %v5879_v40 = vld [vmem:[%s9510_s3 + $0xe8] ss:$28 sps:$4 sm:$0xff]  }
  0x1a   : > { %633 = vmatprep.mubr.bf16.mxu1 %v9517_v2  ;;  %2549 = vmatpush1.bf16.msra.mxu1 %v5855_v17  ;;  %v5873_v34 = vld [vmem:[%s9510_s3 + $0xb0] ss:$28 sps:$4 sm:$0xff]   ;;  %v266_v39 = vpack.c.bf16 %v238_v35, %v237_v33  ;;  %v5884_v41 = vld [vmem:[%s9510_s3 + $0x11c] ss:$28 sps:$4 sm:$0xff]   ;;  %v5887_v42 = vld [vmem:[%s9510_s3 + $0x124] ss:$28 sps:$4 sm:$0xff]  }
  0x1b   : > { %2550 = vmatprep.subr.bf16.mxu1 %v5863_v24  ;;  %v5882_v43 = vld [vmem:[%s9510_s3 + $0x118] ss:$28 sps:$4 sm:$0xff]   ;;  %v239_v45 = vld [vmem:[%s7075_s13 + $0x40] sm:$0xff]  ;;  %v240_v47 = vld [vmem:[%s7075_s13 + $0x48] sm:$0xff] }
  0x1c   : > { %2165 = vmatpush1.bf16.msra.mxu0 %v5858_v19  ;;  %v5890_v44 = vld [vmem:[%s9510_s3 + $0x154] ss:$28 sps:$4 sm:$0xff]   ;;  %v5885_v46 = vld [vmem:[%s9510_s3 + $0x120] ss:$28 sps:$4 sm:$0xff]   ;;  %v5896_v50 = vld [vmem:[%s9510_s3 + $0x18c] ss:$28 sps:$4 sm:$0xff]   ;;  %v267_v51 = vpack.c.bf16 %v240_v47, %v239_v45 }
  0x1d   : > { %2166 = vmatprep.subr.bf16.mxu0 %v5866_v26  ;;  %v5893_v48 = vld [vmem:[%s9510_s3 + $0x15c] ss:$28 sps:$4 sm:$0xff]   ;;  %v5888_v49 = vld [vmem:[%s9510_s3 + $0x150] ss:$28 sps:$4 sm:$0xff]   ;;  %v5894_v54 = vld [vmem:[%s9510_s3 + $0x188] ss:$28 sps:$4 sm:$0xff]  }
  0x1e   : > { %2551 = vmatpush1.bf16.msra.mxu1 %v5861_v21  ;;  %v5891_v52 = vld [vmem:[%s9510_s3 + $0x158] ss:$28 sps:$4 sm:$0xff]   ;;  %v5902_v55 = vld [vmem:[%s9510_s3 + $0x1c4] ss:$28 sps:$4 sm:$0xff]   ;;  %v5897_v57 = vld [vmem:[%s9510_s3 + $0x190] ss:$28 sps:$4 sm:$0xff]  }
  0x1f   : > { %5062 = vmatmul.mubr.msk.bf16.gmra.mrb[4].mxu0 %vm349_vm0, %v264_v16  ;;  %2552 = vmatprep.subr.bf16.mxu1 %v5869_v29  ;;  %v5899_v53 = vld [vmem:[%s9510_s3 + $0x194] ss:$28 sps:$4 sm:$0xff]   ;;  %v242_v58 = vld [vmem:[%s7075_s13 + $0x58] sm:$0xff]  ;;  %v5905_v59 = vld [vmem:[%s9510_s3 + $0x1cc] ss:$28 sps:$4 sm:$0xff]  }
  0x20   : > { %450 = vmatprep.mubr.bf16.mxu0 %v9517_v2  ;;  %2167 = vmatpush1.bf16.msra.mxu0 %v5864_v25  ;;  %v241_v56 = vld [vmem:[%s7075_s13 + $0x50] sm:$0xff]  ;;  %v5900_v60 = vld [vmem:[%s9510_s3 + $0x1c0] ss:$28 sps:$4 sm:$0xff]   ;;  %v5903_v63 = vld [vmem:[%s9510_s3 + $0x1c8] ss:$28 sps:$4 sm:$0xff]  }
  0x21   : > { %5078 = vmatmul.mubr.msk.bf16.gmra.mrb[4].mxu1 %vm349_vm0, %v264_v16  ;;  %2168 = vmatprep.subr.bf16.mxu0 %v5872_v31  ;;  %v5908_v61 = vld [vmem:[%s9510_s3 + $0x1fc] ss:$28 sps:$4 sm:$0xff]   ;;  %v268_v62 = vpack.c.bf16 %v242_v58, %v241_v56  ;;  %v5911_v0 = vld [vmem:[%s9510_s3 + $0x204] ss:$28 sps:$4 sm:$0xff]   ;;  %v5914_v3 = vld [vmem:[%s9510_s3 + $0x234] ss:$28 sps:$4 sm:$0xff]  }
  0x22   : > { %643 = vmatprep.mubr.bf16.mxu1 %v9517_v2  ;;  %2553 = vmatpush1.bf16.msra.mxu1 %v5867_v28  ;;  %v5906_v1 = vld [vmem:[%s9510_s3 + $0x1f8] ss:$28 sps:$4 sm:$0xff]   ;;  %v243_v4 = vld [vmem:[%s7075_s13 + $0x60] sm:$0xff]  ;;  %v244_v6 = vld [vmem:[%s7075_s13 + $0x68] sm:$0xff] }
  0x23   : > { %2554 = vmatprep.subr.bf16.mxu1 %v5875_v32  ;;  %v5909_v5 = vld [vmem:[%s9510_s3 + $0x200] ss:$28 sps:$4 sm:$0xff]   ;;  %v5912_v8 = vld [vmem:[%s9510_s3 + $0x230] ss:$28 sps:$4 sm:$0xff]   ;;  %v269_v10 = vpack.c.bf16 %v244_v6, %v243_v4  ;;  %v5915_v11 = vld [vmem:[%s9510_s3 + $0x238] ss:$28 sps:$4 sm:$0xff]  }
  0x24   : > { %2169 = vmatpush1.bf16.msra.mxu0 %v5870_v30  ;;  %v5917_v7 = vld [vmem:[%s9510_s3 + $0x23c] ss:$28 sps:$4 sm:$0xff]   ;;  %v5920_v9 = vld [vmem:[%s9510_s3 + $0x26c] ss:$28 sps:$4 sm:$0xff]   ;;  %v5923_v13 = vld [vmem:[%s9510_s3 + $0x274] ss:$28 sps:$4 sm:$0xff]  }
  0x25   : > { %2170 = vmatprep.subr.bf16.mxu0 %v5878_v36  ;;  %v5918_v12 = vld [vmem:[%s9510_s3 + $0x268] ss:$28 sps:$4 sm:$0xff]   ;;  %v5921_v14 = vld [vmem:[%s9510_s3 + $0x270] ss:$28 sps:$4 sm:$0xff]   ;;  %v246_v17 = vld [vmem:[%s7075_s13 + $0x78] sm:$0xff] }
  0x26   : > { %2555 = vmatpush1.bf16.msra.mxu1 %v5873_v34  ;;  %v5926_v15 = vld [vmem:[%s9510_s3 + $0x2a4] ss:$28 sps:$4 sm:$0xff]   ;;  %v245_v16 = vld [vmem:[%s7075_s13 + $0x70] sm:$0xff]  ;;  %v5929_v18 = vld [vmem:[%s9510_s3 + $0x2ac] ss:$28 sps:$4 sm:$0xff]  }
  0x27   : > { %5063 = vmatmul.mubr.msk.bf16.gmra.mrb[8].mxu0 %vm349_vm0, %v265_v27  ;;  %2556 = vmatprep.subr.bf16.mxu1 %v5881_v38  ;;  %v5924_v19 = vld [vmem:[%s9510_s3 + $0x2a0] ss:$28 sps:$4 sm:$0xff]   ;;  %v5927_v21 = vld [vmem:[%s9510_s3 + $0x2a8] ss:$28 sps:$4 sm:$0xff]   ;;  %v270_v23 = vpack.c.bf16 %v246_v17, %v245_v16  ;;  %v5930_v24 = vld [vmem:[%s9510_s3 + $0x2d8] ss:$28 sps:$4 sm:$0xff]  }
  0x28   : > { %460 = vmatprep.mubr.bf16.mxu0 %v9517_v2  ;;  %2171 = vmatpush1.bf16.msra.mxu0 %v5876_v37  ;;  %v5932_v20 = vld [vmem:[%s9510_s3 + $0x2dc] ss:$28 sps:$4 sm:$0xff]   ;;  %v5935_v22 = vld [vmem:[%s9510_s3 + $0x2e4] ss:$28 sps:$4 sm:$0xff]   ;;  %v5938_v25 = vld [vmem:[%s9510_s3 + $0x314] ss:$28 sps:$4 sm:$0xff]  }
  0x29   : > { %5079 = vmatmul.mubr.msk.bf16.gmra.mrb[8].mxu1 %vm349_vm0, %v265_v27  ;;  %2172 = vmatprep.subr.bf16.mxu0 %v5884_v41  ;;  %v5933_v26 = vld [vmem:[%s9510_s3 + $0x2e0] ss:$28 sps:$4 sm:$0xff]   ;;  %v248_v28 = vld [vmem:[%s7075_s13 + $0x88] sm:$0xff]  ;;  %v5939_v31 = vld [vmem:[%s9510_s3 + $0x318] ss:$28 sps:$4 sm:$0xff]  }
  0x2a   : > { %653 = vmatprep.mubr.bf16.mxu1 %v9517_v2  ;;  %2557 = vmatpush1.bf16.msra.mxu1 %v5879_v40  ;;  %v247_v27 = vld [vmem:[%s7075_s13 + $0x80] sm:$0xff]  ;;  %v5941_v29 = vld [vmem:[%s9510_s3 + $0x31c] ss:$28 sps:$4 sm:$0xff]   ;;  %v5936_v30 = vld [vmem:[%s9510_s3 + $0x310] ss:$28 sps:$4 sm:$0xff]  }
  0x2b   : > { %2558 = vmatprep.subr.bf16.mxu1 %v5887_v42  ;;  %v271_v32 = vpack.c.bf16 %v248_v28, %v247_v27  ;;  %v249_v33 = vld [vmem:[%s7075_s13 + $0x90] sm:$0xff]  ;;  %v250_v34 = vld [vmem:[%s7075_s13 + $0x98] sm:$0xff]  ;;  %v251_v36 = vld [vmem:[%s7075_s13 + $0xa0] sm:$0xff] }
  0x2c   : > { %2173 = vmatpush1.bf16.msra.mxu0 %v5882_v43  ;;  %v272_v35 = vpack.c.bf16 %v250_v34, %v249_v33  ;;  %v252_v37 = vld [vmem:[%s7075_s13 + $0xa8] sm:$0xff]  ;;  %v254_v40 = vld [vmem:[%s7075_s13 + $0xb8] sm:$0xff]  ;;  %v255_v42 = vld [vmem:[%s7075_s13 + $0xc0] sm:$0xff] }
  0x2d   : > { %2174 = vmatprep.subr.bf16.mxu0 %v5890_v44  ;;  %v273_v38 = vpack.c.bf16 %v252_v37, %v251_v36  ;;  %v256_v43 = vld [vmem:[%s7075_s13 + $0xc8] sm:$0xff]  ;;  %v5947_v45 = vld [vmem:[%s9510_s3 + $0x354] ss:$28 sps:$4 sm:$0xff]   ;;  %v262_v58 = vld [vmem:[%s7075_s13 + $0xf8] sm:$0xff] }
  0x2e   : > { %2559 = vmatpush1.bf16.msra.mxu1 %v5885_v46  ;;  %v5944_v44 = vld [vmem:[%s9510_s3 + $0x34c] ss:$28 sps:$4 sm:$0xff]   ;;  %v5948_v33 = vld [vmem:[%s9510_s3 + $0x380] ss:$28 sps:$4 sm:$0xff]  }
  0x2f   : > { %5064 = vmatmul.mubr.msk.bf16.gmra.mrb[12].mxu0 %vm349_vm0, %v266_v39  ;;  %2560 = vmatprep.subr.bf16.mxu1 %v5893_v48  ;;  %v5942_v46 = vld [vmem:[%s9510_s3 + $0x348] ss:$28 sps:$4 sm:$0xff]   ;;  %v5945_v47 = vld [vmem:[%s9510_s3 + $0x350] ss:$28 sps:$4 sm:$0xff]   ;;  %v275_v48 = vpack.c.bf16 %v256_v43, %v255_v42 }
  0x30   : > { %470 = vmatprep.mubr.bf16.mxu0 %v9517_v2  ;;  %2175 = vmatpush1.bf16.msra.mxu0 %v5888_v49  ;;  %v257_v49 = vld [vmem:[%s7075_s13 + $0xd0] sm:$0xff]  ;;  %v5951_v34 = vld [vmem:[%s9510_s3 + $0x388] ss:$28 sps:$4 sm:$0xff]  }
  0x31   : > { %5080 = vmatmul.mubr.msk.bf16.gmra.mrb[12].mxu1 %vm349_vm0, %v266_v39  ;;  %2176 = vmatprep.subr.bf16.mxu0 %v5896_v50  ;;  %v253_v39 = vld [vmem:[%s7075_s13 + $0xb0] sm:$0xff]  ;;  %v258_v50 = vld [vmem:[%s7075_s13 + $0xd8] sm:$0xff] }
  0x32   : > { %663 = vmatprep.mubr.bf16.mxu1 %v9517_v2  ;;  %2561 = vmatpush1.bf16.msra.mxu1 %v5891_v52  ;;  %v274_v41 = vpack.c.bf16 %v254_v40, %v253_v39  ;;  %v5953_v52 = vld [vmem:[%s9510_s3 + $0x38c] ss:$28 sps:$4 sm:$0xff]   ;;  %v5959_v39 = vld [vmem:[%s9510_s3 + $0x3c4] ss:$28 sps:$4 sm:$0xff]  }
  0x33   : > { %2562 = vmatprep.subr.bf16.mxu1 %v5899_v53  ;;  %v276_v53 = vpack.c.bf16 %v258_v50, %v257_v49  ;;  %v5957_v50 = vld [vmem:[%s9510_s3 + $0x3c0] ss:$28 sps:$4 sm:$0xff]  }
  0x34   : > { %2177 = vmatpush1.bf16.msra.mxu0 %v5894_v54  ;;  %v259_v54 = vld [vmem:[%s7075_s13 + $0xe0] sm:$0xff] }
  0x35   : > { %2178 = vmatprep.subr.bf16.mxu0 %v5902_v55  ;;  %v260_v55 = vld [vmem:[%s7075_s13 + $0xe8] sm:$0xff] }
  0x36   : > { %2563 = vmatpush1.bf16.msra.mxu1 %v5897_v57  ;;  %v277_v56 = vpack.c.bf16 %v260_v55, %v259_v54  ;;  %v261_v57 = vld [vmem:[%s7075_s13 + $0xf0] sm:$0xff] }
  0x37   : > { %5065 = vmatmul.mubr.msk.bf16.gmra.mrb[16].mxu0 %vm349_vm0, %v267_v51  ;;  %2564 = vmatprep.subr.bf16.mxu1 %v5905_v59  ;;  %v278_v59 = vpack.c.bf16 %v262_v58, %v261_v57 }
  0x38   : > { %480 = vmatprep.mubr.bf16.mxu0 %v9517_v2  ;;  %2179 = vmatpush1.bf16.msra.mxu0 %v5900_v60  ;;  %v289_v60 = vlaneseq }
  0x39   : > { %5081 = vmatmul.mubr.msk.bf16.gmra.mrb[16].mxu1 %vm349_vm0, %v267_v51  ;;  %2180 = vmatprep.subr.bf16.mxu0 %v5908_v61  ;;  %v5950_v51 = vld [vmem:[%s9510_s3 + $0x384] ss:$28 sps:$4 sm:$0xff]  }
  0x3a   : > { %673 = vmatprep.mubr.bf16.mxu1 %v9517_v2  ;;  %2565 = vmatpush1.bf16.msra.mxu1 %v5903_v63  ;;  %v7372_v61 = vshrl.u32 %v289_v60, 7  ;;  %v287_v63 = vld [vmem:[%s9509_s2] sm:$0xf] }
  0x3b   : > { %2566 = vmatprep.subr.bf16.mxu1 %v5911_v0 }
  0x3c   : > { %2181 = vmatpush1.bf16.msra.mxu0 %v5906_v1  ;;  %9588 = vst [vmem:[#allocation2_spill] sm:$0xff] %v7372_v61  ;;  %v9514_v0 = vsub.s32 1, %v7372_v61  ;;  %v9515_v1 = vsub.s32 2, %v7372_v61  ;;  %v9513_v4 = vsub.s32 3, %v7372_v61 }
  0x3d   : > { %2182 = vmatprep.subr.bf16.mxu0 %v5914_v3 }
  0x3e   : > { %2567 = vmatpush1.bf16.msra.mxu1 %v5909_v5  ;;  %v7387_v5 = vrot.slane %v287_v63, %v9514_v0 }
  0x3f   : > { %5066 = vmatmul.mubr.msk.bf16.gmra.mrb[20].mxu0 %vm349_vm0, %v268_v62  ;;  %2568 = vmatprep.subr.bf16.mxu1 %v5917_v7  ;;  %v7391_v7 = vrot.slane %v287_v63, %v9515_v1 }
  0x40   : > { %490 = vmatprep.mubr.bf16.mxu0 %v9517_v2  ;;  %2183 = vmatpush1.bf16.msra.mxu0 %v5912_v8 }
  0x41   : > { %5082 = vmatmul.mubr.msk.bf16.gmra.mrb[20].mxu1 %vm349_vm0, %v268_v62  ;;  %2184 = vmatprep.subr.bf16.mxu0 %v5920_v9  ;;  %v9516_v62 = vsub.s32 0, %v7372_v61 }
  0x42   : > { %683 = vmatprep.mubr.bf16.mxu1 %v9517_v2  ;;  %2569 = vmatpush1.bf16.msra.mxu1 %v5915_v11 }
  0x43   : > { %2570 = vmatprep.subr.bf16.mxu1 %v5923_v13  ;;  %v7382_v3 = vrot.slane %v287_v63, %v9516_v62 }
  0x44   : > { %2185 = vmatpush1.bf16.msra.mxu0 %v5918_v12 }
  0x45   : > { %2186 = vmatprep.subr.bf16.mxu0 %v5926_v15 }
  0x46   : > { %2571 = vmatpush1.bf16.msra.mxu1 %v5921_v14 }
  0x47   : > { %5067 = vmatmul.mubr.msk.bf16.gmra.mrb[24].mxu0 %vm349_vm0, %v269_v10  ;;  %2572 = vmatprep.subr.bf16.mxu1 %v5929_v18 }
  0x48   : > { %500 = vmatprep.mubr.bf16.mxu0 %v9517_v2  ;;  %2187 = vmatpush1.bf16.msra.mxu0 %v5924_v19 }
  0x49   : > { %5083 = vmatmul.mubr.msk.bf16.gmra.mrb[24].mxu1 %vm349_vm0, %v269_v10  ;;  %2188 = vmatprep.subr.bf16.mxu0 %v5932_v20  ;;  %v7396_v10 = vrot.slane %v287_v63, %v9513_v4 }
  0x4a   : > { %693 = vmatprep.mubr.bf16.mxu1 %v9517_v2  ;;  %2573 = vmatpush1.bf16.msra.mxu1 %v5927_v21 }
  0x4b   : > { %2574 = vmatprep.subr.bf16.mxu1 %v5935_v22 }
  0x4c   : > { %2189 = vmatpush1.bf16.msra.mxu0 %v5930_v24 }
  0x4d   : > { %2190 = vmatprep.subr.bf16.mxu0 %v5938_v25 }
  0x4e   : > { %2575 = vmatpush1.bf16.msra.mxu1 %v5933_v26 }
  0x4f   : > { %5068 = vmatmul.mubr.msk.bf16.gmra.mrb[28].mxu0 %vm349_vm0, %v270_v23  ;;  %2576 = vmatprep.subr.bf16.mxu1 %v5941_v29 }
  0x50   : > { %510 = vmatprep.mubr.bf16.mxu0 %v9517_v2  ;;  %2191 = vmatpush1.bf16.msra.mxu0 %v5936_v30 }
  0x51   : > { %5084 = vmatmul.mubr.msk.bf16.gmra.mrb[28].mxu1 %vm349_vm0, %v270_v23  ;;  %2192 = vmatprep.subr.bf16.mxu0 %v5944_v44 }
  0x52   : > { %703 = vmatprep.mubr.bf16.mxu1 %v9517_v2  ;;  %2577 = vmatpush1.bf16.msra.mxu1 %v5939_v31 }
  0x53   : > { %2578 = vmatprep.subr.bf16.mxu1 %v5947_v45 }
  0x54   : > { %2193 = vmatpush1.bf16.msra.mxu0 %v5942_v46  ;;  %v5954_v46 = vld [vmem:[%s9510_s3 + $0x3b8] ss:$28 sps:$4 sm:$0xff]  }
  0x55   : > { %2355 = vmatprep.subr.bf16.mxu0 %v5950_v51  ;;  %v5962_v51 = vld [vmem:[%s9510_s3 + $0x3f4] ss:$28 sps:$4 sm:$0xff]  }
  0x56   : > { %2579 = vmatpush1.bf16.msra.mxu1 %v5945_v47 }
  0x57   : > { %5069 = vmatmul.mubr.msk.bf16.gmra.mrb[32].mxu0 %vm349_vm0, %v271_v32  ;;  %2741 = vmatprep.subr.bf16.mxu1 %v5953_v52 }
  0x58   : > { %520 = vmatprep.mubr.bf16.mxu0 %v9517_v2 }
  0x59   : > { %5085 = vmatmul.mubr.msk.bf16.gmra.mrb[32].mxu1 %vm349_vm0, %v271_v32 }
  0x5a   : > { %713 = vmatprep.mubr.bf16.mxu1 %v9517_v2 }
  0x5f   : > { %5070 = vmatmul.mubr.msk.bf16.gmra.mrb[36].mxu0 %vm349_vm0, %v272_v35 }
  0x60   : > { %530 = vmatprep.mubr.bf16.mxu0 %v9517_v2 }
  0x61   : > { %5086 = vmatmul.mubr.msk.bf16.gmra.mrb[36].mxu1 %vm349_vm0, %v272_v35 }
  0x62   : > { %723 = vmatprep.mubr.bf16.mxu1 %v9517_v2 }
  0x67   : > { %5071 = vmatmul.mubr.msk.bf16.gmra.mrb[40].mxu0 %vm349_vm0, %v273_v38 }
  0x68   : > { %540 = vmatprep.mubr.bf16.mxu0 %v9517_v2 }
  0x69   : > { %5087 = vmatmul.mubr.msk.bf16.gmra.mrb[40].mxu1 %vm349_vm0, %v273_v38  ;;  %v5956_v38 = vld [vmem:[%s9510_s3 + $0x3bc] ss:$28 sps:$4 sm:$0xff]  }
  0x6a   : > { %733 = vmatprep.mubr.bf16.mxu1 %v9517_v2 }
  0x6f   : > { %5072 = vmatmul.mubr.msk.bf16.gmra.mrb[44].mxu0 %vm349_vm0, %v274_v41 }
  0x70   : > { %550 = vmatprep.mubr.bf16.mxu0 %v9517_v2 }
  0x71   : > { %5088 = vmatmul.mubr.msk.bf16.gmra.mrb[44].mxu1 %vm349_vm0, %v274_v41 }
  0x72   : > { %743 = vmatprep.mubr.bf16.mxu1 %v9517_v2 }
  0x77   : > { %5073 = vmatmul.mubr.msk.bf16.gmra.mrb[48].mxu0 %vm349_vm0, %v275_v48 }
  0x78   : > { %560 = vmatprep.mubr.bf16.mxu0 %v9517_v2 }
  0x79   : > { %5089 = vmatmul.mubr.msk.bf16.gmra.mrb[48].mxu1 %vm349_vm0, %v275_v48 }
  0x7a   : > { %753 = vmatprep.mubr.bf16.mxu1 %v9517_v2 }
  0x7f   : > { %5074 = vmatmul.mubr.msk.bf16.gmra.mrb[52].mxu0 %vm349_vm0, %v276_v53 }
  0x80   : > { %570 = vmatprep.mubr.bf16.mxu0 %v9517_v2 }
  0x81   : > { %5090 = vmatmul.mubr.msk.bf16.gmra.mrb[52].mxu1 %vm349_vm0, %v276_v53 }
  0x82   : > { %763 = vmatprep.mubr.bf16.mxu1 %v9517_v2 }
  0x87   : > { %5075 = vmatmul.mubr.msk.bf16.gmra.mrb[56].mxu0 %vm349_vm0, %v277_v56 }
  0x88   : > { %580 = vmatprep.mubr.bf16.mxu0 %v9517_v2 }
  0x89   : > { %5091 = vmatmul.mubr.msk.bf16.gmra.mrb[56].mxu1 %vm349_vm0, %v277_v56  ;;  %v5965_v56 = vld [vmem:[%s9510_s3 + $0x3fc] ss:$28 sps:$4 sm:$0xff]  }
  0x8a   : > { %773 = vmatprep.mubr.bf16.mxu1 %v9517_v2 }
  0x8f   : > { %5076 = vmatmul.mubr.msk.bf16.gmra.mrb[60].mxu0 %vm349_vm0, %v278_v59 }
  0x91   : > { %5092 = vmatmul.mubr.msk.bf16.gmra.mrb[60].mxu1 %vm349_vm0, %v278_v59 }
  0xea   : > { %v432_v6 = vpop.f32.mrb[0].mxu0 }
  0xeb   : > { %v433_v8 = vadd.f32 %v432_v6, %v7382_v3  ;;  %v434_v9 = vpop.f32.mrb[1].mxu0 }
  0xec   : > { %v435_v11 = vadd.f32 %v434_v9, %v7387_v5  ;;  %v436_v12 = vpop.f32.mrb[2].mxu0  ;;  %v625_v15 = vpop.f32.mrb[0].mxu1 }
  0xed   : > { %v437_v13 = vadd.f32 %v436_v12, %v7382_v3  ;;  %v438_v14 = vpop.f32.mrb[3].mxu0  ;;  %v626_v17 = vadd.f32 %v625_v15, %v7391_v7  ;;  %v627_v18 = vpop.f32.mrb[1].mxu1  ;;  %v784_v19 = vmax.f32 %v433_v8, 0.0  ;;  %v5960_v15 = vld [vmem:[%s9510_s3 + $0x3f0] ss:$28 sps:$4 sm:$0xff]  }
  0xee   : > { %v439_v16 = vadd.f32 %v438_v14, %v7387_v5  ;;  %v628_v21 = vadd.f32 %v627_v18, %v7396_v10  ;;  %v629_v22 = vpop.f32.mrb[2].mxu1  ;;  %v785_v23 = vmax.f32 %v435_v11, 0.0 }
  0xef   : > { %v788_v20 = vmax.f32 %v437_v13, 0.0  ;;  %v786_v25 = vmax.f32 %v626_v17, 0.0  ;;  %v630_v26 = vadd.f32 %v629_v22, %v7391_v7  ;;  %v631_v27 = vpop.f32.mrb[3].mxu1 }
  0xf0   : > { %v789_v24 = vmax.f32 %v439_v16, 0.0  ;;  %v787_v29 = vmax.f32 %v628_v21, 0.0  ;;  %v632_v30 = vadd.f32 %v631_v27, %v7396_v10  ;;  %v5963_v16 = vld [vmem:[%s9510_s3 + $0x3f8] ss:$28 sps:$4 sm:$0xff]  }
  0xf1   : > { %v7404_v28 = vpack.c.bf16 %v788_v20, %v784_v19  ;;  %v790_v35 = vmax.f32 %v630_v26, 0.0  ;;  %v5968_v20 = vld [vmem:[%s9510_s3 + $0x42c] ss:$28 sps:$4 sm:$0xff]   ;;  %v5971_v21 = vld [vmem:[%s9510_s3 + $0x434] ss:$28 sps:$4 sm:$0xff]  }
  0xf2   : > { %v7407_v31 = vpack.c.bf16 %v789_v24, %v785_v23  ;;  %v442_v32 = vpop.f32.mrb[4].mxu0  ;;  %v791_v40 = vmax.f32 %v632_v30, 0.0 }
  0xf3   : > { %v443_v36 = vadd.f32 %v442_v32, %v7382_v3  ;;  %v444_v37 = vpop.f32.mrb[5].mxu0  ;;  %v7425_v43 = vpack.c.bf16 %v790_v35, %v786_v25  ;;  %v5974_v35 = vld [vmem:[%s9510_s3 + $0x464] ss:$28 sps:$4 sm:$0xff]  }
  0xf4   : > { %v445_v41 = vadd.f32 %v444_v37, %v7387_v5  ;;  %v446_v42 = vpop.f32.mrb[6].mxu0  ;;  %2194 = vmatprep.mubr.bf16.mxu0 %v7407_v31  ;;  %2580 = vmatprep.mubr.bf16.mxu1 %v7407_v31  ;;  %v7433_v47 = vpack.c.bf16 %v791_v40, %v787_v29  ;;  %v635_v48 = vpop.f32.mrb[4].mxu1  ;;  %v5966_v29 = vld [vmem:[%s9510_s3 + $0x428] ss:$28 sps:$4 sm:$0xff]  }
  0xf5   : > { %v447_v44 = vadd.f32 %v446_v42, %v7382_v3  ;;  %v448_v45 = vpop.f32.mrb[7].mxu0  ;;  %2195 = vmatmul.mubr.bf16.vlgmr.msra.gmra.mrb[64].mxu0 %v7404_v28  ;;  %2581 = vmatmul.mubr.bf16.vlgmr.msra.gmra.mrb[64].mxu1 %v7404_v28  ;;  %v636_v52 = vadd.f32 %v635_v48, %v7391_v7  ;;  %v637_v53 = vpop.f32.mrb[5].mxu1  ;;  %v792_v54 = vmax.f32 %v443_v36, 0.0  ;;  %v5977_v40 = vld [vmem:[%s9510_s3 + $0x46c] ss:$28 sps:$4 sm:$0xff]  }
  0xf6   : > { %v449_v49 = vadd.f32 %v448_v45, %v7387_v5  ;;  %2356 = vmatpush1.bf16.msra.mxu0 %v5948_v33  ;;  %2742 = vmatpush1.bf16.msra.mxu1 %v5951_v34  ;;  %v638_v57 = vadd.f32 %v637_v53, %v7396_v10  ;;  %v639_v58 = vpop.f32.mrb[6].mxu1  ;;  %v793_v59 = vmax.f32 %v445_v41, 0.0  ;;  %v5969_v34 = vld [vmem:[%s9510_s3 + $0x430] ss:$28 sps:$4 sm:$0xff]  }
  0xf7   : > { %v796_v55 = vmax.f32 %v447_v44, 0.0  ;;  %2357 = vmatprep.subr.bf16.mxu0 %v5956_v38  ;;  %2743 = vmatprep.subr.bf16.mxu1 %v5959_v39  ;;  %v794_v63 = vmax.f32 %v636_v52, 0.0  ;;  %v640_v6 = vadd.f32 %v639_v58, %v7391_v7  ;;  %v641_v8 = vpop.f32.mrb[7].mxu1 }
  0xf8   : > { %v797_v60 = vmax.f32 %v449_v49, 0.0  ;;  %v795_v11 = vmax.f32 %v638_v57, 0.0  ;;  %v642_v12 = vadd.f32 %v641_v8, %v7396_v10 }
  0xf9   : > { %v7448_v9 = vpack.c.bf16 %v796_v55, %v792_v54  ;;  %v798_v17 = vmax.f32 %v640_v6, 0.0  ;;  %v5972_v55 = vld [vmem:[%s9510_s3 + $0x460] ss:$28 sps:$4 sm:$0xff]  }
  0xfa   : > { %v7451_v13 = vpack.c.bf16 %v797_v60, %v793_v59  ;;  %v452_v14 = vpop.f32.mrb[8].mxu0  ;;  %2358 = vmatpush1.bf16.msra.mxu0 %v5954_v46  ;;  %2744 = vmatpush1.bf16.msra.mxu1 %v5957_v50  ;;  %v799_v22 = vmax.f32 %v642_v12, 0.0  ;;  %v5980_v60 = vld [vmem:[%s9510_s3 + $0x49c] ss:$28 sps:$4 sm:$0xff]  }
  0xfb   : > { %v453_v18 = vadd.f32 %v452_v14, %v7382_v3  ;;  %v454_v19 = vpop.f32.mrb[9].mxu0  ;;  %2359 = vmatprep.subr.bf16.mxu0 %v5962_v51  ;;  %2745 = vmatprep.subr.bf16.mxu1 %v5965_v56  ;;  %v7469_v25 = vpack.c.bf16 %v798_v17, %v794_v63  ;;  %v5975_v56 = vld [vmem:[%s9510_s3 + $0x468] ss:$28 sps:$4 sm:$0xff]  }
  0xfc   : > { %v455_v23 = vadd.f32 %v454_v19, %v7387_v5  ;;  %v456_v24 = vpop.f32.mrb[10].mxu0  ;;  %2204 = vmatprep.mubr.bf16.mxu0 %v7451_v13  ;;  %2590 = vmatprep.mubr.bf16.mxu1 %v7451_v13  ;;  %v7477_v30 = vpack.c.bf16 %v799_v22, %v795_v11  ;;  %v645_v32 = vpop.f32.mrb[8].mxu1  ;;  %v5983_v63 = vld [vmem:[%s9510_s3 + $0x4a4] ss:$28 sps:$4 sm:$0xff]  }
  0xfd   : > { %v457_v26 = vadd.f32 %v456_v24, %v7382_v3  ;;  %v458_v27 = vpop.f32.mrb[11].mxu0  ;;  %2205 = vmatmul.mubr.bf16.gmra.mrb[68].mxu0 %v7448_v9  ;;  %2591 = vmatmul.mubr.bf16.gmra.mrb[68].mxu1 %v7448_v9  ;;  %v646_v36 = vadd.f32 %v645_v32, %v7391_v7  ;;  %v647_v37 = vpop.f32.mrb[9].mxu1  ;;  %v800_v38 = vmax.f32 %v453_v18, 0.0 }
  0xfe   : > { %v459_v33 = vadd.f32 %v458_v27, %v7387_v5  ;;  %2360 = vmatpush1.bf16.msra.mxu0 %v5960_v15  ;;  %2746 = vmatpush1.bf16.msra.mxu1 %v5963_v16  ;;  %v648_v41 = vadd.f32 %v647_v37, %v7396_v10  ;;  %v649_v42 = vpop.f32.mrb[10].mxu1  ;;  %v801_v44 = vmax.f32 %v455_v23, 0.0  ;;  %v5978_v16 = vld [vmem:[%s9510_s3 + $0x498] ss:$28 sps:$4 sm:$0xff]  }
  0xff   : > { %v804_v39 = vmax.f32 %v457_v26, 0.0  ;;  %2361 = vmatprep.subr.bf16.mxu0 %v5968_v20  ;;  %2747 = vmatprep.subr.bf16.mxu1 %v5971_v21  ;;  %v802_v46 = vmax.f32 %v646_v36, 0.0  ;;  %v650_v48 = vadd.f32 %v649_v42, %v7391_v7  ;;  %v651_v49 = vpop.f32.mrb[11].mxu1  ;;  %v5981_v20 = vld [vmem:[%s9510_s3 + $0x4a0] ss:$28 sps:$4 sm:$0xff]  }
 0x100   : > { %v805_v45 = vmax.f32 %v459_v33, 0.0  ;;  %v803_v51 = vmax.f32 %v648_v41, 0.0  ;;  %v652_v52 = vadd.f32 %v651_v49, %v7396_v10  ;;  %v5986_v21 = vld [vmem:[%s9510_s3 + $0x4d4] ss:$28 sps:$4 sm:$0xff]   ;;  %v5989_v27 = vld [vmem:[%s9510_s3 + $0x4dc] ss:$28 sps:$4 sm:$0xff]  }
 0x101   : > { %v7492_v50 = vpack.c.bf16 %v804_v39, %v800_v38  ;;  %v806_v57 = vmax.f32 %v650_v48, 0.0 }
 0x102   : > { %v7495_v53 = vpack.c.bf16 %v805_v45, %v801_v44  ;;  %v462_v54 = vpop.f32.mrb[12].mxu0  ;;  %2362 = vmatpush1.bf16.msra.mxu0 %v5966_v29  ;;  %2748 = vmatpush1.bf16.msra.mxu1 %v5969_v34  ;;  %v807_v6 = vmax.f32 %v652_v52, 0.0  ;;  %v5984_v44 = vld [vmem:[%s9510_s3 + $0x4d0] ss:$28 sps:$4 sm:$0xff]   ;;  %v5987_v45 = vld [vmem:[%s9510_s3 + $0x4d8] ss:$28 sps:$4 sm:$0xff]  }
 0x103   : > { %v463_v58 = vadd.f32 %v462_v54, %v7382_v3  ;;  %v464_v59 = vpop.f32.mrb[13].mxu0  ;;  %2363 = vmatprep.subr.bf16.mxu0 %v5974_v35  ;;  %2749 = vmatprep.subr.bf16.mxu1 %v5977_v40  ;;  %v7513_v12 = vpack.c.bf16 %v806_v57, %v802_v46  ;;  %v5995_v52 = vld [vmem:[%s9510_s3 + $0x514] ss:$28 sps:$4 sm:$0xff]  }
 0x104   : > { %v465_v8 = vadd.f32 %v464_v59, %v7387_v5  ;;  %v466_v11 = vpop.f32.mrb[14].mxu0  ;;  %2214 = vmatprep.mubr.bf16.mxu0 %v7495_v53  ;;  %2600 = vmatprep.mubr.bf16.mxu1 %v7495_v53  ;;  %v7521_v17 = vpack.c.bf16 %v807_v6, %v803_v51  ;;  %v655_v18 = vpop.f32.mrb[12].mxu1  ;;  %v5992_v51 = vld [vmem:[%s9510_s3 + $0x50c] ss:$28 sps:$4 sm:$0xff]  }
 0x105   : > { %v467_v14 = vadd.f32 %v466_v11, %v7382_v3  ;;  %v468_v15 = vpop.f32.mrb[15].mxu0  ;;  %2215 = vmatmul.mubr.bf16.gmra.mrb[72].mxu0 %v7492_v50  ;;  %2601 = vmatmul.mubr.bf16.gmra.mrb[72].mxu1 %v7492_v50  ;;  %v656_v22 = vadd.f32 %v655_v18, %v7391_v7  ;;  %v657_v23 = vpop.f32.mrb[13].mxu1  ;;  %v808_v24 = vmax.f32 %v463_v58, 0.0  ;;  %v5993_v11 = vld [vmem:[%s9510_s3 + $0x510] ss:$28 sps:$4 sm:$0xff]  }
 0x106   : > { %v469_v19 = vadd.f32 %v468_v15, %v7387_v5  ;;  %2364 = vmatpush1.bf16.msra.mxu0 %v5972_v55  ;;  %2750 = vmatpush1.bf16.msra.mxu1 %v5975_v56  ;;  %v658_v29 = vadd.f32 %v657_v23, %v7396_v10  ;;  %v659_v32 = vpop.f32.mrb[14].mxu1  ;;  %v809_v33 = vmax.f32 %v465_v8, 0.0  ;;  %v5998_v15 = vld [vmem:[%s9510_s3 + $0x544] ss:$28 sps:$4 sm:$0xff]  }
 0x107   : > { %v812_v26 = vmax.f32 %v467_v14, 0.0  ;;  %2365 = vmatprep.subr.bf16.mxu0 %v5980_v60  ;;  %2751 = vmatprep.subr.bf16.mxu1 %v5983_v63  ;;  %v810_v35 = vmax.f32 %v656_v22, 0.0  ;;  %v660_v36 = vadd.f32 %v659_v32, %v7391_v7  ;;  %v661_v37 = vpop.f32.mrb[15].mxu1  ;;  %v5990_v60 = vld [vmem:[%s9510_s3 + $0x508] ss:$28 sps:$4 sm:$0xff]  }
 0x108   : > { %v813_v34 = vmax.f32 %v469_v19, 0.0  ;;  %v811_v39 = vmax.f32 %v658_v29, 0.0  ;;  %v662_v40 = vadd.f32 %v661_v37, %v7396_v10  ;;  %v5996_v37 = vld [vmem:[%s9510_s3 + $0x540] ss:$28 sps:$4 sm:$0xff]  }
 0x109   : > { %v7536_v38 = vpack.c.bf16 %v812_v26, %v808_v24  ;;  %v814_v46 = vmax.f32 %v660_v36, 0.0 }
 0x10a   : > { %v7539_v41 = vpack.c.bf16 %v813_v34, %v809_v33  ;;  %v472_v42 = vpop.f32.mrb[16].mxu0  ;;  %2366 = vmatpush1.bf16.msra.mxu0 %v5978_v16  ;;  %2752 = vmatpush1.bf16.msra.mxu1 %v5981_v20  ;;  %v815_v54 = vmax.f32 %v662_v40, 0.0 }
 0x10b   : > { %v473_v48 = vadd.f32 %v472_v42, %v7382_v3  ;;  %v474_v49 = vpop.f32.mrb[17].mxu0  ;;  %2367 = vmatprep.subr.bf16.mxu0 %v5986_v21  ;;  %2753 = vmatprep.subr.bf16.mxu1 %v5989_v27  ;;  %v7557_v57 = vpack.c.bf16 %v814_v46, %v810_v35  ;;  %v6001_v21 = vld [vmem:[%s9510_s3 + $0x54c] ss:$28 sps:$4 sm:$0xff]   ;;  %v6004_v46 = vld [vmem:[%s9510_s3 + $0x14] ss:$28 sps:$4 sm:$0xff]  }
 0x10c   : > { %v475_v55 = vadd.f32 %v474_v49, %v7387_v5  ;;  %v476_v56 = vpop.f32.mrb[18].mxu0  ;;  %2224 = vmatprep.mubr.bf16.mxu0 %v7539_v41  ;;  %2610 = vmatprep.mubr.bf16.mxu1 %v7539_v41  ;;  %v7565_v63 = vpack.c.bf16 %v815_v54, %v811_v39  ;;  %v665_v6 = vpop.f32.mrb[16].mxu1  ;;  %v5999_v39 = vld [vmem:[%s9510_s3 + $0x548] ss:$28 sps:$4 sm:$0xff]  }
 0x10d   : > { %v477_v58 = vadd.f32 %v476_v56, %v7382_v3  ;;  %v478_v59 = vpop.f32.mrb[19].mxu0  ;;  %2225 = vmatmul.mubr.bf16.gmra.mrb[76].mxu0 %v7536_v38  ;;  %2611 = vmatmul.mubr.bf16.gmra.mrb[76].mxu1 %v7536_v38  ;;  %v666_v14 = vadd.f32 %v665_v6, %v7391_v7  ;;  %v667_v16 = vpop.f32.mrb[17].mxu1  ;;  %v816_v18 = vmax.f32 %v473_v48, 0.0  ;;  %v6005_v48 = vld [vmem:[%s9510_s3 + $0x1d8] ss:$28 sps:$4 sm:$0xff]  }
 0x10e   : > { %v479_v8 = vadd.f32 %v478_v59, %v7387_v5  ;;  %2368 = vmatpush1.bf16.msra.mxu0 %v5984_v44  ;;  %2754 = vmatpush1.bf16.msra.mxu1 %v5987_v45  ;;  %v668_v20 = vadd.f32 %v667_v16, %v7396_v10  ;;  %v669_v22 = vpop.f32.mrb[18].mxu1  ;;  %v817_v23 = vmax.f32 %v475_v55, 0.0 }
 0x10f   : > { %v820_v19 = vmax.f32 %v477_v58, 0.0  ;;  %2369 = vmatprep.subr.bf16.mxu0 %v5992_v51  ;;  %2755 = vmatprep.subr.bf16.mxu1 %v5995_v52  ;;  %v818_v26 = vmax.f32 %v666_v14, 0.0  ;;  %v670_v27 = vadd.f32 %v669_v22, %v7391_v7  ;;  %v671_v29 = vpop.f32.mrb[19].mxu1 }
 0x110   : > { %v821_v24 = vmax.f32 %v479_v8, 0.0  ;;  %v819_v33 = vmax.f32 %v668_v20, 0.0  ;;  %v672_v34 = vadd.f32 %v671_v29, %v7396_v10 }
 0x111   : > { %v7580_v32 = vpack.c.bf16 %v820_v19, %v816_v18  ;;  %v822_v40 = vmax.f32 %v670_v27, 0.0 }
 0x112   : > { %v7583_v35 = vpack.c.bf16 %v821_v24, %v817_v23  ;;  %v482_v36 = vpop.f32.mrb[20].mxu0  ;;  %2370 = vmatpush1.bf16.msra.mxu0 %v5990_v60  ;;  %2756 = vmatpush1.bf16.msra.mxu1 %v5993_v11  ;;  %v823_v45 = vmax.f32 %v672_v34, 0.0 }
 0x113   : > { %v483_v42 = vadd.f32 %v482_v36, %v7382_v3  ;;  %v484_v44 = vpop.f32.mrb[21].mxu0  ;;  %2371 = vmatprep.subr.bf16.mxu0 %v5998_v15  ;;  %2757 = vmatprep.subr.bf16.mxu1 %v6001_v21  ;;  %v7601_v52 = vpack.c.bf16 %v822_v40, %v818_v26 }
 0x114   : > { %v485_v49 = vadd.f32 %v484_v44, %v7387_v5  ;;  %v486_v51 = vpop.f32.mrb[22].mxu0  ;;  %2234 = vmatprep.mubr.bf16.mxu0 %v7583_v35  ;;  %2620 = vmatprep.mubr.bf16.mxu1 %v7583_v35  ;;  %v7606_v56 = vpack.c.bf16 %v823_v45, %v819_v33  ;;  %v675_v58 = vpop.f32.mrb[20].mxu1 }
 0x115   : > { %v487_v54 = vadd.f32 %v486_v51, %v7382_v3  ;;  %v488_v55 = vpop.f32.mrb[23].mxu0  ;;  %2235 = vmatmul.mubr.bf16.gmra.mrb[80].mxu0 %v7580_v32  ;;  %2621 = vmatmul.mubr.bf16.gmra.mrb[80].mxu1 %v7580_v32  ;;  %v676_v60 = vadd.f32 %v675_v58, %v7391_v7  ;;  %v677_v6 = vpop.f32.mrb[21].mxu1  ;;  %v824_v8 = vmax.f32 %v483_v42, 0.0 }
 0x116   : > { %v489_v59 = vadd.f32 %v488_v55, %v7387_v5  ;;  %2372 = vmatpush1.bf16.msra.mxu0 %v5996_v37  ;;  %2758 = vmatpush1.bf16.msra.mxu1 %v5999_v39  ;;  %v678_v14 = vadd.f32 %v677_v6, %v7396_v10  ;;  %v679_v15 = vpop.f32.mrb[22].mxu1  ;;  %v825_v16 = vmax.f32 %v485_v49, 0.0 }
 0x117   : > { %v828_v11 = vmax.f32 %v487_v54, 0.0  ;;  %2934 = vmatprep.subr.bf16.mxu0 %v6004_v46  ;;  %5334 = vmatprep.subr.bf16.mxu1 %v6005_v48  ;;  %v826_v19 = vmax.f32 %v676_v60, 0.0  ;;  %v680_v20 = vadd.f32 %v679_v15, %v7391_v7  ;;  %v681_v21 = vpop.f32.mrb[23].mxu1 }
 0x118   : > { %v829_v18 = vmax.f32 %v489_v59, 0.0  ;;  %v827_v23 = vmax.f32 %v678_v14, 0.0  ;;  %v682_v24 = vadd.f32 %v681_v21, %v7396_v10 }
 0x119   : > { %v7612_v22 = vpack.c.bf16 %v828_v11, %v824_v8  ;;  %v830_v29 = vmax.f32 %v680_v20, 0.0 }
 0x11a   : > { %v7615_v26 = vpack.c.bf16 %v829_v18, %v825_v16  ;;  %v492_v27 = vpop.f32.mrb[24].mxu0  ;;  %v831_v36 = vmax.f32 %v682_v24, 0.0 }
 0x11b   : > { %9589 = vst [vmem:[#allocation3_spill] sm:$0xff] %v7612_v22  ;;  %v493_v33 = vadd.f32 %v492_v27, %v7382_v3  ;;  %v494_v34 = vpop.f32.mrb[25].mxu0  ;;  %v7621_v40 = vpack.c.bf16 %v830_v29, %v826_v19 }
 0x11c   : > { %v495_v37 = vadd.f32 %v494_v34, %v7387_v5  ;;  %v496_v39 = vpop.f32.mrb[26].mxu0  ;;  %2244 = vmatprep.mubr.bf16.mxu0 %v7615_v26  ;;  %2630 = vmatprep.mubr.bf16.mxu1 %v7615_v26  ;;  %v7626_v45 = vpack.c.bf16 %v831_v36, %v827_v23  ;;  %v685_v46 = vpop.f32.mrb[24].mxu1 }
 0x11d   : > { %v497_v42 = vadd.f32 %v496_v39, %v7382_v3  ;;  %v498_v44 = vpop.f32.mrb[27].mxu0  ;;  %2245 = vmatmul.mubr.bf16.gmra.mrb[84].mxu0 %v7612_v22  ;;  %2631 = vmatmul.mubr.bf16.gmra.mrb[84].mxu1 %v7612_v22  ;;  %v686_v49 = vadd.f32 %v685_v46, %v7391_v7  ;;  %v687_v51 = vpop.f32.mrb[25].mxu1  ;;  %v832_v54 = vmax.f32 %v493_v33, 0.0 }
 0x11e   : > { %v499_v48 = vadd.f32 %v498_v44, %v7387_v5  ;;  %v688_v58 = vadd.f32 %v687_v51, %v7396_v10  ;;  %v689_v59 = vpop.f32.mrb[26].mxu1  ;;  %v833_v60 = vmax.f32 %v495_v37, 0.0 }
 0x11f   : > { %v836_v55 = vmax.f32 %v497_v42, 0.0  ;;  %v834_v8 = vmax.f32 %v686_v49, 0.0  ;;  %v690_v11 = vadd.f32 %v689_v59, %v7391_v7  ;;  %v691_v14 = vpop.f32.mrb[27].mxu1 }
 0x120   : > { %v837_v6 = vmax.f32 %v499_v48, 0.0  ;;  %v835_v16 = vmax.f32 %v688_v58, 0.0  ;;  %v692_v18 = vadd.f32 %v691_v14, %v7396_v10 }
 0x121   : > { %v7632_v15 = vpack.c.bf16 %v836_v55, %v832_v54  ;;  %v838_v21 = vmax.f32 %v690_v11, 0.0 }
 0x122   : > { %v7635_v19 = vpack.c.bf16 %v837_v6, %v833_v60  ;;  %v502_v20 = vpop.f32.mrb[28].mxu0  ;;  %v839_v27 = vmax.f32 %v692_v18, 0.0 }
 0x123   : > { %9590 = vst [vmem:[#allocation4_spill] sm:$0xff] %v7632_v15  ;;  %v503_v23 = vadd.f32 %v502_v20, %v7382_v3  ;;  %v504_v24 = vpop.f32.mrb[29].mxu0  ;;  %v7641_v34 = vpack.c.bf16 %v838_v21, %v834_v8 }
 0x124   : > { %9591 = vst [vmem:[#allocation5_spill] sm:$0xff] %v7635_v19  ;;  %v505_v29 = vadd.f32 %v504_v24, %v7387_v5  ;;  %v506_v33 = vpop.f32.mrb[30].mxu0  ;;  %2254 = vmatprep.mubr.bf16.mxu0 %v7635_v19  ;;  %2640 = vmatprep.mubr.bf16.mxu1 %v7635_v19  ;;  %v7646_v39 = vpack.c.bf16 %v839_v27, %v835_v16  ;;  %v695_v42 = vpop.f32.mrb[28].mxu1 }
 0x125   : > { %v507_v36 = vadd.f32 %v506_v33, %v7382_v3  ;;  %v508_v37 = vpop.f32.mrb[31].mxu0  ;;  %2255 = vmatmul.mubr.bf16.gmra.mrb[88].mxu0 %v7632_v15  ;;  %2641 = vmatmul.mubr.bf16.gmra.mrb[88].mxu1 %v7632_v15  ;;  %v696_v46 = vadd.f32 %v695_v42, %v7391_v7  ;;  %v697_v48 = vpop.f32.mrb[29].mxu1  ;;  %v840_v49 = vmax.f32 %v503_v23, 0.0 }
 0x126   : > { %v509_v44 = vadd.f32 %v508_v37, %v7387_v5  ;;  %v698_v54 = vadd.f32 %v697_v48, %v7396_v10  ;;  %v699_v55 = vpop.f32.mrb[30].mxu1  ;;  %v841_v58 = vmax.f32 %v505_v29, 0.0 }
 0x127   : > { %v844_v51 = vmax.f32 %v507_v36, 0.0  ;;  %v842_v60 = vmax.f32 %v696_v46, 0.0  ;;  %v700_v6 = vadd.f32 %v699_v55, %v7391_v7  ;;  %v701_v8 = vpop.f32.mrb[31].mxu1 }
 0x128   : > { %v845_v59 = vmax.f32 %v509_v44, 0.0  ;;  %v843_v14 = vmax.f32 %v698_v54, 0.0  ;;  %v702_v16 = vadd.f32 %v701_v8, %v7396_v10 }
 0x129   : > { %v7652_v11 = vpack.c.bf16 %v844_v51, %v840_v49  ;;  %v846_v21 = vmax.f32 %v700_v6, 0.0 }
 0x12a   : > { %v7655_v18 = vpack.c.bf16 %v845_v59, %v841_v58  ;;  %v512_v20 = vpop.f32.mrb[32].mxu0  ;;  %v847_v27 = vmax.f32 %v702_v16, 0.0 }
 0x12b   : > { %9592 = vst [vmem:[#allocation6_spill] sm:$0xff] %v7652_v11  ;;  %v513_v23 = vadd.f32 %v512_v20, %v7382_v3  ;;  %v514_v24 = vpop.f32.mrb[33].mxu0  ;;  %v7661_v36 = vpack.c.bf16 %v846_v21, %v842_v60 }
 0x12c   : > { %9593 = vst [vmem:[#allocation7_spill] sm:$0xff] %v7655_v18  ;;  %v515_v29 = vadd.f32 %v514_v24, %v7387_v5  ;;  %v516_v33 = vpop.f32.mrb[34].mxu0  ;;  %2264 = vmatprep.mubr.bf16.mxu0 %v7655_v18  ;;  %2650 = vmatprep.mubr.bf16.mxu1 %v7655_v18  ;;  %v7666_v44 = vpack.c.bf16 %v847_v27, %v843_v14  ;;  %v705_v46 = vpop.f32.mrb[32].mxu1 }
 0x12d   : > { %v517_v37 = vadd.f32 %v516_v33, %v7382_v3  ;;  %v518_v42 = vpop.f32.mrb[35].mxu0  ;;  %2265 = vmatmul.mubr.bf16.gmra.mrb[92].mxu0 %v7652_v11  ;;  %2651 = vmatmul.mubr.bf16.gmra.mrb[92].mxu1 %v7652_v11  ;;  %v706_v49 = vadd.f32 %v705_v46, %v7391_v7  ;;  %v707_v51 = vpop.f32.mrb[33].mxu1  ;;  %v848_v54 = vmax.f32 %v513_v23, 0.0 }
 0x12e   : > { %v519_v48 = vadd.f32 %v518_v42, %v7387_v5  ;;  %v708_v58 = vadd.f32 %v707_v51, %v7396_v10  ;;  %v709_v59 = vpop.f32.mrb[34].mxu1  ;;  %v849_v60 = vmax.f32 %v515_v29, 0.0 }
 0x12f   : > { %v852_v55 = vmax.f32 %v517_v37, 0.0  ;;  %v850_v8 = vmax.f32 %v706_v49, 0.0  ;;  %v710_v16 = vadd.f32 %v709_v59, %v7391_v7  ;;  %v711_v20 = vpop.f32.mrb[35].mxu1 }
 0x130   : > { %v853_v6 = vmax.f32 %v519_v48, 0.0  ;;  %v851_v14 = vmax.f32 %v708_v58, 0.0  ;;  %v712_v24 = vadd.f32 %v711_v20, %v7396_v10 }
 0x131   : > { %v7672_v21 = vpack.c.bf16 %v852_v55, %v848_v54  ;;  %v854_v42 = vmax.f32 %v710_v16, 0.0 }
 0x132   : > { %v7675_v27 = vpack.c.bf16 %v853_v6, %v849_v60  ;;  %v522_v33 = vpop.f32.mrb[36].mxu0  ;;  %v855_v46 = vmax.f32 %v712_v24, 0.0 }
 0x133   : > { %9594 = vst [vmem:[#allocation8_spill] sm:$0xff] %v7672_v21  ;;  %v523_v23 = vadd.f32 %v522_v33, %v7382_v3  ;;  %v524_v37 = vpop.f32.mrb[37].mxu0  ;;  %v7681_v49 = vpack.c.bf16 %v854_v42, %v850_v8 }
 0x134   : > { %9595 = vst [vmem:[#allocation9_spill] sm:$0xff] %v7675_v27  ;;  %v525_v29 = vadd.f32 %v524_v37, %v7387_v5  ;;  %v526_v48 = vpop.f32.mrb[38].mxu0  ;;  %2274 = vmatprep.mubr.bf16.mxu0 %v7675_v27  ;;  %2660 = vmatprep.mubr.bf16.mxu1 %v7675_v27  ;;  %v7686_v55 = vpack.c.bf16 %v855_v46, %v851_v14  ;;  %v715_v58 = vpop.f32.mrb[36].mxu1 }
 0x135   : > { %v527_v51 = vadd.f32 %v526_v48, %v7382_v3  ;;  %v528_v54 = vpop.f32.mrb[39].mxu0  ;;  %2275 = vmatmul.mubr.bf16.gmra.mrb[96].mxu0 %v7672_v21  ;;  %2661 = vmatmul.mubr.bf16.gmra.mrb[96].mxu1 %v7672_v21  ;;  %v716_v60 = vadd.f32 %v715_v58, %v7391_v7  ;;  %v717_v6 = vpop.f32.mrb[37].mxu1  ;;  %v856_v16 = vmax.f32 %v523_v23, 0.0 }
 0x136   : > { %v529_v59 = vadd.f32 %v528_v54, %v7387_v5  ;;  %v718_v8 = vadd.f32 %v717_v6, %v7396_v10  ;;  %v719_v24 = vpop.f32.mrb[38].mxu1  ;;  %v857_v33 = vmax.f32 %v525_v29, 0.0 }
 0x137   : > { %v860_v20 = vmax.f32 %v527_v51, 0.0  ;;  %v858_v37 = vmax.f32 %v716_v60, 0.0  ;;  %v720_v48 = vadd.f32 %v719_v24, %v7391_v7  ;;  %v721_v4 = vpop.f32.mrb[39].mxu1 }
 0x138   : > { %v861_v42 = vmax.f32 %v529_v59, 0.0  ;;  %v859_v14 = vmax.f32 %v718_v8, 0.0  ;;  %v722_v46 = vadd.f32 %v721_v4, %v7396_v10 }
 0x139   : > { %v7692_v0 = vpack.c.bf16 %v860_v20, %v856_v16  ;;  %v862_v1 = vmax.f32 %v720_v48, 0.0 }
 0x13a   : > { %v7695_v54 = vpack.c.bf16 %v861_v42, %v857_v33  ;;  %v532_v58 = vpop.f32.mrb[40].mxu0  ;;  %v863_v6 = vmax.f32 %v722_v46, 0.0 }
 0x13b   : > { %9596 = vst [vmem:[#allocation10_spill] sm:$0xff] %v7692_v0  ;;  %v533_v23 = vadd.f32 %v532_v58, %v7382_v3  ;;  %v534_v51 = vpop.f32.mrb[41].mxu0  ;;  %v7701_v60 = vpack.c.bf16 %v862_v1, %v858_v37 }
 0x13c   : > { %9597 = vst [vmem:[#allocation11_spill] sm:$0xff] %v7695_v54  ;;  %v535_v29 = vadd.f32 %v534_v51, %v7387_v5  ;;  %v536_v59 = vpop.f32.mrb[42].mxu0  ;;  %2284 = vmatprep.mubr.bf16.mxu0 %v7695_v54  ;;  %2670 = vmatprep.mubr.bf16.mxu1 %v7695_v54  ;;  %v7706_v20 = vpack.c.bf16 %v863_v6, %v859_v14  ;;  %v725_v8 = vpop.f32.mrb[40].mxu1 }
 0x13d   : > { %9598 = vst [vmem:[#allocation12_spill] sm:$0xff] %v7701_v60  ;;  %v537_v16 = vadd.f32 %v536_v59, %v7382_v3  ;;  %v538_v4 = vpop.f32.mrb[43].mxu0  ;;  %2285 = vmatmul.mubr.bf16.gmra.mrb[100].mxu0 %v7692_v0  ;;  %2671 = vmatmul.mubr.bf16.gmra.mrb[100].mxu1 %v7692_v0  ;;  %v726_v33 = vadd.f32 %v725_v8, %v7391_v7  ;;  %v727_v42 = vpop.f32.mrb[41].mxu1  ;;  %v864_v48 = vmax.f32 %v533_v23, 0.0 }
 0x13e   : > { %9599 = vst [vmem:[#allocation13_spill] sm:$0xff] %v7706_v20  ;;  %v539_v24 = vadd.f32 %v538_v4, %v7387_v5  ;;  %v728_v1 = vadd.f32 %v727_v42, %v7396_v10  ;;  %v729_v37 = vpop.f32.mrb[42].mxu1  ;;  %v865_v58 = vmax.f32 %v535_v29, 0.0 }
 0x13f   : > { %v868_v46 = vmax.f32 %v537_v16, 0.0  ;;  %v866_v59 = vmax.f32 %v726_v33, 0.0  ;;  %v730_v62 = vadd.f32 %v729_v37, %v7391_v7  ;;  %v731_v2 = vpop.f32.mrb[43].mxu1 }
 0x140   : > { %v869_v51 = vmax.f32 %v539_v24, 0.0  ;;  %v867_v14 = vmax.f32 %v728_v1, 0.0  ;;  %v732_v6 = vadd.f32 %v731_v2, %v7396_v10 }
 0x141   : > { %v7712_v61 = vpack.c.bf16 %v868_v46, %v864_v48  ;;  %v870_v0 = vmax.f32 %v730_v62, 0.0 }
 0x142   : > { %v7715_v4 = vpack.c.bf16 %v869_v51, %v865_v58  ;;  %v542_v8 = vpop.f32.mrb[44].mxu0  ;;  %v871_v42 = vmax.f32 %v732_v6, 0.0 }
 0x143   : > { %9600 = vst [vmem:[#allocation14_spill] sm:$0xff] %v7712_v61  ;;  %v543_v23 = vadd.f32 %v542_v8, %v7382_v3  ;;  %v544_v16 = vpop.f32.mrb[45].mxu0  ;;  %v7721_v33 = vpack.c.bf16 %v870_v0, %v866_v59 }
 0x144   : > { %9601 = vst [vmem:[#allocation15_spill] sm:$0xff] %v7715_v4  ;;  %v545_v29 = vadd.f32 %v544_v16, %v7387_v5  ;;  %v546_v24 = vpop.f32.mrb[46].mxu0  ;;  %2294 = vmatprep.mubr.bf16.mxu0 %v7715_v4  ;;  %2680 = vmatprep.mubr.bf16.mxu1 %v7715_v4  ;;  %v7726_v62 = vpack.c.bf16 %v871_v42, %v867_v14  ;;  %v735_v46 = vpop.f32.mrb[44].mxu1 }
 0x145   : > { %9602 = vst [vmem:[#allocation16_spill] sm:$0xff] %v7721_v33  ;;  %v547_v48 = vadd.f32 %v546_v24, %v7382_v3  ;;  %v548_v2 = vpop.f32.mrb[47].mxu0  ;;  %2295 = vmatmul.mubr.bf16.gmra.mrb[104].mxu0 %v7712_v61  ;;  %2681 = vmatmul.mubr.bf16.gmra.mrb[104].mxu1 %v7712_v61  ;;  %v736_v37 = vadd.f32 %v735_v46, %v7391_v7  ;;  %v737_v58 = vpop.f32.mrb[45].mxu1  ;;  %v872_v51 = vmax.f32 %v543_v23, 0.0 }
 0x146   : > { %9603 = vst [vmem:[#allocation17_spill] sm:$0xff] %v7726_v62  ;;  %v549_v1 = vadd.f32 %v548_v2, %v7387_v5  ;;  %v738_v0 = vadd.f32 %v737_v58, %v7396_v10  ;;  %v739_v59 = vpop.f32.mrb[46].mxu1  ;;  %v873_v8 = vmax.f32 %v545_v29, 0.0 }
 0x147   : > { %v876_v6 = vmax.f32 %v547_v48, 0.0  ;;  %v874_v24 = vmax.f32 %v736_v37, 0.0  ;;  %v740_v4 = vadd.f32 %v739_v59, %v7391_v7  ;;  %v741_v54 = vpop.f32.mrb[47].mxu1 }
 0x148   : > { %v877_v16 = vmax.f32 %v549_v1, 0.0  ;;  %v875_v14 = vmax.f32 %v738_v0, 0.0  ;;  %v742_v42 = vadd.f32 %v741_v54, %v7396_v10 }
 0x149   : > { %v7732_v61 = vpack.c.bf16 %v876_v6, %v872_v51  ;;  %v878_v21 = vmax.f32 %v740_v4, 0.0 }
 0x14a   : > { %v7735_v2 = vpack.c.bf16 %v877_v16, %v873_v8  ;;  %v552_v46 = vpop.f32.mrb[48].mxu0  ;;  %v879_v58 = vmax.f32 %v742_v42, 0.0 }
 0x14b   : > { %9604 = vst [vmem:[#allocation18_spill] sm:$0xff] %v7732_v61  ;;  %v553_v23 = vadd.f32 %v552_v46, %v7382_v3  ;;  %v554_v48 = vpop.f32.mrb[49].mxu0  ;;  %v7741_v37 = vpack.c.bf16 %v878_v21, %v874_v24 }
 0x14c   : > { %9605 = vst [vmem:[#allocation19_spill] sm:$0xff] %v7735_v2  ;;  %v555_v29 = vadd.f32 %v554_v48, %v7387_v5  ;;  %v556_v1 = vpop.f32.mrb[50].mxu0  ;;  %2304 = vmatprep.mubr.bf16.mxu0 %v7735_v2  ;;  %2690 = vmatprep.mubr.bf16.mxu1 %v7735_v2  ;;  %v7746_v4 = vpack.c.bf16 %v879_v58, %v875_v14  ;;  %v745_v6 = vpop.f32.mrb[48].mxu1 }
 0x14d   : > { %9606 = vst [vmem:[#allocation20_spill] sm:$0xff] %v7741_v37  ;;  %v557_v51 = vadd.f32 %v556_v1, %v7382_v3  ;;  %v558_v54 = vpop.f32.mrb[51].mxu0  ;;  %2305 = vmatmul.mubr.bf16.gmra.mrb[108].mxu0 %v7732_v61  ;;  %2691 = vmatmul.mubr.bf16.gmra.mrb[108].mxu1 %v7732_v61  ;;  %v746_v59 = vadd.f32 %v745_v6, %v7391_v7  ;;  %v747_v8 = vpop.f32.mrb[49].mxu1  ;;  %v880_v16 = vmax.f32 %v553_v23, 0.0 }
 0x14e   : > { %9607 = vst [vmem:[#allocation21_spill] sm:$0xff] %v7746_v4  ;;  %v559_v0 = vadd.f32 %v558_v54, %v7387_v5  ;;  %v748_v21 = vadd.f32 %v747_v8, %v7396_v10  ;;  %v749_v24 = vpop.f32.mrb[50].mxu1  ;;  %v881_v46 = vmax.f32 %v555_v29, 0.0 }
 0x14f   : > { %v884_v42 = vmax.f32 %v557_v51, 0.0  ;;  %v882_v1 = vmax.f32 %v746_v59, 0.0  ;;  %v750_v2 = vadd.f32 %v749_v24, %v7391_v7  ;;  %v751_v27 = vpop.f32.mrb[51].mxu1 }
 0x150   : > { %v885_v48 = vmax.f32 %v559_v0, 0.0  ;;  %v883_v14 = vmax.f32 %v748_v21, 0.0  ;;  %v752_v58 = vadd.f32 %v751_v27, %v7396_v10 }
 0x151   : > { %v7752_v61 = vpack.c.bf16 %v884_v42, %v880_v16  ;;  %v886_v11 = vmax.f32 %v750_v2, 0.0 }
 0x152   : > { %v7755_v54 = vpack.c.bf16 %v885_v48, %v881_v46  ;;  %v562_v6 = vpop.f32.mrb[52].mxu0  ;;  %v887_v8 = vmax.f32 %v752_v58, 0.0 }
 0x153   : > { %9608 = vst [vmem:[#allocation22_spill] sm:$0xff] %v7752_v61  ;;  %v563_v23 = vadd.f32 %v562_v6, %v7382_v3  ;;  %v564_v51 = vpop.f32.mrb[53].mxu0  ;;  %v7761_v59 = vpack.c.bf16 %v886_v11, %v882_v1 }
 0x154   : > { %9609 = vst [vmem:[#allocation23_spill] sm:$0xff] %v7755_v54  ;;  %v565_v29 = vadd.f32 %v564_v51, %v7387_v5  ;;  %v566_v0 = vpop.f32.mrb[54].mxu0  ;;  %2314 = vmatprep.mubr.bf16.mxu0 %v7755_v54  ;;  %2700 = vmatprep.mubr.bf16.mxu1 %v7755_v54  ;;  %v7766_v2 = vpack.c.bf16 %v887_v8, %v883_v14  ;;  %v755_v42 = vpop.f32.mrb[52].mxu1 }
 0x155   : > { %9610 = vst [vmem:[#allocation24_spill] sm:$0xff] %v7761_v59  ;;  %v567_v16 = vadd.f32 %v566_v0, %v7382_v3  ;;  %v568_v27 = vpop.f32.mrb[55].mxu0  ;;  %2315 = vmatmul.mubr.bf16.gmra.mrb[112].mxu0 %v7752_v61  ;;  %2701 = vmatmul.mubr.bf16.gmra.mrb[112].mxu1 %v7752_v61  ;;  %v756_v24 = vadd.f32 %v755_v42, %v7391_v7  ;;  %v757_v46 = vpop.f32.mrb[53].mxu1  ;;  %v888_v48 = vmax.f32 %v563_v23, 0.0 }
 0x156   : > { %9611 = vst [vmem:[#allocation25_spill] sm:$0xff] %v7766_v2  ;;  %v569_v21 = vadd.f32 %v568_v27, %v7387_v5  ;;  %v758_v11 = vadd.f32 %v757_v46, %v7396_v10  ;;  %v759_v1 = vpop.f32.mrb[54].mxu1  ;;  %v889_v6 = vmax.f32 %v565_v29, 0.0 }
 0x157   : > { %v892_v58 = vmax.f32 %v567_v16, 0.0  ;;  %v890_v0 = vmax.f32 %v756_v24, 0.0  ;;  %v760_v54 = vadd.f32 %v759_v1, %v7391_v7  ;;  %v761_v18 = vpop.f32.mrb[55].mxu1 }
 0x158   : > { %v893_v51 = vmax.f32 %v569_v21, 0.0  ;;  %v891_v14 = vmax.f32 %v758_v11, 0.0  ;;  %v762_v8 = vadd.f32 %v761_v18, %v7396_v10 }
 0x159   : > { %v7772_v61 = vpack.c.bf16 %v892_v58, %v888_v48  ;;  %v894_v15 = vmax.f32 %v760_v54, 0.0 }
 0x15a   : > { %v7775_v27 = vpack.c.bf16 %v893_v51, %v889_v6  ;;  %v572_v42 = vpop.f32.mrb[56].mxu0  ;;  %v895_v46 = vmax.f32 %v762_v8, 0.0 }
 0x15b   : > { %9612 = vst [vmem:[#allocation26_spill] sm:$0xff] %v7772_v61  ;;  %v573_v23 = vadd.f32 %v572_v42, %v7382_v3  ;;  %v574_v16 = vpop.f32.mrb[57].mxu0  ;;  %v7781_v24 = vpack.c.bf16 %v894_v15, %v890_v0 }
 0x15c   : > { %9613 = vst [vmem:[#allocation27_spill] sm:$0xff] %v7775_v27  ;;  %v575_v29 = vadd.f32 %v574_v16, %v7387_v5  ;;  %v576_v21 = vpop.f32.mrb[58].mxu0  ;;  %2324 = vmatprep.mubr.bf16.mxu0 %v7775_v27  ;;  %2710 = vmatprep.mubr.bf16.mxu1 %v7775_v27  ;;  %v7786_v54 = vpack.c.bf16 %v895_v46, %v891_v14  ;;  %v765_v58 = vpop.f32.mrb[56].mxu1 }
 0x15d   : > { %9614 = vst [vmem:[#allocation28_spill] sm:$0xff] %v7781_v24  ;;  %v577_v48 = vadd.f32 %v576_v21, %v7382_v3  ;;  %v578_v18 = vpop.f32.mrb[59].mxu0  ;;  %2325 = vmatmul.mubr.bf16.gmra.mrb[116].mxu0 %v7772_v61  ;;  %2711 = vmatmul.mubr.bf16.gmra.mrb[116].mxu1 %v7772_v61  ;;  %v766_v1 = vadd.f32 %v765_v58, %v7391_v7  ;;  %v767_v6 = vpop.f32.mrb[57].mxu1  ;;  %v896_v51 = vmax.f32 %v573_v23, 0.0 }
 0x15e   : > { %9615 = vst [vmem:[#allocation29_spill] sm:$0xff] %v7786_v54  ;;  %v579_v11 = vadd.f32 %v578_v18, %v7387_v5  ;;  %v768_v15 = vadd.f32 %v767_v6, %v7396_v10  ;;  %v769_v0 = vpop.f32.mrb[58].mxu1  ;;  %v897_v42 = vmax.f32 %v575_v29, 0.0 }
 0x15f   : > { %v900_v8 = vmax.f32 %v577_v48, 0.0  ;;  %v898_v21 = vmax.f32 %v766_v1, 0.0  ;;  %v770_v27 = vadd.f32 %v769_v0, %v7391_v7  ;;  %v771_v19 = vpop.f32.mrb[59].mxu1 }
 0x160   : > { %v901_v16 = vmax.f32 %v579_v11, 0.0  ;;  %v899_v14 = vmax.f32 %v768_v15, 0.0  ;;  %v772_v46 = vadd.f32 %v771_v19, %v7396_v10 }
 0x161   : > { %v7792_v61 = vpack.c.bf16 %v900_v8, %v896_v51  ;;  %v902_v22 = vmax.f32 %v770_v27, 0.0 }
 0x162   : > { %v7795_v18 = vpack.c.bf16 %v901_v16, %v897_v42  ;;  %v582_v58 = vpop.f32.mrb[60].mxu0  ;;  %v903_v6 = vmax.f32 %v772_v46, 0.0 }
 0x163   : > { %9616 = vst [vmem:[#allocation30_spill] sm:$0xff] %v7792_v61  ;;  %v583_v23 = vadd.f32 %v582_v58, %v7382_v3  ;;  %v584_v48 = vpop.f32.mrb[61].mxu0  ;;  %v7801_v1 = vpack.c.bf16 %v902_v22, %v898_v21 }
 0x164   : > { %9617 = vst [vmem:[#allocation31_spill] sm:$0xff] %v7795_v18  ;;  %v585_v29 = vadd.f32 %v584_v48, %v7387_v5  ;;  %v586_v11 = vpop.f32.mrb[62].mxu0  ;;  %2334 = vmatprep.mubr.bf16.mxu0 %v7795_v18  ;;  %2720 = vmatprep.mubr.bf16.mxu1 %v7795_v18  ;;  %v7806_v27 = vpack.c.bf16 %v903_v6, %v899_v14  ;;  %v775_v8 = vpop.f32.mrb[60].mxu1 }
 0x165   : > { %9618 = vst [vmem:[#allocation32_spill] sm:$0xff] %v7801_v1  ;;  %v587_v51 = vadd.f32 %v586_v11, %v7382_v3  ;;  %v588_v19 = vpop.f32.mrb[63].mxu0  ;;  %2335 = vmatmul.mubr.bf16.gmra.mrb[120].mxu0 %v7792_v61  ;;  %2721 = vmatmul.mubr.bf16.gmra.mrb[120].mxu1 %v7792_v61  ;;  %v776_v0 = vadd.f32 %v775_v8, %v7391_v7  ;;  %v777_v42 = vpop.f32.mrb[61].mxu1  ;;  %v904_v16 = vmax.f32 %v583_v23, 0.0  ;;  %v6013_v8 = vld [vmem:[%s9510_s3 + $0x210] ss:$28 sps:$4 sm:$0xff]  }
 0x166   : > { %9619 = vst [vmem:[#allocation33_spill] sm:$0xff] %v7806_v27  ;;  %v589_v15 = vadd.f32 %v588_v19, %v7387_v5  ;;  %v778_v22 = vadd.f32 %v777_v42, %v7396_v10  ;;  %v779_v21 = vpop.f32.mrb[62].mxu1  ;;  %v905_v58 = vmax.f32 %v585_v29, 0.0  ;;  %v6014_v42 = vld [vmem:[%s9510_s3 + $0x50] ss:$28 sps:$4 sm:$0xff]  }
 0x167   : > { %v908_v46 = vmax.f32 %v587_v51, 0.0  ;;  %v906_v48 = vmax.f32 %v776_v0, 0.0  ;;  %v780_v11 = vadd.f32 %v779_v21, %v7391_v7  ;;  %v781_v18 = vpop.f32.mrb[63].mxu1  ;;  %v6009_v51 = vld [vmem:[%s9510_s3 + $0x4c] ss:$28 sps:$4 sm:$0xff]  }
 0x168   : > { %v909_v3 = vmax.f32 %v589_v15, 0.0  ;;  %v907_v14 = vmax.f32 %v778_v22, 0.0  ;;  %v782_v6 = vadd.f32 %v781_v18, %v7396_v10  ;;  %v6002_v10 = vld [vmem:[%s9510_s3 + $0x10] ss:$28 sps:$4 sm:$0xff]   ;;  %v6006_v18 = vld [vmem:[%s9510_s3 + $0x18] ss:$28 sps:$4 sm:$0xff]  }
 0x169   : > { %v7812_v61 = vpack.c.bf16 %v908_v46, %v904_v16  ;;  %v910_v19 = vmax.f32 %v780_v11, 0.0  ;;  %v6007_v15 = vld [vmem:[%s9510_s3 + $0x48] ss:$28 sps:$4 sm:$0xff]   ;;  %v6010_v46 = vld [vmem:[%s9510_s3 + $0x80] ss:$28 sps:$4 sm:$0xff]  }
 0x16a   : > { %v7815_v5 = vpack.c.bf16 %v909_v3, %v905_v58  ;;  %v911_v23 = vmax.f32 %v782_v6, 0.0  ;;  %v6012_v0 = vld [vmem:[%s9510_s3 + $0x84] ss:$28 sps:$4 sm:$0xff]   ;;  %v6017_v21 = vld [vmem:[%s9510_s3 + $0xbc] ss:$28 sps:$4 sm:$0xff]  }
 0x16b   : > { %v7819_v29 = vpack.c.bf16 %v910_v19, %v906_v48  ;;  %v6021_v16 = vld [vmem:[%s9510_s3 + $0x248] ss:$28 sps:$4 sm:$0xff]   ;;  %v6029_v58 = vld [vmem:[%s9510_s3 + $0x280] ss:$28 sps:$4 sm:$0xff]   ;;  %v6015_v3 = vld [vmem:[%s9510_s3 + $0xb8] ss:$28 sps:$4 sm:$0xff]  }
 0x16c   : > { %2344 = vmatprep.mubr.bf16.mxu0 %v7815_v5  ;;  %2730 = vmatprep.mubr.bf16.mxu1 %v7815_v5  ;;  %v7823_v7 = vpack.c.bf16 %v911_v23, %v907_v14  ;;  %v6022_v22 = vld [vmem:[%s9510_s3 + $0x88] ss:$28 sps:$4 sm:$0xff]   ;;  %v6030_v48 = vld [vmem:[%s9510_s3 + $0xc0] ss:$28 sps:$4 sm:$0xff]   ;;  %v6020_v11 = vld [vmem:[%s9510_s3 + $0xf4] ss:$28 sps:$4 sm:$0xff]  }
 0x16d   : > { %9620 = vst [vmem:[#allocation34_spill] sm:$0xff] %v7819_v29  ;;  %2345 = vmatmul.mubr.bf16.gmra.mrb[124].mxu0 %v7812_v61  ;;  %2731 = vmatmul.mubr.bf16.gmra.mrb[124].mxu1 %v7812_v61  ;;  %v6037_v14 = vld [vmem:[%s9510_s3 + $0x2b8] ss:$28 sps:$4 sm:$0xff]   ;;  %v6018_v6 = vld [vmem:[%s9510_s3 + $0xf0] ss:$28 sps:$4 sm:$0xff]  }
 0x16e   : > { %9621 = vst [vmem:[#allocation35_spill] sm:$0xff] %v7823_v7  ;;  %5268 = vmatprep.mubr.msk.bf16.mxu0 %vm2113_vm1, %v7433_v47  ;;  %5284 = vmatprep.mubr.msk.bf16.mxu1 %vm2113_vm1, %v7433_v47  ;;  %v6038_v19 = vld [vmem:[%s9510_s3 + $0xf8] ss:$28 sps:$4 sm:$0xff]   ;;  %v6025_v23 = vld [vmem:[%s9510_s3 + $0x12c] ss:$28 sps:$4 sm:$0xff]  }
 0x175   : > { %2388 = vmatmul.mubr.bf16.vlgmr.msra.gmra.mrb[64].mxu0 %v7425_v43  ;;  %2774 = vmatmul.mubr.bf16.vlgmr.msra.gmra.mrb[64].mxu1 %v7425_v43 }
 0x176   : > { %2935 = vmatpush1.bf16.msra.mxu0 %v6002_v10  ;;  %5269 = vmatprep.mubr.msk.bf16.mxu0 %vm2113_vm1, %v7477_v30  ;;  %v6045_v10 = vld [vmem:[%s9510_s3 + $0x2f0] ss:$28 sps:$4 sm:$0xff]  }
 0x177   : > { %5285 = vmatprep.mubr.msk.bf16.mxu1 %vm2113_vm1, %v7477_v30  ;;  %5335 = vmatpush3.bf16.msra.mxu1 %v6006_v18  ;;  %v6023_v18 = vld [vmem:[%s9510_s3 + $0x128] ss:$28 sps:$4 sm:$0xff]  }
 0x178   : > { %2936 = vmatprep.subr.bf16.mxu0 %v6009_v51  ;;  %5336 = vmatprep.subr.bf16.mxu1 %v6013_v8  ;;  %v6046_v51 = vld [vmem:[%s9510_s3 + $0x130] ss:$28 sps:$4 sm:$0xff]   ;;  %v6028_v8 = vld [vmem:[%s9510_s3 + $0x164] ss:$28 sps:$4 sm:$0xff]  }
 0x17a   : > { %2937 = vmatpush1.bf16.msra.mxu0 %v6007_v15  ;;  %v6053_v15 = vld [vmem:[%s9510_s3 + $0x328] ss:$28 sps:$4 sm:$0xff]  }
 0x17b   : > { %2938 = vmatprep.subr.bf16.mxu0 %v6012_v0  ;;  %5337 = vmatpush3.bf16.msra.mxu1 %v6014_v42  ;;  %v6026_v0 = vld [vmem:[%s9510_s3 + $0x160] ss:$28 sps:$4 sm:$0xff]   ;;  %v6054_v42 = vld [vmem:[%s9510_s3 + $0x168] ss:$28 sps:$4 sm:$0xff]  }
 0x17c   : > { %5338 = vmatprep.subr.bf16.mxu1 %v6021_v16  ;;  %v6033_v16 = vld [vmem:[%s9510_s3 + $0x19c] ss:$28 sps:$4 sm:$0xff]  }
 0x17d   : > { %2398 = vmatmul.mubr.bf16.gmra.mrb[68].mxu0 %v7469_v25  ;;  %2784 = vmatmul.mubr.bf16.gmra.mrb[68].mxu1 %v7469_v25 }
 0x17e   : > { %5270 = vmatprep.mubr.msk.bf16.mxu0 %vm2113_vm1, %v7521_v17  ;;  %5286 = vmatprep.mubr.msk.bf16.mxu1 %vm2113_vm1, %v7521_v17 }
 0x17f   : > { %2939 = vmatpush1.bf16.msra.mxu0 %v6010_v46  ;;  %5339 = vmatpush3.bf16.msra.mxu1 %v6022_v22  ;;  %v6061_v46 = vld [vmem:[%s9510_s3 + $0x360] ss:$28 sps:$4 sm:$0xff]   ;;  %v6031_v22 = vld [vmem:[%s9510_s3 + $0x198] ss:$28 sps:$4 sm:$0xff]  }
 0x180   : > { %2940 = vmatprep.subr.bf16.mxu0 %v6017_v21  ;;  %5340 = vmatprep.subr.bf16.mxu1 %v6029_v58  ;;  %v6062_v21 = vld [vmem:[%s9510_s3 + $0x1a0] ss:$28 sps:$4 sm:$0xff]   ;;  %v6036_v58 = vld [vmem:[%s9510_s3 + $0x1d4] ss:$28 sps:$4 sm:$0xff]  }
 0x183   : > { %2941 = vmatpush1.bf16.msra.mxu0 %v6015_v3  ;;  %5341 = vmatpush3.bf16.msra.mxu1 %v6030_v48  ;;  %v6034_v3 = vld [vmem:[%s9510_s3 + $0x1d0] ss:$28 sps:$4 sm:$0xff]  }
 0x184   : > { %2942 = vmatprep.subr.bf16.mxu0 %v6020_v11  ;;  %5342 = vmatprep.subr.bf16.mxu1 %v6037_v14  ;;  %v6041_v48 = vld [vmem:[%s9510_s3 + $0x20c] ss:$28 sps:$4 sm:$0xff]   ;;  %v9622_v11 = vmov 0  }
 0x185   : > { %2408 = vmatmul.mubr.bf16.gmra.mrb[72].mxu0 %v7513_v12  ;;  %2794 = vmatmul.mubr.bf16.gmra.mrb[72].mxu1 %v7513_v12  ;;  %v6039_v14 = vld [vmem:[%s9510_s3 + $0x208] ss:$28 sps:$4 sm:$0xff]  }
 0x186   : > { %5271 = vmatprep.mubr.msk.bf16.mxu0 %vm2113_vm1, %v7565_v63  ;;  %5287 = vmatprep.mubr.msk.bf16.mxu1 %vm2113_vm1, %v7565_v63 }
 0x187   : > { %2943 = vmatpush1.bf16.msra.mxu0 %v6018_v6  ;;  %5343 = vmatpush3.bf16.msra.mxu1 %v6038_v19  ;;  %v6044_v6 = vld [vmem:[%s9510_s3 + $0x244] ss:$28 sps:$4 sm:$0xff]  }
 0x188   : > { %2944 = vmatprep.subr.bf16.mxu0 %v6025_v23  ;;  %5344 = vmatprep.subr.bf16.mxu1 %v6045_v10  ;;  %v6042_v19 = vld [vmem:[%s9510_s3 + $0x240] ss:$28 sps:$4 sm:$0xff]   ;;  %v6047_v10 = vld [vmem:[%s9510_s3 + $0x278] ss:$28 sps:$4 sm:$0xff]  }
 0x189   : > { %v6049_v23 = vld [vmem:[%s9510_s3 + $0x27c] ss:$28 sps:$4 sm:$0xff]  }
 0x18b   : > { %2945 = vmatpush1.bf16.msra.mxu0 %v6023_v18  ;;  %5345 = vmatpush3.bf16.msra.mxu1 %v6046_v51  ;;  %v6052_v18 = vld [vmem:[%s9510_s3 + $0x2b4] ss:$28 sps:$4 sm:$0xff]  }
 0x18c   : > { %2946 = vmatprep.subr.bf16.mxu0 %v6028_v8  ;;  %5346 = vmatprep.subr.bf16.mxu1 %v6053_v15  ;;  %v6050_v51 = vld [vmem:[%s9510_s3 + $0x2b0] ss:$28 sps:$4 sm:$0xff]   ;;  %v6055_v15 = vld [vmem:[%s9510_s3 + $0x2e8] ss:$28 sps:$4 sm:$0xff]  }
 0x18d   : > { %2418 = vmatmul.mubr.bf16.gmra.mrb[76].mxu0 %v7557_v57  ;;  %2804 = vmatmul.mubr.bf16.gmra.mrb[76].mxu1 %v7557_v57  ;;  %v6057_v8 = vld [vmem:[%s9510_s3 + $0x2ec] ss:$28 sps:$4 sm:$0xff]  }
 0x18e   : > { %5272 = vmatprep.mubr.msk.bf16.mxu0 %vm2113_vm1, %v7606_v56  ;;  %5288 = vmatprep.mubr.msk.bf16.mxu1 %vm2113_vm1, %v7606_v56 }
 0x18f   : > { %2947 = vmatpush1.bf16.msra.mxu0 %v6026_v0  ;;  %5347 = vmatpush3.bf16.msra.mxu1 %v6054_v42  ;;  %v6060_v0 = vld [vmem:[%s9510_s3 + $0x324] ss:$28 sps:$4 sm:$0xff]  }
 0x190   : > { %2948 = vmatprep.subr.bf16.mxu0 %v6033_v16  ;;  %5348 = vmatprep.subr.bf16.mxu1 %v6061_v46  ;;  %v6058_v42 = vld [vmem:[%s9510_s3 + $0x320] ss:$28 sps:$4 sm:$0xff]   ;;  %v6063_v46 = vld [vmem:[%s9510_s3 + $0x358] ss:$28 sps:$4 sm:$0xff]  }
 0x191   : > { %v6065_v16 = vld [vmem:[%s9510_s3 + $0x35c] ss:$28 sps:$4 sm:$0xff]  }
 0x193   : > { %2949 = vmatpush1.bf16.msra.mxu0 %v6031_v22  ;;  %5349 = vmatpush3.bf16.msra.mxu1 %v6062_v21  ;;  %v6068_v22 = vld [vmem:[%s9510_s3 + $0x394] ss:$28 sps:$4 sm:$0xff]  }
 0x194   : > { %2950 = vmatprep.subr.bf16.mxu0 %v6036_v58  ;;  %3481 = vmatprep.subr.bf16.mxu1 %v9622_v11  ;;  %v6066_v21 = vld [vmem:[%s9510_s3 + $0x390] ss:$28 sps:$4 sm:$0xff]   ;;  %v6069_v58 = vld [vmem:[%s9510_s3 + $0x398] ss:$28 sps:$4 sm:$0xff]  }
 0x195   : > { %2428 = vmatmul.mubr.bf16.gmra.mrb[80].mxu0 %v7601_v52  ;;  %2814 = vmatmul.mubr.bf16.gmra.mrb[80].mxu1 %v7601_v52 }
 0x196   : > { %5273 = vmatprep.mubr.msk.bf16.mxu0 %vm2113_vm1, %v7626_v45  ;;  %5289 = vmatprep.mubr.msk.bf16.mxu1 %vm2113_vm1, %v7626_v45 }
 0x197   : > { %2951 = vmatpush1.bf16.msra.mxu0 %v6034_v3  ;;  %v6072_v3 = vld [vmem:[%s9510_s3 + $0x3cc] ss:$28 sps:$4 sm:$0xff]  }
 0x198   : > { %2952 = vmatprep.subr.bf16.mxu0 %v6041_v48  ;;  %v6073_v48 = vld [vmem:[%s9510_s3 + $0x3d0] ss:$28 sps:$4 sm:$0xff]  }
 0x19b   : > { %2953 = vmatpush1.bf16.msra.mxu0 %v6039_v14  ;;  %v6076_v14 = vld [vmem:[%s9510_s3 + $0x404] ss:$28 sps:$4 sm:$0xff]  }
 0x19c   : > { %2954 = vmatprep.subr.bf16.mxu0 %v6044_v6  ;;  %v6080_v6 = vld [vmem:[%s9510_s3 + $0x43c] ss:$28 sps:$4 sm:$0xff]  }
 0x19d   : > { %2438 = vmatmul.mubr.bf16.gmra.mrb[84].mxu0 %v7621_v40  ;;  %2824 = vmatmul.mubr.bf16.gmra.mrb[84].mxu1 %v7621_v40 }
 0x19e   : > { %5274 = vmatprep.mubr.msk.bf16.mxu0 %vm2113_vm1, %v7646_v39  ;;  %5290 = vmatprep.mubr.msk.bf16.mxu1 %vm2113_vm1, %v7646_v39 }
 0x19f   : > { %2955 = vmatpush1.bf16.msra.mxu0 %v6042_v19  ;;  %v6078_v19 = vld [vmem:[%s9510_s3 + $0x438] ss:$28 sps:$4 sm:$0xff]  }
 0x1a0   : > { %2956 = vmatprep.subr.bf16.mxu0 %v6049_v23  ;;  %v6081_v23 = vld [vmem:[%s9510_s3 + $0x440] ss:$28 sps:$4 sm:$0xff]  }
 0x1a3   : > { %2957 = vmatpush1.bf16.msra.mxu0 %v6047_v10  ;;  %v6085_v10 = vld [vmem:[%s9510_s3 + $0x478] ss:$28 sps:$4 sm:$0xff]  }
 0x1a4   : > { %2958 = vmatprep.subr.bf16.mxu0 %v6052_v18  ;;  %v6088_v18 = vld [vmem:[%s9510_s3 + $0x4ac] ss:$28 sps:$4 sm:$0xff]  }
 0x1a5   : > { %2448 = vmatmul.mubr.bf16.gmra.mrb[88].mxu0 %v7641_v34  ;;  %2834 = vmatmul.mubr.bf16.gmra.mrb[88].mxu1 %v7641_v34 }
 0x1a6   : > { %5275 = vmatprep.mubr.msk.bf16.mxu0 %vm2113_vm1, %v7666_v44  ;;  %5291 = vmatprep.mubr.msk.bf16.mxu1 %vm2113_vm1, %v7666_v44 }
 0x1a7   : > { %2959 = vmatpush1.bf16.msra.mxu0 %v6050_v51  ;;  %v6086_v51 = vld [vmem:[%s9510_s3 + $0x4a8] ss:$28 sps:$4 sm:$0xff]  }
 0x1a8   : > { %2960 = vmatprep.subr.bf16.mxu0 %v6057_v8  ;;  %v6089_v8 = vld [vmem:[%s9510_s3 + $0x4b0] ss:$28 sps:$4 sm:$0xff]  }
 0x1ab   : > { %2961 = vmatpush1.bf16.msra.mxu0 %v6055_v15  ;;  %v6093_v15 = vld [vmem:[%s9510_s3 + $0x4e8] ss:$28 sps:$4 sm:$0xff]  }
 0x1ac   : > { %2962 = vmatprep.subr.bf16.mxu0 %v6060_v0  ;;  %v6096_v0 = vld [vmem:[%s9510_s3 + $0x51c] ss:$28 sps:$4 sm:$0xff]  }
 0x1ad   : > { %2458 = vmatmul.mubr.bf16.gmra.mrb[92].mxu0 %v7661_v36  ;;  %2844 = vmatmul.mubr.bf16.gmra.mrb[92].mxu1 %v7661_v36 }
 0x1ae   : > { %5276 = vmatprep.mubr.msk.bf16.mxu0 %vm2113_vm1, %v7686_v55  ;;  %5292 = vmatprep.mubr.msk.bf16.mxu1 %vm2113_vm1, %v7686_v55 }
 0x1af   : > { %2963 = vmatpush1.bf16.msra.mxu0 %v6058_v42  ;;  %v6094_v42 = vld [vmem:[%s9510_s3 + $0x518] ss:$28 sps:$4 sm:$0xff]  }
 0x1b0   : > { %2964 = vmatprep.subr.bf16.mxu0 %v6065_v16  ;;  %v6097_v16 = vld [vmem:[%s9510_s3 + $0x520] ss:$28 sps:$4 sm:$0xff]  }
 0x1b3   : > { %2965 = vmatpush1.bf16.msra.mxu0 %v6063_v46  ;;  %v6101_v46 = vld [vmem:[%s9510_s3 + $0x558] ss:$28 sps:$4 sm:$0xff]  }
 0x1b4   : > { %3127 = vmatprep.subr.bf16.mxu0 %v6068_v22  ;;  %v9623_v22 = vld [vmem:[#allocation3_spill] sm:$0xff] }
 0x1b5   : > { %2468 = vmatmul.mubr.bf16.gmra.mrb[96].mxu0 %v7681_v49  ;;  %2854 = vmatmul.mubr.bf16.gmra.mrb[96].mxu1 %v7681_v49 }
 0x1b6   : > { %5277 = vmatprep.mubr.msk.bf16.mxu0 %vm2113_vm1, %v7706_v20  ;;  %5293 = vmatprep.mubr.msk.bf16.mxu1 %vm2113_vm1, %v7706_v20 }
 0x1bd   : > { %2478 = vmatmul.mubr.bf16.gmra.mrb[100].mxu0 %v7701_v60  ;;  %2864 = vmatmul.mubr.bf16.gmra.mrb[100].mxu1 %v7701_v60 }
 0x1be   : > { %5278 = vmatprep.mubr.msk.bf16.mxu0 %vm2113_vm1, %v7726_v62  ;;  %5294 = vmatprep.mubr.msk.bf16.mxu1 %vm2113_vm1, %v7726_v62 }
 0x1c5   : > { %2488 = vmatmul.mubr.bf16.gmra.mrb[104].mxu0 %v7721_v33  ;;  %2874 = vmatmul.mubr.bf16.gmra.mrb[104].mxu1 %v7721_v33 }
 0x1c6   : > { %5279 = vmatprep.mubr.msk.bf16.mxu0 %vm2113_vm1, %v7746_v4  ;;  %5295 = vmatprep.mubr.msk.bf16.mxu1 %vm2113_vm1, %v7746_v4 }
 0x1cd   : > { %2498 = vmatmul.mubr.bf16.gmra.mrb[108].mxu0 %v7741_v37  ;;  %2884 = vmatmul.mubr.bf16.gmra.mrb[108].mxu1 %v7741_v37 }
 0x1ce   : > { %5280 = vmatprep.mubr.msk.bf16.mxu0 %vm2113_vm1, %v7766_v2  ;;  %5296 = vmatprep.mubr.msk.bf16.mxu1 %vm2113_vm1, %v7766_v2 }
 0x1d5   : > { %2508 = vmatmul.mubr.bf16.gmra.mrb[112].mxu0 %v7761_v59  ;;  %2894 = vmatmul.mubr.bf16.gmra.mrb[112].mxu1 %v7761_v59 }
 0x1d6   : > { %5281 = vmatprep.mubr.msk.bf16.mxu0 %vm2113_vm1, %v7786_v54  ;;  %5297 = vmatprep.mubr.msk.bf16.mxu1 %vm2113_vm1, %v7786_v54 }
 0x1dd   : > { %2518 = vmatmul.mubr.bf16.gmra.mrb[116].mxu0 %v7781_v24  ;;  %2904 = vmatmul.mubr.bf16.gmra.mrb[116].mxu1 %v7781_v24 }
 0x1de   : > { %5282 = vmatprep.mubr.msk.bf16.mxu0 %vm2113_vm1, %v7806_v27  ;;  %5298 = vmatprep.mubr.msk.bf16.mxu1 %vm2113_vm1, %v7806_v27 }
 0x1e5   : > { %2528 = vmatmul.mubr.bf16.gmra.mrb[120].mxu0 %v7801_v1  ;;  %2914 = vmatmul.mubr.bf16.gmra.mrb[120].mxu1 %v7801_v1 }
 0x1e6   : > { %5283 = vmatprep.mubr.msk.bf16.mxu0 %vm2113_vm1, %v7823_v7  ;;  %5299 = vmatprep.mubr.msk.bf16.mxu1 %vm2113_vm1, %v7823_v7 }
 0x1ed   : > { %2538 = vmatmul.mubr.bf16.gmra.mrb[124].mxu0 %v7819_v29  ;;  %2924 = vmatmul.mubr.bf16.gmra.mrb[124].mxu1 %v7819_v29 }
 0x1ee   : > { %2966 = vmatprep.mubr.bf16.mxu0 %v7407_v31  ;;  %3352 = vmatprep.mubr.bf16.mxu1 %v7407_v31  ;;  %v6070_v31 = vld [vmem:[%s9510_s3 + $0x3c8] ss:$28 sps:$4 sm:$0xff]  }
 0x1f5   : > { %2967 = vmatmul.mubr.bf16.vlgmr.msra.gmra.mrb[128].mxu0 %v7404_v28  ;;  %3353 = vmatmul.mubr.bf16.vlgmr.msra.gmra.mrb[128].mxu1 %v7404_v28  ;;  %v6074_v28 = vld [vmem:[%s9510_s3 + $0x400] ss:$28 sps:$4 sm:$0xff]  }
 0x1f6   : > { %3128 = vmatpush1.bf16.msra.mxu0 %v6066_v21  ;;  %2976 = vmatprep.mubr.bf16.mxu0 %v7451_v13  ;;  %v9624_v21 = vld [vmem:[#allocation5_spill] sm:$0xff] }
 0x1f7   : > { %3360 = vmatprep.mubr.bf16.mxu1 %v7451_v13  ;;  %3482 = vmatpush1.bf16.msra.mxu1 %v6069_v58  ;;  %v6077_v13 = vld [vmem:[%s9510_s3 + $0x408] ss:$28 sps:$4 sm:$0xff]   ;;  %v9625_v58 = vld [vmem:[#allocation4_spill] sm:$0xff] }
 0x1f8   : > { %3129 = vmatprep.subr.bf16.mxu0 %v6072_v3  ;;  %3483 = vmatprep.subr.bf16.mxu1 %v9622_v11  ;;  %v9629_v3 = vld [vmem:[#allocation8_spill] sm:$0xff] }
 0x1fa   : > { %3130 = vmatpush1.bf16.msra.mxu0 %v6070_v31  ;;  %v9630_v31 = vld [vmem:[#allocation11_spill] sm:$0xff] }
 0x1fb   : > { %3484 = vmatpush1.bf16.msra.mxu1 %v6073_v48  ;;  %3131 = vmatprep.subr.bf16.mxu0 %v6076_v14  ;;  %v9631_v48 = vld [vmem:[#allocation10_spill] sm:$0xff]  ;;  %v9632_v14 = vld [vmem:[#allocation15_spill] sm:$0xff] }
 0x1fc   : > { %3485 = vmatprep.subr.bf16.mxu1 %v9622_v11 }
 0x1fd   : > { %2977 = vmatmul.mubr.bf16.gmra.mrb[132].mxu0 %v7448_v9  ;;  %3361 = vmatmul.mubr.bf16.gmra.mrb[132].mxu1 %v7448_v9  ;;  %v6084_v9 = vld [vmem:[%s9510_s3 + $0x474] ss:$28 sps:$4 sm:$0xff]  }
 0x1fe   : > { %2986 = vmatprep.mubr.bf16.mxu0 %v7495_v53  ;;  %3368 = vmatprep.mubr.bf16.mxu1 %v7495_v53  ;;  %v6082_v53 = vld [vmem:[%s9510_s3 + $0x470] ss:$28 sps:$4 sm:$0xff]  }
 0x1ff   : > { %3132 = vmatpush1.bf16.msra.mxu0 %v6074_v28  ;;  %3486 = vmatpush1.bf16.msra.mxu1 %v6077_v13  ;;  %v1176_v28 = vld [vmem:[%s9511_s4] sm:$0x7f] }
 0x200   : > { %3133 = vmatprep.subr.bf16.mxu0 %v6080_v6  ;;  %3487 = vmatprep.subr.bf16.mxu1 %v9622_v11  ;;  %v9633_v13 = vld [vmem:[#allocation14_spill] sm:$0xff] }
 0x201   : > { %v9634_v6 = vld [vmem:[#allocation2_spill] sm:$0xff] }
 0x203   : > { %3134 = vmatpush1.bf16.msra.mxu0 %v6078_v19  ;;  %3488 = vmatpush1.bf16.msra.mxu1 %v6081_v23  ;;  %v9635_v19 = vsub.s32 0, %v9634_v6 }
 0x204   : > { %3135 = vmatprep.subr.bf16.mxu0 %v6084_v9  ;;  %3489 = vmatprep.subr.bf16.mxu1 %v9622_v11  ;;  %v9636_v9 = vsub.s32 2, %v9634_v6 }
 0x205   : > { %2987 = vmatmul.mubr.bf16.gmra.mrb[136].mxu0 %v7492_v50  ;;  %3369 = vmatmul.mubr.bf16.gmra.mrb[136].mxu1 %v7492_v50  ;;  %v6092_v50 = vld [vmem:[%s9510_s3 + $0x4e4] ss:$28 sps:$4 sm:$0xff]   ;;  %v8198_v23 = vrot.slane %v1176_v28, %v9635_v19 }
 0x206   : > { %2996 = vmatprep.mubr.bf16.mxu0 %v7539_v41  ;;  %3376 = vmatprep.mubr.bf16.mxu1 %v7539_v41  ;;  %v6090_v41 = vld [vmem:[%s9510_s3 + $0x4e0] ss:$28 sps:$4 sm:$0xff]  }
 0x207   : > { %3136 = vmatpush1.bf16.msra.mxu0 %v6082_v53  ;;  %3490 = vmatpush1.bf16.msra.mxu1 %v6085_v10  ;;  %v8202_v53 = vrot.slane %v1176_v28, %v9636_v9  ;;  %v9637_v10 = vld [vmem:[#allocation19_spill] sm:$0xff] }
 0x208   : > { %3137 = vmatprep.subr.bf16.mxu0 %v6088_v18  ;;  %3491 = vmatprep.subr.bf16.mxu1 %v9622_v11  ;;  %v9638_v18 = vsub.s32 1, %v9634_v6 }
 0x20b   : > { %3138 = vmatpush1.bf16.msra.mxu0 %v6086_v51  ;;  %3492 = vmatpush1.bf16.msra.mxu1 %v6089_v8  ;;  %v8208_v51 = vrot.slane %v1176_v28, %v9638_v18  ;;  %v9639_v8 = vsub.s32 3, %v9634_v6 }
 0x20c   : > { %3139 = vmatprep.subr.bf16.mxu0 %v6092_v50  ;;  %3493 = vmatprep.subr.bf16.mxu1 %v9622_v11 }
 0x20d   : > { %2997 = vmatmul.mubr.bf16.gmra.mrb[140].mxu0 %v7536_v38  ;;  %3377 = vmatmul.mubr.bf16.gmra.mrb[140].mxu1 %v7536_v38  ;;  %v6100_v38 = vld [vmem:[%s9510_s3 + $0x554] ss:$28 sps:$4 sm:$0xff]   ;;  %v8212_v50 = vrot.slane %v1176_v28, %v9639_v8  ;;  %v9640_v8 = vld [vmem:[#allocation18_spill] sm:$0xff] }
 0x20e   : > { %3006 = vmatprep.mubr.bf16.mxu0 %v7583_v35  ;;  %3384 = vmatprep.mubr.bf16.mxu1 %v7583_v35  ;;  %v6098_v35 = vld [vmem:[%s9510_s3 + $0x550] ss:$28 sps:$4 sm:$0xff]  }
 0x20f   : > { %3140 = vmatpush1.bf16.msra.mxu0 %v6090_v41  ;;  %3494 = vmatpush1.bf16.msra.mxu1 %v6093_v15 }
 0x210   : > { %3141 = vmatprep.subr.bf16.mxu0 %v6096_v0  ;;  %3495 = vmatprep.subr.bf16.mxu1 %v9622_v11 }
 0x213   : > { %3142 = vmatpush1.bf16.msra.mxu0 %v6094_v42  ;;  %3496 = vmatpush1.bf16.msra.mxu1 %v6097_v16 }
 0x214   : > { %3143 = vmatprep.subr.bf16.mxu0 %v6100_v38  ;;  %3497 = vmatprep.subr.bf16.mxu1 %v9622_v11  ;;  %v9626_v11 = vld [vmem:[#allocation7_spill] sm:$0xff] }
 0x215   : > { %3007 = vmatmul.mubr.bf16.gmra.mrb[144].mxu0 %v7580_v32  ;;  %3385 = vmatmul.mubr.bf16.gmra.mrb[144].mxu1 %v7580_v32  ;;  %v9627_v32 = vld [vmem:[#allocation6_spill] sm:$0xff] }
 0x216   : > { %3016 = vmatprep.mubr.bf16.mxu0 %v7615_v26  ;;  %3392 = vmatprep.mubr.bf16.mxu1 %v7615_v26  ;;  %v9628_v26 = vld [vmem:[#allocation9_spill] sm:$0xff] }
 0x217   : > { %3144 = vmatpush1.bf16.msra.mxu0 %v6098_v35  ;;  %3498 = vmatpush1.bf16.msra.mxu1 %v6101_v46 }
 0x21d   : > { %3017 = vmatmul.mubr.bf16.gmra.mrb[148].mxu0 %v9623_v22  ;;  %3393 = vmatmul.mubr.bf16.gmra.mrb[148].mxu1 %v9623_v22 }
 0x21e   : > { %3026 = vmatprep.mubr.bf16.mxu0 %v9624_v21  ;;  %3400 = vmatprep.mubr.bf16.mxu1 %v9624_v21 }
 0x225   : > { %3027 = vmatmul.mubr.bf16.gmra.mrb[152].mxu0 %v9625_v58  ;;  %3401 = vmatmul.mubr.bf16.gmra.mrb[152].mxu1 %v9625_v58 }
 0x226   : > { %3036 = vmatprep.mubr.bf16.mxu0 %v9626_v11  ;;  %3408 = vmatprep.mubr.bf16.mxu1 %v9626_v11 }
 0x22d   : > { %3037 = vmatmul.mubr.bf16.gmra.mrb[156].mxu0 %v9627_v32  ;;  %3409 = vmatmul.mubr.bf16.gmra.mrb[156].mxu1 %v9627_v32 }
 0x22e   : > { %3046 = vmatprep.mubr.bf16.mxu0 %v9628_v26  ;;  %3416 = vmatprep.mubr.bf16.mxu1 %v9628_v26 }
 0x235   : > { %3047 = vmatmul.mubr.bf16.gmra.mrb[160].mxu0 %v9629_v3  ;;  %3417 = vmatmul.mubr.bf16.gmra.mrb[160].mxu1 %v9629_v3 }
 0x236   : > { %3056 = vmatprep.mubr.bf16.mxu0 %v9630_v31  ;;  %3424 = vmatprep.mubr.bf16.mxu1 %v9630_v31 }
 0x23d   : > { %3057 = vmatmul.mubr.bf16.gmra.mrb[164].mxu0 %v9631_v48  ;;  %3425 = vmatmul.mubr.bf16.gmra.mrb[164].mxu1 %v9631_v48 }
 0x23e   : > { %3066 = vmatprep.mubr.bf16.mxu0 %v9632_v14  ;;  %3432 = vmatprep.mubr.bf16.mxu1 %v9632_v14 }
 0x245   : > { %3067 = vmatmul.mubr.bf16.gmra.mrb[168].mxu0 %v9633_v13  ;;  %3433 = vmatmul.mubr.bf16.gmra.mrb[168].mxu1 %v9633_v13 }
 0x246   : > { %3076 = vmatprep.mubr.bf16.mxu0 %v9637_v10  ;;  %3440 = vmatprep.mubr.bf16.mxu1 %v9637_v10 }
 0x248   : > { %v2389_v41 = vpop.f32.mrb[64].mxu0  ;;  %v2775_v15 = vpop.f32.mrb[64].mxu1 }
 0x249   : > { %v5446_v0 = vadd.f32 %v2389_v41, %v8198_v23  ;;  %v5510_v42 = vadd.f32 %v2775_v15, %v8202_v53  ;;  %v2391_v16 = vpop.f32.mrb[65].mxu0  ;;  %v2777_v38 = vpop.f32.mrb[65].mxu1 }
 0x24a   : > { %v5447_v35 = vadd.f32 %v2391_v16, %v8208_v51  ;;  %v5511_v46 = vadd.f32 %v2777_v38, %v8212_v50  ;;  %v2393_v22 = vpop.f32.mrb[66].mxu0  ;;  %v2779_v21 = vpop.f32.mrb[66].mxu1  ;;  %v9641_v16 = vld [vmem:[#allocation23_spill] sm:$0xff] }
 0x24b   : > { %v3642_v58 = vsub.f32 0.0, %v5446_v0  ;;  %v3644_v11 = vsub.f32 0.0, %v5510_v42  ;;  %v5448_v32 = vadd.f32 %v2393_v22, %v8198_v23  ;;  %v5512_v26 = vadd.f32 %v2779_v21, %v8202_v53  ;;  %v2395_v3 = vpop.f32.mrb[67].mxu0  ;;  %v2781_v31 = vpop.f32.mrb[67].mxu1 }
 0x24c   : > { %v3643_v48 = vsub.f32 0.0, %v5447_v35  ;;  %v3645_v14 = vsub.f32 0.0, %v5511_v46  ;;  %v5449_v28 = vadd.f32 %v2395_v3, %v8208_v51  ;;  %v5513_v13 = vadd.f32 %v2781_v31, %v8212_v50 }
 0x24d   : > { %v3866_v19 = vmul.f32 1.442695, %v3642_v58  ;;  %v3870_v9 = vmul.f32 1.442695, %v3644_v11  ;;  %v3649_v10 = vsub.f32 0.0, %v5448_v32  ;;  %v3651_v18 = vsub.f32 0.0, %v5512_v26  ;;  %3077 = vmatmul.mubr.bf16.gmra.mrb[172].mxu0 %v9640_v8  ;;  %3441 = vmatmul.mubr.bf16.gmra.mrb[172].mxu1 %v9640_v8 }
 0x24e   : > { %v3868_v41 = vmul.f32 1.442695, %v3643_v48  ;;  %v3872_v15 = vmul.f32 1.442695, %v3645_v14  ;;  %v3650_v0 = vsub.f32 0.0, %v5449_v28  ;;  %v3652_v42 = vsub.f32 0.0, %v5513_v13  ;;  %3086 = vmatprep.mubr.bf16.mxu0 %v9641_v16  ;;  %3448 = vmatprep.mubr.bf16.mxu1 %v9641_v16 }
 0x24f   : > { %6102 = vpow2.f32 %v3866_v19  ;;  %v3880_v38 = vmul.f32 1.442695, %v3649_v10  ;;  %v3884_v35 = vmul.f32 1.442695, %v3651_v18  ;;  %v9642_v16 = vld [vmem:[#allocation22_spill] sm:$0xff] }
 0x250   : > { %6104 = vpow2.f32 %v3870_v9  ;;  %v2399_v46 = vpop.f32.mrb[68].mxu0  ;;  %v2785_v22 = vpop.f32.mrb[68].mxu1  ;;  %v3882_v21 = vmul.f32 1.442695, %v3650_v0  ;;  %v3886_v3 = vmul.f32 1.442695, %v3652_v42 }
 0x251   : > { %6106 = vpow2.f32 %v3868_v41  ;;  %v5450_v58 = vadd.f32 %v2399_v46, %v8198_v23  ;;  %v5514_v11 = vadd.f32 %v2785_v22, %v8202_v53  ;;  %v2401_v32 = vpop.f32.mrb[69].mxu0  ;;  %v2787_v26 = vpop.f32.mrb[69].mxu1  ;;  %v9643_v22 = vld [vmem:[#allocation27_spill] sm:$0xff] }
 0x252   : > { %6108 = vpow2.f32 %v3872_v15  ;;  %v5451_v31 = vadd.f32 %v2401_v32, %v8208_v51  ;;  %v5515_v48 = vadd.f32 %v2787_v26, %v8212_v50  ;;  %v2403_v14 = vpop.f32.mrb[70].mxu0  ;;  %v2789_v28 = vpop.f32.mrb[70].mxu1 }
 0x253   : > { %6110 = vpow2.f32 %v3880_v38  ;;  %v3656_v13 = vsub.f32 0.0, %v5450_v58  ;;  %v3658_v19 = vsub.f32 0.0, %v5514_v11  ;;  %v5452_v9 = vadd.f32 %v2403_v14, %v8198_v23  ;;  %v2405_v10 = vpop.f32.mrb[71].mxu0  ;;  %v2791_v18 = vpop.f32.mrb[71].mxu1 }
 0x254   : > { %6112 = vpow2.f32 %v3884_v35  ;;  %v3657_v8 = vsub.f32 0.0, %v5451_v31  ;;  %v3659_v41 = vsub.f32 0.0, %v5515_v48  ;;  %v5516_v32 = vadd.f32 %v2789_v28, %v8202_v53 }
 0x255   : > { %6114 = vpow2.f32 %v3882_v21  ;;  %v3894_v0 = vmul.f32 1.442695, %v3656_v13  ;;  %v3898_v15 = vmul.f32 1.442695, %v3658_v19  ;;  %v3663_v42 = vsub.f32 0.0, %v5452_v9  ;;  %3087 = vmatmul.mubr.bf16.gmra.mrb[176].mxu0 %v9642_v16  ;;  %3449 = vmatmul.mubr.bf16.gmra.mrb[176].mxu1 %v9642_v16 }
 0x256   : > { %6116 = vpow2.f32 %v3886_v3  ;;  %v3896_v46 = vmul.f32 1.442695, %v3657_v8  ;;  %v3900_v38 = vmul.f32 1.442695, %v3659_v41  ;;  %3096 = vmatprep.mubr.bf16.mxu0 %v9643_v22  ;;  %3456 = vmatprep.mubr.bf16.mxu1 %v9643_v22  ;;  %v5453_v8 = vadd.f32 %v2405_v10, %v8208_v51 }
 0x257   : > { %6118 = vpow2.f32 %v3894_v0  ;;  %v3908_v58 = vmul.f32 1.442695, %v3663_v42  ;;  %v5517_v10 = vadd.f32 %v2791_v18, %v8212_v50 }
 0x258   : > { %6120 = vpow2.f32 %v3898_v15  ;;  %v2409_v35 = vpop.f32.mrb[72].mxu0  ;;  %v2795_v11 = vpop.f32.mrb[72].mxu1 }
 0x259   : > { %v6103_v21 = vpop.eup %6102  ;;  %6122 = vpow2.f32 %v3896_v46  ;;  %v2411_v26 = vpop.f32.mrb[73].mxu0  ;;  %v3665_v46 = vsub.f32 0.0, %v5516_v32  ;;  %v5518_v29 = vadd.f32 %v2795_v11, %v8202_v53 }
 0x25a   : > { %v2797_v31 = vpop.f32.mrb[73].mxu1  ;;  %v6105_v48 = vpop.eup %6104  ;;  %v4314_v14 = vadd.f32 1.0, %v6103_v21  ;;  %6124 = vpow2.f32 %v3900_v38  ;;  %v9644_v38 = vld [vmem:[#allocation26_spill] sm:$0xff]  ;;  %v9645_v21 = vld [vmem:[#allocation31_spill] sm:$0xff] }
 0x25b   : > { %v2413_v3 = vpop.f32.mrb[74].mxu0  ;;  %v8236_v13 = vpop.f32.mrb[74].mxu1  ;;  %v4316_v9 = vadd.f32 1.0, %v6105_v48  ;;  %6126 = vpow2.f32 %v3908_v58  ;;  %v3912_v18 = vmul.f32 1.442695, %v3665_v46  ;;  %v5519_v11 = vadd.f32 %v2797_v31, %v8212_v50 }
 0x25c   : > { %v6107_v19 = vpop.eup %6106  ;;  %v8239_v41 = vpop.f32.mrb[75].mxu0  ;;  %6128 = vrcp.f32 %v4314_v14  ;;  %v3672_v31 = vsub.f32 0.0, %v5518_v29 }
 0x25d   : > { %v6109_v0 = vpop.eup %6108  ;;  %v4315_v15 = vadd.f32 1.0, %v6107_v19  ;;  %v8241_v42 = vpop.f32.mrb[75].mxu1  ;;  %6130 = vrcp.f32 %v4316_v9  ;;  %3097 = vmatmul.mubr.bf16.gmra.mrb[180].mxu0 %v9644_v38  ;;  %3457 = vmatmul.mubr.bf16.gmra.mrb[180].mxu1 %v9644_v38  ;;  %v3664_v19 = vsub.f32 0.0, %v5453_v8 }
 0x25e   : > { %v6111_v28 = vpop.eup %6110  ;;  %v4317_v16 = vadd.f32 1.0, %v6109_v0  ;;  %3106 = vmatprep.mubr.bf16.mxu0 %v9645_v21  ;;  %3464 = vmatprep.mubr.bf16.mxu1 %v9645_v21  ;;  %v5454_v0 = vadd.f32 %v2409_v35, %v8198_v23 }
 0x25f   : > { %v6113_v22 = vpop.eup %6112  ;;  %6132 = vrcp.f32 %v4315_v15  ;;  %v4321_v58 = vadd.f32 1.0, %v6111_v28  ;;  %v3910_v46 = vmul.f32 1.442695, %v3664_v19 }
 0x260   : > { %v6115_v48 = vpop.eup %6114  ;;  %6134 = vrcp.f32 %v4317_v16  ;;  %v4323_v14 = vadd.f32 1.0, %v6113_v22  ;;  %v2419_v38 = vpop.f32.mrb[76].mxu0  ;;  %v3666_v22 = vsub.f32 0.0, %v5517_v10  ;;  %v3670_v10 = vsub.f32 0.0, %v5454_v0 }
 0x261   : > { %v6117_v9 = vpop.eup %6116  ;;  %6136 = vrcp.f32 %v4321_v58  ;;  %v4322_v32 = vadd.f32 1.0, %v6115_v48  ;;  %v2805_v6 = vpop.f32.mrb[76].mxu1  ;;  %v5455_v58 = vadd.f32 %v2411_v26, %v8208_v51  ;;  %v5521_v0 = vadd.f32 %v8241_v42, %v8212_v50 }
 0x262   : > { %v6119_v15 = vpop.eup %6118  ;;  %6138 = vrcp.f32 %v4323_v14  ;;  %v4324_v28 = vadd.f32 1.0, %v6117_v9  ;;  %v8251_v7 = vpop.f32.mrb[77].mxu0  ;;  %v3914_v29 = vmul.f32 1.442695, %v3666_v22  ;;  %v3926_v22 = vmul.f32 1.442695, %v3672_v31 }
 0x263   : > { %v8253_v21 = vpop.f32.mrb[77].mxu1  ;;  %v6121_v16 = vpop.eup %6120  ;;  %6140 = vrcp.f32 %v4322_v32  ;;  %v4328_v8 = vadd.f32 1.0, %v6119_v15  ;;  %v5456_v32 = vadd.f32 %v2413_v3, %v8198_v23  ;;  %v5457_v3 = vadd.f32 %v8239_v41, %v8208_v51 }
 0x264   : > { %v8256_v48 = vpop.f32.mrb[78].mxu0  ;;  %v8258_v35 = vpop.f32.mrb[78].mxu1  ;;  %6142 = vrcp.f32 %v4324_v28  ;;  %v4330_v14 = vadd.f32 1.0, %v6121_v16  ;;  %v5520_v28 = vadd.f32 %v8236_v13, %v8202_v53  ;;  %v9646_v16 = vld [vmem:[#allocation30_spill] sm:$0xff]  ;;  %v3673_v13 = vsub.f32 0.0, %v5519_v11 }
 0x265   : > { %v6123_v1 = vpop.eup %6122  ;;  %v8261_v9 = vpop.f32.mrb[79].mxu0  ;;  %6144 = vrcp.f32 %v4328_v8  ;;  %3107 = vmatmul.mubr.bf16.gmra.mrb[184].mxu0 %v9646_v16  ;;  %3465 = vmatmul.mubr.bf16.gmra.mrb[184].mxu1 %v9646_v16  ;;  %v5458_v41 = vadd.f32 %v2419_v38, %v8198_v23  ;;  %v5522_v42 = vadd.f32 %v2805_v6, %v8202_v53  ;;  %v3680_v31 = vsub.f32 0.0, %v5521_v0 }
 0x266   : > { %v8263_v27 = vpop.f32.mrb[79].mxu1  ;;  %v6125_v24 = vpop.eup %6124  ;;  %v4329_v26 = vadd.f32 1.0, %v6123_v1  ;;  %6146 = vrcp.f32 %v4330_v14  ;;  %v3671_v1 = vsub.f32 0.0, %v5455_v58  ;;  %3116 = vmatprep.mubr.bf16.mxu0 %v7815_v5  ;;  %3472 = vmatprep.mubr.bf16.mxu1 %v7815_v5  ;;  %v3922_v58 = vmul.f32 1.442695, %v3670_v10 }
 0x267   : > { %v6127_v15 = vpop.eup %6126  ;;  %v4331_v19 = vadd.f32 1.0, %v6125_v24  ;;  %v3679_v11 = vsub.f32 0.0, %v5520_v28  ;;  %v3684_v59 = vsub.f32 0.0, %v5458_v41 }
 0x268   : > { %v6129_v54 = vpop.eup %6128  ;;  %6148 = vrcp.f32 %v4329_v26  ;;  %v4335_v8 = vadd.f32 1.0, %v6127_v15  ;;  %v3677_v26 = vsub.f32 0.0, %v5456_v32  ;;  %v8284_v15 = vpop.f32.mrb[80].mxu0  ;;  %v3924_v38 = vmul.f32 1.442695, %v3671_v1 }
 0x269   : > { %v6131_v24 = vpop.eup %6130  ;;  %4762 = vst [vmem:[%s8268_s9] sm:$0xff] %v6129_v54  ;;  %6150 = vrcp.f32 %v4331_v19  ;;  %v8286_v5 = vpop.f32.mrb[80].mxu1  ;;  %v3678_v32 = vsub.f32 0.0, %v5457_v3  ;;  %v3940_v3 = vmul.f32 1.442695, %v3679_v11 }
 0x26a   : > { %v6133_v14 = vpop.eup %6132  ;;  %4764 = vst [vmem:[%s8268_s9 + $0x10] sm:$0xff] %v6131_v24  ;;  %6152 = vrcp.f32 %v4335_v8  ;;  %v8290_v19 = vpop.f32.mrb[81].mxu0 }
 0x26b   : > { %v6135_v54 = vpop.eup %6134  ;;  %4763 = vst [vmem:[%s8268_s9 + $0x8] sm:$0xff] %v6133_v14  ;;  %6154 = vpow2.f32 %v3912_v18  ;;  %v8292_v16 = vpop.f32.mrb[81].mxu1  ;;  %v3928_v18 = vmul.f32 1.442695, %v3673_v13  ;;  %v3936_v14 = vmul.f32 1.442695, %v3677_v26 }
 0x26c   : > { %v6137_v10 = vpop.eup %6136  ;;  %4765 = vst [vmem:[%s8268_s9 + $0x18] sm:$0xff] %v6135_v54  ;;  %6156 = vpow2.f32 %v3910_v46  ;;  %v8295_v8 = vpop.f32.mrb[82].mxu0  ;;  %v3938_v0 = vmul.f32 1.442695, %v3678_v32  ;;  %v3942_v26 = vmul.f32 1.442695, %v3680_v31 }
 0x26d   : > { %v6139_v24 = vpop.eup %6138  ;;  %4769 = vst [vmem:[%s8268_s9 + $0x38] sm:$0xff] %v6137_v10  ;;  %6158 = vpow2.f32 %v3914_v29  ;;  %v8298_v28 = vpop.f32.mrb[82].mxu1  ;;  %v3686_v29 = vsub.f32 0.0, %v5522_v42  ;;  %3117 = vmatmul.mubr.bf16.gmra.mrb[188].mxu0 %v7812_v61  ;;  %3473 = vmatmul.mubr.bf16.gmra.mrb[188].mxu1 %v7812_v61  ;;  %v3950_v61 = vmul.f32 1.442695, %v3684_v59 }
 0x26e   : > { %v6141_v6 = vpop.eup %6140  ;;  %4771 = vst [vmem:[%s8268_s9 + $0x48] sm:$0xff] %v6139_v24  ;;  %6160 = vpow2.f32 %v3922_v58  ;;  %v8301_v54 = vpop.f32.mrb[83].mxu0  ;;  %5300 = vmatprep.mubr.msk.bf16.mxu0 %vm2113_vm1, %v7433_v47  ;;  %5316 = vmatprep.mubr.msk.bf16.mxu1 %vm2113_vm1, %v7433_v47 }
 0x26f   : > { %v8303_v46 = vpop.f32.mrb[83].mxu1  ;;  %v6143_v1 = vpop.eup %6142  ;;  %4770 = vst [vmem:[%s8268_s9 + $0x40] sm:$0xff] %v6141_v6  ;;  %6162 = vpow2.f32 %v3926_v22  ;;  %v3954_v42 = vmul.f32 1.442695, %v3686_v29  ;;  %v5465_v60 = vadd.f32 %v8301_v54, %v8208_v51 }
 0x270   : > { %v6145_v13 = vpop.eup %6144  ;;  %4772 = vst [vmem:[%s8268_s9 + $0x50] sm:$0xff] %v6143_v1  ;;  %6164 = vpow2.f32 %v3924_v38  ;;  %v8315_v22 = vpop.f32.mrb[84].mxu0 }
 0x271   : > { %v6147_v58 = vpop.eup %6146  ;;  %4776 = vst [vmem:[%s8268_s9 + $0x70] sm:$0xff] %v6145_v13  ;;  %6166 = vpow2.f32 %v3928_v18  ;;  %v8318_v10 = vpop.f32.mrb[84].mxu1 }
 0x272   : > { %v6149_v41 = vpop.eup %6148  ;;  %4778 = vst [vmem:[%s8268_s9 + $0x80] sm:$0xff] %v6147_v58  ;;  %6168 = vpow2.f32 %v3936_v14  ;;  %v8321_v47 = vpop.f32.mrb[85].mxu0  ;;  %v5459_v14 = vadd.f32 %v8251_v7, %v8208_v51 }
 0x273   : > { %v6151_v11 = vpop.eup %6150  ;;  %4777 = vst [vmem:[%s8268_s9 + $0x78] sm:$0xff] %v6149_v41  ;;  %6170 = vpow2.f32 %v3940_v3  ;;  %v8323_v32 = vpop.f32.mrb[85].mxu1 }
 0x274   : > { %v6153_v38 = vpop.eup %6152  ;;  %4779 = vst [vmem:[%s8268_s9 + $0x88] sm:$0xff] %v6151_v11  ;;  %6172 = vpow2.f32 %v3938_v0  ;;  %v8326_v18 = vpop.f32.mrb[86].mxu0  ;;  %v5523_v0 = vadd.f32 %v8253_v21, %v8212_v50 }
 0x275   : > { %v6155_v24 = vpop.eup %6154  ;;  %4783 = vst [vmem:[%s8268_s9 + $0xa8] sm:$0xff] %v6153_v38  ;;  %6174 = vpow2.f32 %v3942_v26  ;;  %v8328_v59 = vpop.f32.mrb[86].mxu1  ;;  %3160 = vmatmul.mubr.bf16.vlgmr.msra.gmra.mrb[128].mxu0 %v7425_v43  ;;  %3514 = vmatmul.mubr.bf16.vlgmr.msra.gmra.mrb[192].mxu1 %v7425_v43 }
 0x276   : > { %v6157_v31 = vpop.eup %6156  ;;  %v4337_v6 = vadd.f32 1.0, %v6155_v24  ;;  %6176 = vpow2.f32 %v3950_v61  ;;  %v8332_v1 = vpop.f32.mrb[87].mxu0  ;;  %5301 = vmatprep.mubr.msk.bf16.mxu0 %vm2113_vm1, %v7477_v30  ;;  %5317 = vmatprep.mubr.msk.bf16.mxu1 %vm2113_vm1, %v7477_v30  ;;  %v5460_v61 = vadd.f32 %v8256_v48, %v8198_v23  ;;  %v5524_v48 = vadd.f32 %v8258_v35, %v8202_v53 }
 0x277   : > { %v8334_v3 = vpop.f32.mrb[87].mxu1  ;;  %v6159_v29 = vpop.eup %6158  ;;  %v4336_v13 = vadd.f32 1.0, %v6157_v31  ;;  %6178 = vpow2.f32 %v3954_v42  ;;  %v3685_v42 = vsub.f32 0.0, %v5459_v14  ;;  %v5525_v35 = vadd.f32 %v8263_v27, %v8212_v50 }
 0x278   : > { %v6161_v58 = vpop.eup %6160  ;;  %6180 = vrcp.f32 %v4337_v6  ;;  %v4338_v26 = vadd.f32 1.0, %v6159_v29  ;;  %v8346_v43 = vpop.f32.mrb[88].mxu0  ;;  %v3687_v6 = vsub.f32 0.0, %v5523_v0  ;;  %v5461_v0 = vadd.f32 %v8261_v9, %v8208_v51 }
 0x279   : > { %v6163_v7 = vpop.eup %6162  ;;  %6182 = vrcp.f32 %v4336_v13  ;;  %v4342_v41 = vadd.f32 1.0, %v6161_v58  ;;  %v8348_v38 = vpop.f32.mrb[88].mxu1  ;;  %v3952_v4 = vmul.f32 1.442695, %v3685_v42  ;;  %v5526_v42 = vadd.f32 %v8286_v5, %v8202_v53 }
 0x27a   : > { %v6165_v21 = vpop.eup %6164  ;;  %6184 = vrcp.f32 %v4338_v26  ;;  %v4344_v11 = vadd.f32 1.0, %v6163_v7  ;;  %v8350_v29 = vpop.f32.mrb[89].mxu0  ;;  %v5527_v5 = vadd.f32 %v8292_v16, %v8212_v50 }
 0x27b   : > { %v6167_v24 = vpop.eup %6166  ;;  %6186 = vrcp.f32 %v4342_v41  ;;  %v4343_v31 = vadd.f32 1.0, %v6165_v21  ;;  %v8352_v30 = vpop.f32.mrb[89].mxu1  ;;  %v3691_v41 = vsub.f32 0.0, %v5460_v61  ;;  %v5462_v61 = vadd.f32 %v8284_v15, %v8198_v23 }
 0x27c   : > { %v6169_v13 = vpop.eup %6168  ;;  %6188 = vrcp.f32 %v4344_v11  ;;  %v4345_v58 = vadd.f32 1.0, %v6167_v24  ;;  %v8356_v26 = vpop.f32.mrb[90].mxu0  ;;  %v3692_v15 = vsub.f32 0.0, %v5461_v0 }
 0x27d   : > { %v8358_v14 = vpop.f32.mrb[90].mxu1  ;;  %v6171_v7 = vpop.eup %6170  ;;  %6190 = vrcp.f32 %v4343_v31  ;;  %v4349_v2 = vadd.f32 1.0, %v6169_v13  ;;  %v3956_v31 = vmul.f32 1.442695, %v3687_v6  ;;  %3170 = vmatmul.mubr.bf16.gmra.mrb[132].mxu0 %v7469_v25  ;;  %3522 = vmatmul.mubr.bf16.gmra.mrb[196].mxu1 %v7469_v25  ;;  %v5463_v25 = vadd.f32 %v8290_v19, %v8208_v51 }
 0x27e   : > { %v8362_v21 = vpop.f32.mrb[91].mxu0  ;;  %v8364_v37 = vpop.f32.mrb[91].mxu1  ;;  %6192 = vrcp.f32 %v4345_v58  ;;  %v4351_v24 = vadd.f32 1.0, %v6171_v7  ;;  %v3693_v58 = vsub.f32 0.0, %v5524_v48  ;;  %5302 = vmatprep.mubr.msk.bf16.mxu0 %vm2113_vm1, %v7521_v17  ;;  %5318 = vmatprep.mubr.msk.bf16.mxu1 %vm2113_vm1, %v7521_v17  ;;  %v3694_v48 = vsub.f32 0.0, %v5525_v35 }
 0x27f   : > { %v6173_v11 = vpop.eup %6172  ;;  %6194 = vrcp.f32 %v4349_v2  ;;  %v3698_v0 = vsub.f32 0.0, %v5462_v61  ;;  %v5464_v19 = vadd.f32 %v8295_v8, %v8198_v23  ;;  %v3966_v8 = vmul.f32 1.442695, %v3692_v15 }
 0x280   : > { %v6175_v33 = vpop.eup %6174  ;;  %v4350_v62 = vadd.f32 1.0, %v6173_v11  ;;  %6196 = vrcp.f32 %v4351_v24  ;;  %v8382_v7 = vpop.f32.mrb[92].mxu0  ;;  %v3968_v16 = vmul.f32 1.442695, %v3693_v58 }
 0x281   : > { %v6177_v9 = vpop.eup %6176  ;;  %v4352_v13 = vadd.f32 1.0, %v6175_v33  ;;  %v8384_v11 = vpop.f32.mrb[92].mxu1  ;;  %v3705_v15 = vsub.f32 0.0, %v5464_v19 }
 0x282   : > { %v6179_v2 = vpop.eup %6178  ;;  %6198 = vrcp.f32 %v4350_v62  ;;  %v4356_v27 = vadd.f32 1.0, %v6177_v9  ;;  %v3964_v62 = vmul.f32 1.442695, %v3691_v41  ;;  %v8389_v24 = vpop.f32.mrb[93].mxu0 }
 0x283   : > { %v6181_v6 = vpop.eup %6180  ;;  %6200 = vrcp.f32 %v4352_v13  ;;  %v4358_v33 = vadd.f32 1.0, %v6179_v2  ;;  %v8391_v9 = vpop.f32.mrb[93].mxu1  ;;  %v3700_v13 = vsub.f32 0.0, %v5526_v42  ;;  %v5528_v2 = vadd.f32 %v8298_v28, %v8202_v53 }
 0x284   : > { %v6183_v17 = vpop.eup %6182  ;;  %4785 = vst [vmem:[%s8268_s9 + $0xb8] sm:$0xff] %v6181_v6  ;;  %6202 = vrcp.f32 %v4356_v27  ;;  %v8396_v6 = vpop.f32.mrb[94].mxu0  ;;  %v3699_v27 = vsub.f32 0.0, %v5463_v25  ;;  %v3970_v28 = vmul.f32 1.442695, %v3694_v48  ;;  %v3701_v42 = vsub.f32 0.0, %v5527_v5 }
 0x285   : > { %v6185_v35 = vpop.eup %6184  ;;  %4784 = vst [vmem:[%s8268_s9 + $0xb0] sm:$0xff] %v6183_v17  ;;  %6204 = vrcp.f32 %v4358_v33  ;;  %v8398_v41 = vpop.f32.mrb[94].mxu1  ;;  %3180 = vmatmul.mubr.bf16.gmra.mrb[136].mxu0 %v7513_v12  ;;  %3530 = vmatmul.mubr.bf16.gmra.mrb[200].mxu1 %v7513_v12  ;;  %v3982_v25 = vmul.f32 1.442695, %v3700_v13 }
 0x286   : > { %v6187_v61 = vpop.eup %6186  ;;  %4786 = vst [vmem:[%s8268_s9 + $0xc0] sm:$0xff] %v6185_v35  ;;  %6206 = vpow2.f32 %v3952_v4  ;;  %v8403_v33 = vpop.f32.mrb[95].mxu0  ;;  %v3978_v4 = vmul.f32 1.442695, %v3698_v0  ;;  %5303 = vmatprep.mubr.msk.bf16.mxu0 %vm2113_vm1, %v7565_v63  ;;  %5319 = vmatprep.mubr.msk.bf16.mxu1 %vm2113_vm1, %v7565_v63  ;;  %v3980_v5 = vmul.f32 1.442695, %v3699_v27 }
 0x287   : > { %v6189_v58 = vpop.eup %6188  ;;  %4790 = vst [vmem:[%s8268_s9 + $0xe0] sm:$0xff] %v6187_v61  ;;  %6208 = vpow2.f32 %v3956_v31  ;;  %v8406_v17 = vpop.f32.mrb[95].mxu1  ;;  %v3707_v31 = vsub.f32 0.0, %v5528_v2  ;;  %v3984_v12 = vmul.f32 1.442695, %v3701_v42 }
 0x288   : > { %v6191_v20 = vpop.eup %6190  ;;  %4792 = vst [vmem:[%s8268_s9 + $0xf0] sm:$0xff] %v6189_v58  ;;  %6210 = vpow2.f32 %v3964_v62  ;;  %v3706_v62 = vsub.f32 0.0, %v5465_v60  ;;  %v8420_v19 = vpop.f32.mrb[96].mxu1  ;;  %v3992_v63 = vmul.f32 1.442695, %v3705_v15 }
 0x289   : > { %v6193_v54 = vpop.eup %6192  ;;  %4791 = vst [vmem:[%s8268_s9 + $0xe8] sm:$0xff] %v6191_v20  ;;  %6212 = vpow2.f32 %v3968_v16  ;;  %v8418_v20 = vpop.f32.mrb[96].mxu0  ;;  %v3996_v60 = vmul.f32 1.442695, %v3707_v31 }
 0x28a   : > { %v6195_v48 = vpop.eup %6194  ;;  %4793 = vst [vmem:[%s8268_s9 + $0xf8] sm:$0xff] %v6193_v54  ;;  %6214 = vpow2.f32 %v3966_v8  ;;  %v8423_v16 = vpop.f32.mrb[97].mxu0  ;;  %v3994_v27 = vmul.f32 1.442695, %v3706_v62  ;;  %v5529_v54 = vadd.f32 %v8303_v46, %v8212_v50 }
 0x28b   : > { %v6197_v0 = vpop.eup %6196  ;;  %4797 = vst [vmem:[%s8268_s9 + $0x118] sm:$0xff] %v6195_v48  ;;  %6216 = vpow2.f32 %v3970_v28  ;;  %v8426_v2 = vpop.f32.mrb[97].mxu1 }
 0x28c   : > { %v6199_v35 = vpop.eup %6198  ;;  %4799 = vst [vmem:[%s8268_s9 + $0x128] sm:$0xff] %v6197_v0  ;;  %6218 = vpow2.f32 %v3978_v4  ;;  %v8428_v61 = vpop.f32.mrb[98].mxu0 }
 0x28d   : > { %v6201_v13 = vpop.eup %6200  ;;  %4798 = vst [vmem:[%s8268_s9 + $0x120] sm:$0xff] %v6199_v35  ;;  %6220 = vpow2.f32 %v3982_v25  ;;  %v8431_v58 = vpop.f32.mrb[98].mxu1  ;;  %3190 = vmatmul.mubr.bf16.gmra.mrb[140].mxu0 %v7557_v57  ;;  %3538 = vmatmul.mubr.bf16.gmra.mrb[204].mxu1 %v7557_v57 }
 0x28e   : > { %v6203_v8 = vpop.eup %6202  ;;  %4800 = vst [vmem:[%s8268_s9 + $0x130] sm:$0xff] %v6201_v13  ;;  %6222 = vpow2.f32 %v3980_v5  ;;  %v8433_v28 = vpop.f32.mrb[99].mxu0  ;;  %5304 = vmatprep.mubr.msk.bf16.mxu0 %vm2113_vm1, %v7606_v56  ;;  %5320 = vmatprep.mubr.msk.bf16.mxu1 %vm2113_vm1, %v7606_v56  ;;  %v5466_v13 = vadd.f32 %v8315_v22, %v8198_v23  ;;  %v5467_v22 = vadd.f32 %v8321_v47, %v8208_v51 }
 0x28f   : > { %v6205_v42 = vpop.eup %6204  ;;  %4804 = vst [vmem:[%s8268_s9 + $0x150] sm:$0xff] %v6203_v8  ;;  %6224 = vpow2.f32 %v3984_v12  ;;  %v8436_v4 = vpop.f32.mrb[99].mxu1 }
 0x290   : > { %v6207_v15 = vpop.eup %6206  ;;  %4806 = vst [vmem:[%s8268_s9 + $0x160] sm:$0xff] %v6205_v42  ;;  %6226 = vpow2.f32 %v3992_v63  ;;  %v8447_v46 = vpop.f32.mrb[100].mxu0  ;;  %v3708_v63 = vsub.f32 0.0, %v5529_v54  ;;  %v5530_v42 = vadd.f32 %v8318_v10, %v8202_v53  ;;  %v5531_v10 = vadd.f32 %v8323_v32, %v8212_v50 }
 0x291   : > { %v6209_v25 = vpop.eup %6208  ;;  %v4357_v31 = vadd.f32 1.0, %v6207_v15  ;;  %6228 = vpow2.f32 %v3996_v60  ;;  %v8449_v12 = vpop.f32.mrb[100].mxu1 }
 0x292   : > { %v6211_v48 = vpop.eup %6210  ;;  %v4359_v5 = vadd.f32 1.0, %v6209_v25  ;;  %6230 = vpow2.f32 %v3994_v27  ;;  %v8453_v60 = vpop.f32.mrb[101].mxu0 }
 0x293   : > { %v6213_v62 = vpop.eup %6212  ;;  %6232 = vrcp.f32 %v4357_v31  ;;  %v4363_v0 = vadd.f32 1.0, %v6211_v48  ;;  %v8455_v56 = vpop.f32.mrb[101].mxu1 }
 0x294   : > { %v6215_v57 = vpop.eup %6214  ;;  %6234 = vrcp.f32 %v4359_v5  ;;  %v4365_v35 = vadd.f32 1.0, %v6213_v62  ;;  %9647 = vst [vmem:[#allocation3_spill] sm:$0xff] %v8455_v56  ;;  %v8459_v15 = vpop.f32.mrb[102].mxu0  ;;  %v3712_v56 = vsub.f32 0.0, %v5466_v13  ;;  %v3713_v13 = vsub.f32 0.0, %v5467_v22 }
 0x295   : > { %v6217_v8 = vpop.eup %6216  ;;  %6236 = vrcp.f32 %v4363_v0  ;;  %v4364_v27 = vadd.f32 1.0, %v6215_v57  ;;  %9648 = vst [vmem:[#allocation5_spill] sm:$0xff] %v8459_v15  ;;  %v8461_v25 = vpop.f32.mrb[102].mxu1  ;;  %3200 = vmatmul.mubr.bf16.gmra.mrb[144].mxu0 %v7601_v52  ;;  %3546 = vmatmul.mubr.bf16.gmra.mrb[208].mxu1 %v7601_v52  ;;  %v5532_v52 = vadd.f32 %v8328_v59, %v8202_v53  ;;  %v5533_v22 = vadd.f32 %v8334_v3, %v8212_v50 }
 0x296   : > { %9649 = vst [vmem:[#allocation4_spill] sm:$0xff] %v8461_v25  ;;  %v6219_v31 = vpop.eup %6218  ;;  %6238 = vrcp.f32 %v4365_v35  ;;  %v4366_v54 = vadd.f32 1.0, %v6217_v8  ;;  %v8465_v48 = vpop.f32.mrb[103].mxu0  ;;  %v3998_v25 = vmul.f32 1.442695, %v3708_v63  ;;  %v3714_v8 = vsub.f32 0.0, %v5530_v42  ;;  %5305 = vmatprep.mubr.msk.bf16.mxu0 %vm2113_vm1, %v7626_v45  ;;  %5321 = vmatprep.mubr.msk.bf16.mxu1 %vm2113_vm1, %v7626_v45 }
 0x297   : > { %v8467_v5 = vpop.f32.mrb[103].mxu1  ;;  %v6221_v62 = vpop.eup %6220  ;;  %6240 = vrcp.f32 %v4364_v27  ;;  %v4370_v0 = vadd.f32 1.0, %v6219_v31  ;;  %v5468_v27 = vadd.f32 %v8326_v18, %v8198_v23  ;;  %v3715_v42 = vsub.f32 0.0, %v5531_v10 }
 0x298   : > { %v6223_v57 = vpop.eup %6222  ;;  %6242 = vrcp.f32 %v4366_v54  ;;  %v4372_v15 = vadd.f32 1.0, %v6221_v62  ;;  %v5469_v18 = vadd.f32 %v8332_v1, %v8208_v51  ;;  %v8483_v62 = vpop.f32.mrb[104].mxu0  ;;  %v4010_v3 = vmul.f32 1.442695, %v3714_v8 }
 0x299   : > { %v6225_v47 = vpop.eup %6224  ;;  %6244 = vrcp.f32 %v4370_v0  ;;  %v4371_v35 = vadd.f32 1.0, %v6223_v57  ;;  %v8485_v0 = vpop.f32.mrb[104].mxu1  ;;  %v4006_v57 = vmul.f32 1.442695, %v3712_v56  ;;  %v4012_v8 = vmul.f32 1.442695, %v3715_v42 }
 0x29a   : > { %v6227_v32 = vpop.eup %6226  ;;  %6246 = vrcp.f32 %v4372_v15  ;;  %v4373_v63 = vadd.f32 1.0, %v6225_v47  ;;  %9650 = vst [vmem:[#allocation7_spill] sm:$0xff] %v8485_v0  ;;  %v8489_v59 = vpop.f32.mrb[105].mxu0 }
 0x29b   : > { %v6229_v31 = vpop.eup %6228  ;;  %6248 = vrcp.f32 %v4371_v35  ;;  %v4377_v54 = vadd.f32 1.0, %v6227_v32  ;;  %9651 = vst [vmem:[#allocation6_spill] sm:$0xff] %v8489_v59  ;;  %v8491_v47 = vpop.f32.mrb[105].mxu1  ;;  %v3719_v35 = vsub.f32 0.0, %v5468_v27  ;;  %v5470_v32 = vadd.f32 %v8346_v43, %v8198_v23 }
 0x29c   : > { %v6231_v45 = vpop.eup %6230  ;;  %6250 = vrcp.f32 %v4373_v63  ;;  %v4379_v15 = vadd.f32 1.0, %v6229_v31  ;;  %9652 = vst [vmem:[#allocation9_spill] sm:$0xff] %v8491_v47  ;;  %v8495_v0 = vpop.f32.mrb[106].mxu0  ;;  %v3721_v31 = vsub.f32 0.0, %v5532_v52  ;;  %v5534_v47 = vadd.f32 %v8348_v38, %v8202_v53 }
 0x29d   : > { %v6233_v10 = vpop.eup %6232  ;;  %6252 = vrcp.f32 %v4377_v54  ;;  %v4378_v1 = vadd.f32 1.0, %v6231_v45  ;;  %v8497_v63 = vpop.f32.mrb[106].mxu1  ;;  %v4008_v43 = vmul.f32 1.442695, %v3713_v13  ;;  %v3720_v45 = vsub.f32 0.0, %v5469_v18  ;;  %3210 = vmatmul.mubr.bf16.gmra.mrb[148].mxu0 %v7621_v40  ;;  %3554 = vmatmul.mubr.bf16.gmra.mrb[212].mxu1 %v7621_v40 }
 0x29e   : > { %9653 = vst [vmem:[#allocation8_spill] sm:$0xff] %v8497_v63  ;;  %v6235_v56 = vpop.eup %6234  ;;  %4805 = vst [vmem:[%s8268_s9 + $0x158] sm:$0xff] %v6233_v10  ;;  %6254 = vrcp.f32 %v4379_v15  ;;  %v8502_v59 = vpop.f32.mrb[107].mxu0  ;;  %v5471_v63 = vadd.f32 %v8350_v29, %v8208_v51  ;;  %v3722_v52 = vsub.f32 0.0, %v5533_v22  ;;  %v5535_v38 = vadd.f32 %v8352_v30, %v8212_v50  ;;  %5306 = vmatprep.mubr.msk.bf16.mxu0 %vm2113_vm1, %v7646_v39 }
 0x29f   : > { %v8504_v54 = vpop.f32.mrb[107].mxu1  ;;  %v6237_v27 = vpop.eup %6236  ;;  %4807 = vst [vmem:[%s8268_s9 + $0x168] sm:$0xff] %v6235_v56  ;;  %6256 = vrcp.f32 %v4378_v1  ;;  %v4020_v13 = vmul.f32 1.442695, %v3719_v35  ;;  %v3726_v18 = vsub.f32 0.0, %v5470_v32  ;;  %5322 = vmatprep.mubr.msk.bf16.mxu1 %vm2113_vm1, %v7646_v39 }
 0x2a0   : > { %v6239_v10 = vpop.eup %6238  ;;  %4811 = vst [vmem:[%s8268_s9 + $0x188] sm:$0xff] %v6237_v27  ;;  %6258 = vpow2.f32 %v3998_v25  ;;  %v4024_v30 = vmul.f32 1.442695, %v3721_v31  ;;  %v3728_v25 = vsub.f32 0.0, %v5534_v47  ;;  %v4022_v40 = vmul.f32 1.442695, %v3720_v45 }
 0x2a1   : > { %v6241_v15 = vpop.eup %6240  ;;  %4813 = vst [vmem:[%s8268_s9 + $0x198] sm:$0xff] %v6239_v10  ;;  %6260 = vpow2.f32 %v4006_v57  ;;  %v3727_v57 = vsub.f32 0.0, %v5471_v63  ;;  %v8521_v22 = vpop.f32.mrb[108].mxu0  ;;  %v4026_v39 = vmul.f32 1.442695, %v3722_v52  ;;  %v3729_v32 = vsub.f32 0.0, %v5535_v38 }
 0x2a2   : > { %v6243_v29 = vpop.eup %6242  ;;  %4812 = vst [vmem:[%s8268_s9 + $0x190] sm:$0xff] %v6241_v15  ;;  %6262 = vpow2.f32 %v4010_v3  ;;  %v8523_v1 = vpop.f32.mrb[108].mxu1  ;;  %v4034_v63 = vmul.f32 1.442695, %v3726_v18  ;;  %v4038_v45 = vmul.f32 1.442695, %v3728_v25 }
 0x2a3   : > { %v6245_v42 = vpop.eup %6244  ;;  %4814 = vst [vmem:[%s8268_s9 + $0x1a0] sm:$0xff] %v6243_v29  ;;  %6264 = vpow2.f32 %v4008_v43  ;;  %v8526_v56 = vpop.f32.mrb[109].mxu0  ;;  %v4036_v38 = vmul.f32 1.442695, %v3727_v57 }
 0x2a4   : > { %v6247_v35 = vpop.eup %6246  ;;  %4818 = vst [vmem:[%s8268_s9 + $0x1c0] sm:$0xff] %v6245_v42  ;;  %6266 = vpow2.f32 %v4012_v8  ;;  %v8528_v47 = vpop.f32.mrb[109].mxu1 }
 0x2a5   : > { %v6249_v3 = vpop.eup %6248  ;;  %4820 = vst [vmem:[%s8268_s9 + $0x1d0] sm:$0xff] %v6247_v35  ;;  %6268 = vpow2.f32 %v4020_v13  ;;  %v8531_v31 = vpop.f32.mrb[110].mxu0  ;;  %v4040_v13 = vmul.f32 1.442695, %v3729_v32  ;;  %3220 = vmatmul.mubr.bf16.gmra.mrb[152].mxu0 %v7641_v34  ;;  %3562 = vmatmul.mubr.bf16.gmra.mrb[216].mxu1 %v7641_v34  ;;  %v5536_v34 = vadd.f32 %v8358_v14, %v8202_v53 }
 0x2a6   : > { %v8533_v27 = vpop.f32.mrb[110].mxu1  ;;  %v6251_v43 = vpop.eup %6250  ;;  %4819 = vst [vmem:[%s8268_s9 + $0x1c8] sm:$0xff] %v6249_v3  ;;  %6270 = vpow2.f32 %v4024_v30  ;;  %5307 = vmatprep.mubr.msk.bf16.mxu0 %vm2113_vm1, %v7666_v44  ;;  %5323 = vmatprep.mubr.msk.bf16.mxu1 %vm2113_vm1, %v7666_v44  ;;  %v5472_v30 = vadd.f32 %v8356_v26, %v8198_v23 }
 0x2a7   : > { %v8536_v10 = vpop.f32.mrb[111].mxu0  ;;  %v8538_v8 = vpop.f32.mrb[111].mxu1  ;;  %4821 = vst [vmem:[%s8268_s9 + $0x1d8] sm:$0xff] %v6251_v43  ;;  %6272 = vpow2.f32 %v4022_v40 }
 0x2a8   : > { %v6253_v52 = vpop.eup %6252  ;;  %6274 = vpow2.f32 %v4026_v39  ;;  %v8554_v40 = vpop.f32.mrb[112].mxu0 }
 0x2a9   : > { %v6255_v15 = vpop.eup %6254  ;;  %4825 = vst [vmem:[%s8268_s9 + $0x1f8] sm:$0xff] %v6253_v52  ;;  %6276 = vpow2.f32 %v4034_v63  ;;  %v8556_v57 = vpop.f32.mrb[112].mxu1  ;;  %v3733_v52 = vsub.f32 0.0, %v5472_v30 }
 0x2aa   : > { %v6257_v18 = vpop.eup %6256  ;;  %4827 = vst [vmem:[%s8268_s9 + $0x208] sm:$0xff] %v6255_v15  ;;  %6278 = vpow2.f32 %v4038_v45  ;;  %v8558_v44 = vpop.f32.mrb[113].mxu0 }
 0x2ab   : > { %v6259_v29 = vpop.eup %6258  ;;  %4826 = vst [vmem:[%s8268_s9 + $0x200] sm:$0xff] %v6257_v18  ;;  %6280 = vpow2.f32 %v4036_v38  ;;  %v8560_v32 = vpop.f32.mrb[113].mxu1 }
 0x2ac   : > { %v6261_v25 = vpop.eup %6260  ;;  %v4380_v42 = vadd.f32 1.0, %v6259_v29  ;;  %6282 = vpow2.f32 %v4040_v13  ;;  %v8562_v63 = vpop.f32.mrb[114].mxu0  ;;  %v3735_v29 = vsub.f32 0.0, %v5536_v34 }
 0x2ad   : > { %v6263_v35 = vpop.eup %6262  ;;  %v4384_v39 = vadd.f32 1.0, %v6261_v25  ;;  %v8564_v43 = vpop.f32.mrb[114].mxu1  ;;  %3230 = vmatmul.mubr.bf16.gmra.mrb[156].mxu0 %v7661_v36  ;;  %3570 = vmatmul.mubr.bf16.gmra.mrb[220].mxu1 %v7661_v36 }
 0x2ae   : > { %v6265_v3 = vpop.eup %6264  ;;  %6284 = vrcp.f32 %v4380_v42  ;;  %v4386_v26 = vadd.f32 1.0, %v6263_v35  ;;  %v8566_v38 = vpop.f32.mrb[115].mxu0  ;;  %v5473_v35 = vadd.f32 %v8362_v21, %v8208_v51  ;;  %5308 = vmatprep.mubr.msk.bf16.mxu0 %vm2113_vm1, %v7686_v55  ;;  %5324 = vmatprep.mubr.msk.bf16.mxu1 %vm2113_vm1, %v7686_v55  ;;  %v4048_v21 = vmul.f32 1.442695, %v3733_v52 }
 0x2af   : > { %v6267_v45 = vpop.eup %6266  ;;  %6286 = vrcp.f32 %v4384_v39  ;;  %v4385_v14 = vadd.f32 1.0, %v6265_v3  ;;  %v8568_v15 = vpop.f32.mrb[115].mxu1  ;;  %v5537_v3 = vadd.f32 %v8364_v37, %v8212_v50  ;;  %v5538_v37 = vadd.f32 %v8384_v11, %v8202_v53 }
 0x2b0   : > { %9654 = vst [vmem:[#allocation11_spill] sm:$0xff] %v8568_v15  ;;  %v6269_v13 = vpop.eup %6268  ;;  %6288 = vrcp.f32 %v4386_v26  ;;  %v4387_v18 = vadd.f32 1.0, %v6267_v45  ;;  %v5474_v45 = vadd.f32 %v8382_v7, %v8198_v23  ;;  %v5475_v52 = vadd.f32 %v8389_v24, %v8208_v51 }
 0x2b1   : > { %v6271_v25 = vpop.eup %6270  ;;  %6290 = vrcp.f32 %v4385_v14  ;;  %v4391_v42 = vadd.f32 1.0, %v6269_v13  ;;  %v4052_v13 = vmul.f32 1.442695, %v3735_v29  ;;  %v5539_v11 = vadd.f32 %v8391_v9, %v8212_v50 }
 0x2b2   : > { %v6273_v39 = vpop.eup %6272  ;;  %6292 = vrcp.f32 %v4387_v18  ;;  %v4393_v30 = vadd.f32 1.0, %v6271_v25  ;;  %v8584_v18 = vpop.f32.mrb[116].mxu0  ;;  %v3740_v24 = vsub.f32 0.0, %v5474_v45 }
 0x2b3   : > { %v6275_v34 = vpop.eup %6274  ;;  %6294 = vrcp.f32 %v4391_v42  ;;  %v4392_v26 = vadd.f32 1.0, %v6273_v39  ;;  %v8586_v25 = vpop.f32.mrb[116].mxu1  ;;  %v3734_v42 = vsub.f32 0.0, %v5473_v35 }
 0x2b4   : > { %v6277_v36 = vpop.eup %6276  ;;  %6296 = vrcp.f32 %v4393_v30  ;;  %v4394_v14 = vadd.f32 1.0, %v6275_v34  ;;  %9655 = vst [vmem:[#allocation10_spill] sm:$0xff] %v8586_v25  ;;  %v8590_v39 = vpop.f32.mrb[117].mxu0  ;;  %v3736_v34 = vsub.f32 0.0, %v5537_v3 }
 0x2b5   : > { %v6279_v15 = vpop.eup %6278  ;;  %6298 = vrcp.f32 %v4392_v26  ;;  %v4398_v55 = vadd.f32 1.0, %v6277_v36  ;;  %9656 = vst [vmem:[#allocation15_spill] sm:$0xff] %v8590_v39  ;;  %v8592_v7 = vpop.f32.mrb[117].mxu1  ;;  %v5476_v39 = vadd.f32 %v8396_v6, %v8198_v23  ;;  %v4050_v45 = vmul.f32 1.442695, %v3734_v42  ;;  %3240 = vmatmul.mubr.bf16.gmra.mrb[160].mxu0 %v7681_v49  ;;  %3578 = vmatmul.mubr.bf16.gmra.mrb[224].mxu1 %v7681_v49 }
 0x2b6   : > { %9657 = vst [vmem:[#allocation14_spill] sm:$0xff] %v8592_v7  ;;  %v6281_v30 = vpop.eup %6280  ;;  %6300 = vrcp.f32 %v4394_v14  ;;  %v4400_v29 = vadd.f32 1.0, %v6279_v15  ;;  %v8596_v25 = vpop.f32.mrb[118].mxu0  ;;  %v3742_v14 = vsub.f32 0.0, %v5538_v37  ;;  %v5477_v6 = vadd.f32 %v8403_v33, %v8208_v51 }
 0x2b7   : > { %9658 = vst [vmem:[#allocation19_spill] sm:$0xff] %v8596_v25  ;;  %v8598_v26 = vpop.f32.mrb[118].mxu1  ;;  %v6283_v35 = vpop.eup %6282  ;;  %6302 = vrcp.f32 %v4398_v55  ;;  %v4399_v36 = vadd.f32 1.0, %v6281_v30  ;;  %v5540_v25 = vadd.f32 %v8398_v41, %v8202_v53  ;;  %v3741_v55 = vsub.f32 0.0, %v5475_v52 }
 0x2b8   : > { %9659 = vst [vmem:[#allocation18_spill] sm:$0xff] %v8598_v26  ;;  %v8602_v7 = vpop.f32.mrb[119].mxu0  ;;  %v8604_v15 = vpop.f32.mrb[119].mxu1  ;;  %6304 = vrcp.f32 %v4400_v29  ;;  %v4401_v9 = vadd.f32 1.0, %v6283_v35  ;;  %v4054_v37 = vmul.f32 1.442695, %v3736_v34  ;;  %v5541_v41 = vadd.f32 %v8406_v17, %v8212_v50 }
 0x2b9   : > { %v6285_v3 = vpop.eup %6284  ;;  %6306 = vrcp.f32 %v4399_v36  ;;  %v3743_v29 = vsub.f32 0.0, %v5539_v11  ;;  %v9660_v35 = vld [vmem:[#allocation13_spill] sm:$0xff]  ;;  %v4062_v49 = vmul.f32 1.442695, %v3740_v24  ;;  %v3747_v42 = vsub.f32 0.0, %v5476_v39  ;;  %v8626_v36 = vpop.f32.mrb[120].mxu1 }
 0x2ba   : > { %v6287_v26 = vpop.eup %6286  ;;  %4828 = vst [vmem:[%s8268_s9 + $0x210] sm:$0xff] %v6285_v3  ;;  %6308 = vrcp.f32 %v4401_v9  ;;  %5309 = vmatprep.mubr.msk.bf16.mxu0 %vm2113_vm1, %v9660_v35  ;;  %5325 = vmatprep.mubr.msk.bf16.mxu1 %vm2113_vm1, %v9660_v35  ;;  %v5478_v52 = vadd.f32 %v8418_v20, %v8198_v23  ;;  %v4066_v17 = vmul.f32 1.442695, %v3742_v14  ;;  %v3749_v11 = vsub.f32 0.0, %v5540_v25  ;;  %v8631_v9 = vpop.f32.mrb[121].mxu1 }
 0x2bb   : > { %v6289_v30 = vpop.eup %6288  ;;  %4832 = vst [vmem:[%s8268_s9 + $0x230] sm:$0xff] %v6287_v26  ;;  %6310 = vpow2.f32 %v4048_v21  ;;  %v8624_v26 = vpop.f32.mrb[120].mxu0  ;;  %v4064_v21 = vmul.f32 1.442695, %v3741_v55  ;;  %v3748_v24 = vsub.f32 0.0, %v5477_v6  ;;  %v3750_v25 = vsub.f32 0.0, %v5541_v41 }
 0x2bc   : > { %v6291_v33 = vpop.eup %6290  ;;  %4834 = vst [vmem:[%s8268_s9 + $0x240] sm:$0xff] %v6289_v30  ;;  %6312 = vpow2.f32 %v4052_v13  ;;  %v8629_v39 = vpop.f32.mrb[121].mxu0  ;;  %v4068_v13 = vmul.f32 1.442695, %v3743_v29  ;;  %v3754_v55 = vsub.f32 0.0, %v5478_v52  ;;  %v9664_v52 = vld [vmem:[#allocation17_spill] sm:$0xff] }
 0x2bd   : > { %v6293_v34 = vpop.eup %6292  ;;  %4833 = vst [vmem:[%s8268_s9 + $0x238] sm:$0xff] %v6291_v33  ;;  %6314 = vpow2.f32 %v4050_v45  ;;  %v8634_v14 = vpop.f32.mrb[122].mxu0  ;;  %v4076_v45 = vmul.f32 1.442695, %v3747_v42  ;;  %v4078_v41 = vmul.f32 1.442695, %v3748_v24 }
 0x2be   : > { %v6295_v3 = vpop.eup %6294  ;;  %4835 = vst [vmem:[%s8268_s9 + $0x248] sm:$0xff] %v6293_v34  ;;  %6316 = vpow2.f32 %v4054_v37  ;;  %v8636_v30 = vpop.f32.mrb[122].mxu1  ;;  %v4080_v37 = vmul.f32 1.442695, %v3749_v11  ;;  %v4082_v42 = vmul.f32 1.442695, %v3750_v25 }
 0x2bf   : > { %v6297_v20 = vpop.eup %6296  ;;  %4839 = vst [vmem:[%s8268_s9 + $0x268] sm:$0xff] %v6295_v3  ;;  %6318 = vpow2.f32 %v4062_v49  ;;  %v8639_v6 = vpop.f32.mrb[123].mxu0  ;;  %v9663_v3 = vld [vmem:[#allocation12_spill] sm:$0xff]  ;;  %v4090_v11 = vmul.f32 1.442695, %v3754_v55 }
 0x2c0   : > { %v6299_v35 = vpop.eup %6298  ;;  %4841 = vst [vmem:[%s8268_s9 + $0x278] sm:$0xff] %v6297_v20  ;;  %9661 = vst [vmem:[#allocation23_spill] sm:$0xff] %v8639_v6  ;;  %v8641_v33 = vpop.f32.mrb[123].mxu1  ;;  %6320 = vpow2.f32 %v4066_v17  ;;  %3250 = vmatmul.mubr.bf16.gmra.mrb[164].mxu0 %v9663_v3  ;;  %3586 = vmatmul.mubr.bf16.gmra.mrb[228].mxu1 %v9663_v3 }
 0x2c1   : > { %9662 = vst [vmem:[#allocation22_spill] sm:$0xff] %v8641_v33  ;;  %v6301_v34 = vpop.eup %6300  ;;  %4840 = vst [vmem:[%s8268_s9 + $0x270] sm:$0xff] %v6299_v35  ;;  %6322 = vpow2.f32 %v4064_v21  ;;  %5310 = vmatprep.mubr.msk.bf16.mxu0 %vm2113_vm1, %v9664_v52  ;;  %5326 = vmatprep.mubr.msk.bf16.mxu1 %vm2113_vm1, %v9664_v52  ;;  %v8654_v24 = vpop.f32.mrb[124].mxu0 }
 0x2c2   : > { %v6303_v29 = vpop.eup %6302  ;;  %4842 = vst [vmem:[%s8268_s9 + $0x280] sm:$0xff] %v6301_v34  ;;  %6324 = vpow2.f32 %v4068_v13  ;;  %9665 = vst [vmem:[#allocation27_spill] sm:$0xff] %v8654_v24  ;;  %v8656_v20 = vpop.f32.mrb[124].mxu1 }
 0x2c3   : > { %v6305_v49 = vpop.eup %6304  ;;  %4846 = vst [vmem:[%s8268_s9 + $0x2a0] sm:$0xff] %v6303_v29  ;;  %6326 = vpow2.f32 %v4076_v45  ;;  %9666 = vst [vmem:[#allocation26_spill] sm:$0xff] %v8656_v20  ;;  %v8659_v13 = vpop.f32.mrb[125].mxu0  ;;  %v5542_v45 = vadd.f32 %v8420_v19, %v8202_v53 }
 0x2c4   : > { %v6307_v17 = vpop.eup %6306  ;;  %4848 = vst [vmem:[%s8268_s9 + $0x2b0] sm:$0xff] %v6305_v49  ;;  %6328 = vpow2.f32 %v4080_v37  ;;  %9667 = vst [vmem:[#allocation31_spill] sm:$0xff] %v8659_v13  ;;  %v8661_v25 = vpop.f32.mrb[125].mxu1 }
 0x2c5   : > { %v6309_v21 = vpop.eup %6308  ;;  %4847 = vst [vmem:[%s8268_s9 + $0x2a8] sm:$0xff] %v6307_v17  ;;  %6330 = vpow2.f32 %v4078_v41  ;;  %9668 = vst [vmem:[#allocation30_spill] sm:$0xff] %v8661_v25  ;;  %v8665_v55 = vpop.f32.mrb[126].mxu0  ;;  %v5479_v41 = vadd.f32 %v8423_v16, %v8208_v51  ;;  %v5544_v25 = vadd.f32 %v8431_v58, %v8202_v53 }
 0x2c6   : > { %v6311_v35 = vpop.eup %6310  ;;  %4849 = vst [vmem:[%s8268_s9 + $0x2b8] sm:$0xff] %v6309_v21  ;;  %6332 = vpow2.f32 %v4082_v42  ;;  %9669 = vst [vmem:[#allocation13_spill] sm:$0xff] %v8665_v55  ;;  %v8667_v37 = vpop.f32.mrb[126].mxu1  ;;  %v5543_v55 = vadd.f32 %v8426_v2, %v8212_v50 }
 0x2c7   : > { %v6313_v34 = vpop.eup %6312  ;;  %v4405_v29 = vadd.f32 1.0, %v6311_v35  ;;  %9670 = vst [vmem:[#allocation12_spill] sm:$0xff] %v8667_v37  ;;  %6334 = vpow2.f32 %v4090_v11  ;;  %v8671_v52 = vpop.f32.mrb[127].mxu0  ;;  %v9673_v37 = vld [vmem:[#allocation16_spill] sm:$0xff]  ;;  %v3763_v24 = vsub.f32 0.0, %v5544_v25 }
 0x2c8   : > { %v6315_v3 = vpop.eup %6314  ;;  %v4407_v49 = vadd.f32 1.0, %v6313_v34  ;;  %9671 = vst [vmem:[#allocation17_spill] sm:$0xff] %v8671_v52  ;;  %v8673_v17 = vpop.f32.mrb[127].mxu1  ;;  %3260 = vmatmul.mubr.bf16.gmra.mrb[168].mxu0 %v9673_v37  ;;  %3594 = vmatmul.mubr.bf16.gmra.mrb[232].mxu1 %v9673_v37  ;;  %v3756_v34 = vsub.f32 0.0, %v5542_v45  ;;  %v9674_v52 = vld [vmem:[#allocation21_spill] sm:$0xff]  ;;  %v5480_v37 = vadd.f32 %v8428_v61, %v8198_v23 }
 0x2c9   : > { %9672 = vst [vmem:[#allocation36_spill] sm:$0xff] %v8673_v17  ;;  %v6317_v21 = vpop.eup %6316  ;;  %6336 = vrcp.f32 %v4405_v29  ;;  %v4406_v42 = vadd.f32 1.0, %v6315_v3  ;;  %5311 = vmatprep.mubr.msk.bf16.mxu0 %vm2113_vm1, %v9674_v52  ;;  %5327 = vmatprep.mubr.msk.bf16.mxu1 %vm2113_vm1, %v9674_v52  ;;  %v8685_v17 = vpop.f32.mrb[128].mxu1 }
 0x2ca   : > { %v6319_v35 = vpop.eup %6318  ;;  %6338 = vrcp.f32 %v4407_v49  ;;  %v4408_v19 = vadd.f32 1.0, %v6317_v21  ;;  %v3755_v49 = vsub.f32 0.0, %v5479_v41  ;;  %v8689_v52 = vpop.f32.mrb[129].mxu1 }
 0x2cb   : > { %v6321_v11 = vpop.eup %6320  ;;  %6340 = vrcp.f32 %v4406_v42  ;;  %v4412_v16 = vadd.f32 1.0, %v6319_v35  ;;  %v3757_v35 = vsub.f32 0.0, %v5543_v55  ;;  %v5545_v55 = vadd.f32 %v8436_v4, %v8212_v50 }
 0x2cc   : > { %v6323_v29 = vpop.eup %6322  ;;  %6342 = vrcp.f32 %v4408_v19  ;;  %v4414_v3 = vadd.f32 1.0, %v6321_v11  ;;  %v4094_v11 = vmul.f32 1.442695, %v3756_v34  ;;  %v5482_v34 = vadd.f32 %v8447_v46, %v8198_v23 }
 0x2cd   : > { %v6325_v21 = vpop.eup %6324  ;;  %6344 = vrcp.f32 %v4412_v16  ;;  %v4413_v2 = vadd.f32 1.0, %v6323_v29  ;;  %v5481_v16 = vadd.f32 %v8433_v28, %v8208_v51  ;;  %v8693_v29 = vpop.f32.mrb[130].mxu1  ;;  %v5483_v46 = vadd.f32 %v8453_v60, %v8208_v51 }
 0x2ce   : > { %v6327_v42 = vpop.eup %6326  ;;  %6346 = vrcp.f32 %v4414_v3  ;;  %v4415_v45 = vadd.f32 1.0, %v6325_v21  ;;  %v4092_v3 = vmul.f32 1.442695, %v3755_v49  ;;  %v8697_v21 = vpop.f32.mrb[131].mxu1  ;;  %v5546_v49 = vadd.f32 %v8449_v12, %v8202_v53 }
 0x2cf   : > { %v6329_v19 = vpop.eup %6328  ;;  %6348 = vrcp.f32 %v4413_v2  ;;  %v4419_v41 = vadd.f32 1.0, %v6327_v42  ;;  %v3761_v2 = vsub.f32 0.0, %v5480_v37  ;;  %v3762_v37 = vsub.f32 0.0, %v5481_v16 }
 0x2d0   : > { %v6331_v61 = vpop.eup %6330  ;;  %6350 = vrcp.f32 %v4415_v45  ;;  %v4421_v13 = vadd.f32 1.0, %v6329_v19  ;;  %v9675_v45 = vld [vmem:[#allocation20_spill] sm:$0xff]  ;;  %v3764_v25 = vsub.f32 0.0, %v5545_v55  ;;  %v8717_v33 = vpop.f32.mrb[132].mxu1  ;;  %v3770_v55 = vsub.f32 0.0, %v5546_v49 }
 0x2d1   : > { %v6333_v58 = vpop.eup %6332  ;;  %6352 = vrcp.f32 %v4419_v41  ;;  %v4420_v20 = vadd.f32 1.0, %v6331_v61  ;;  %3270 = vmatmul.mubr.bf16.gmra.mrb[172].mxu0 %v9675_v45  ;;  %3602 = vmatmul.mubr.bf16.gmra.mrb[236].mxu1 %v9675_v45  ;;  %v9676_v41 = vld [vmem:[#allocation25_spill] sm:$0xff]  ;;  %v9677_v61 = vld [vmem:[#allocation3_spill] sm:$0xff]  ;;  %v4104_v60 = vmul.f32 1.442695, %v3761_v2 }
 0x2d2   : > { %v6335_v28 = vpop.eup %6334  ;;  %6354 = vrcp.f32 %v4421_v13  ;;  %v4422_v42 = vadd.f32 1.0, %v6333_v58  ;;  %5312 = vmatprep.mubr.msk.bf16.mxu0 %vm2113_vm1, %v9676_v41  ;;  %5328 = vmatprep.mubr.msk.bf16.mxu1 %vm2113_vm1, %v9676_v41  ;;  %v4096_v13 = vmul.f32 1.442695, %v3757_v35  ;;  %v3768_v58 = vsub.f32 0.0, %v5482_v34 }
 0x2d3   : > { %v6337_v4 = vpop.eup %6336  ;;  %6356 = vrcp.f32 %v4420_v20  ;;  %v4426_v19 = vadd.f32 1.0, %v6335_v28  ;;  %v5547_v20 = vadd.f32 %v9677_v61, %v8212_v50  ;;  %v9678_v28 = vld [vmem:[#allocation5_spill] sm:$0xff]  ;;  %v4108_v35 = vmul.f32 1.442695, %v3763_v24  ;;  %v8722_v61 = vpop.f32.mrb[133].mxu1 }
 0x2d4   : > { %v6339_v12 = vpop.eup %6338  ;;  %4853 = vst [vmem:[%s8268_s9 + $0x2d8] sm:$0xff] %v6337_v4  ;;  %6358 = vrcp.f32 %v4422_v42  ;;  %v5484_v45 = vadd.f32 %v9678_v28, %v8198_v23  ;;  %v9679_v42 = vld [vmem:[#allocation4_spill] sm:$0xff]  ;;  %v4106_v2 = vmul.f32 1.442695, %v3762_v37  ;;  %v3769_v34 = vsub.f32 0.0, %v5483_v46 }
 0x2d5   : > { %v6341_v16 = vpop.eup %6340  ;;  %4855 = vst [vmem:[%s8268_s9 + $0x2e8] sm:$0xff] %v6339_v12  ;;  %6360 = vrcp.f32 %v4426_v19  ;;  %v5548_v4 = vadd.f32 %v9679_v42, %v8202_v53  ;;  %v8725_v12 = vpop.f32.mrb[134].mxu1  ;;  %v3771_v24 = vsub.f32 0.0, %v5547_v20  ;;  %v4118_v42 = vmul.f32 1.442695, %v3768_v58 }
 0x2d6   : > { %v6343_v41 = vpop.eup %6342  ;;  %4854 = vst [vmem:[%s8268_s9 + $0x2e0] sm:$0xff] %v6341_v16  ;;  %6362 = vpow2.f32 %v4094_v11  ;;  %v4110_v11 = vmul.f32 1.442695, %v3764_v25  ;;  %v8728_v49 = vpop.f32.mrb[135].mxu1  ;;  %v3775_v6 = vsub.f32 0.0, %v5484_v45  ;;  %v5485_v20 = vadd.f32 %v8465_v48, %v8208_v51 }
 0x2d7   : > { %v6345_v19 = vpop.eup %6344  ;;  %4856 = vst [vmem:[%s8268_s9 + $0x2f0] sm:$0xff] %v6343_v41  ;;  %6364 = vpow2.f32 %v4092_v3  ;;  %v4122_v37 = vmul.f32 1.442695, %v3770_v55  ;;  %v3777_v46 = vsub.f32 0.0, %v5548_v4  ;;  %v9680_v41 = vld [vmem:[#allocation24_spill] sm:$0xff] }
 0x2d8   : > { %v6347_v28 = vpop.eup %6346  ;;  %4860 = vst [vmem:[%s8268_s9 + $0x310] sm:$0xff] %v6345_v19  ;;  %6366 = vpow2.f32 %v4096_v13  ;;  %v4120_v25 = vmul.f32 1.442695, %v3769_v34  ;;  %v4124_v45 = vmul.f32 1.442695, %v3771_v24  ;;  %v8745_v48 = vpop.f32.mrb[136].mxu1 }
 0x2d9   : > { %v6349_v16 = vpop.eup %6348  ;;  %4862 = vst [vmem:[%s8268_s9 + $0x320] sm:$0xff] %v6347_v28  ;;  %6368 = vpow2.f32 %v4104_v60  ;;  %3280 = vmatmul.mubr.bf16.gmra.mrb[176].mxu0 %v9680_v41  ;;  %3610 = vmatmul.mubr.bf16.gmra.mrb[240].mxu1 %v9680_v41  ;;  %v9681_v60 = vld [vmem:[#allocation29_spill] sm:$0xff]  ;;  %v4132_v4 = vmul.f32 1.442695, %v3775_v6  ;;  %v5363_v34 = vpop.f32.mrb[137].mxu1 }
 0x2da   : > { %v6351_v3 = vpop.eup %6350  ;;  %4861 = vst [vmem:[%s8268_s9 + $0x318] sm:$0xff] %v6349_v16  ;;  %6370 = vpow2.f32 %v4108_v35  ;;  %5313 = vmatprep.mubr.msk.bf16.mxu0 %vm2113_vm1, %v9681_v60  ;;  %5329 = vmatprep.mubr.msk.bf16.mxu1 %vm2113_vm1, %v9681_v60  ;;  %v5549_v35 = vadd.f32 %v8467_v5, %v8212_v50  ;;  %v5365_v24 = vpop.f32.mrb[138].mxu1 }
 0x2db   : > { %v6353_v13 = vpop.eup %6352  ;;  %4863 = vst [vmem:[%s8268_s9 + $0x328] sm:$0xff] %v6351_v3  ;;  %6372 = vpow2.f32 %v4106_v2  ;;  %v4136_v2 = vmul.f32 1.442695, %v3777_v46  ;;  %v5366_v6 = vpop.f32.mrb[139].mxu1  ;;  %v9682_v46 = vld [vmem:[#allocation7_spill] sm:$0xff] }
 0x2dc   : > { %v6355_v58 = vpop.eup %6354  ;;  %4867 = vst [vmem:[%s8268_s9 + $0x348] sm:$0xff] %v6353_v13  ;;  %6374 = vpow2.f32 %v4110_v11  ;;  %v3776_v11 = vsub.f32 0.0, %v5485_v20  ;;  %v3778_v5 = vsub.f32 0.0, %v5549_v35  ;;  %v8754_v60 = vadd.f32 %v9682_v46, %v8202_v53 }
 0x2dd   : > { %v6357_v55 = vpop.eup %6356  ;;  %4869 = vst [vmem:[%s8268_s9 + $0x358] sm:$0xff] %v6355_v58  ;;  %6376 = vpow2.f32 %v4118_v42  ;;  %v5486_v42 = vadd.f32 %v8483_v62, %v8198_v23  ;;  %v9684_v62 = vld [vmem:[#allocation33_spill] sm:$0xff] }
 0x2de   : > { %v6359_v19 = vpop.eup %6358  ;;  %4868 = vst [vmem:[%s8268_s9 + $0x350] sm:$0xff] %v6357_v55  ;;  %6378 = vpow2.f32 %v4122_v37 }
 0x2df   : > { %v6361_v28 = vpop.eup %6360  ;;  %4870 = vst [vmem:[%s8268_s9 + $0x360] sm:$0xff] %v6359_v19  ;;  %6380 = vpow2.f32 %v4120_v25  ;;  %v9683_v25 = vld [vmem:[#allocation28_spill] sm:$0xff]  ;;  %v3782_v19 = vsub.f32 0.0, %v5486_v42 }
 0x2e0   : > { %v6363_v16 = vpop.eup %6362  ;;  %4874 = vst [vmem:[%s8268_s9 + $0x380] sm:$0xff] %v6361_v28  ;;  %6382 = vpow2.f32 %v4124_v45  ;;  %v8758_v45 = vmul.f32 1.442695, %v3776_v11  ;;  %v8772_v11 = vadd.f32 %v8689_v52, %v8685_v17  ;;  %v8785_v17 = vadd.f32 %v8722_v61, %v8717_v33 }
 0x2e1   : > { %v6365_v3 = vpop.eup %6364  ;;  %v4428_v41 = vadd.f32 1.0, %v6363_v16  ;;  %6384 = vpow2.f32 %v4132_v4  ;;  %3290 = vmatmul.mubr.bf16.gmra.mrb[180].mxu0 %v9683_v25  ;;  %3618 = vmatmul.mubr.bf16.gmra.mrb[244].mxu1 %v9683_v25  ;;  %v8764_v4 = vmul.f32 1.442695, %v3778_v5  ;;  %v9685_v16 = vld [vmem:[#allocation6_spill] sm:$0xff]  ;;  %v8777_v5 = vadd.f32 %v8697_v21, %v8693_v29 }
 0x2e2   : > { %v6367_v13 = vpop.eup %6366  ;;  %v4427_v37 = vadd.f32 1.0, %v6365_v3  ;;  %6386 = vpow2.f32 %v4136_v2  ;;  %5314 = vmatprep.mubr.msk.bf16.mxu0 %vm2113_vm1, %v9684_v62  ;;  %5330 = vmatprep.mubr.msk.bf16.mxu1 %vm2113_vm1, %v9684_v62  ;;  %v8768_v3 = vadd.f32 %v9685_v16, %v8208_v51  ;;  %v8789_v29 = vadd.f32 %v8495_v0, %v8198_v23 }
 0x2e3   : > { %v6369_v20 = vpop.eup %6368  ;;  %6388 = vrcp.f32 %v4428_v41  ;;  %v4429_v58 = vadd.f32 1.0, %v6367_v13  ;;  %v5368_v41 = vpop.f32.mrb[140].mxu1  ;;  %v8793_v21 = vadd.f32 %v8728_v49, %v8725_v12  ;;  %v8796_v16 = vadd.f32 %v5363_v34, %v8745_v48  ;;  %v9688_v48 = vld [vmem:[#allocation8_spill] sm:$0xff] }
 0x2e4   : > { %v6371_v35 = vpop.eup %6370  ;;  %6390 = vrcp.f32 %v4427_v37  ;;  %v4433_v55 = vadd.f32 1.0, %v6369_v20  ;;  %v3784_v37 = vsub.f32 0.0, %v8754_v60  ;;  %v5369_v42 = vpop.f32.mrb[141].mxu1  ;;  %v8798_v33 = vadd.f32 %v5366_v6, %v5365_v24  ;;  %v9689_v24 = vld [vmem:[#allocation35_spill] sm:$0xff] }
 0x2e5   : > { %v6373_v2 = vpop.eup %6372  ;;  %6392 = vrcp.f32 %v4429_v58  ;;  %v4435_v28 = vadd.f32 1.0, %v6371_v35  ;;  %v9686_v58 = vld [vmem:[#allocation9_spill] sm:$0xff]  ;;  %v5371_v52 = vpop.f32.mrb[142].mxu1  ;;  %v5552_v34 = vadd.f32 %v9688_v48, %v8202_v53 }
 0x2e6   : > { %v6375_v13 = vpop.eup %6374  ;;  %6394 = vrcp.f32 %v4433_v55  ;;  %v4434_v46 = vadd.f32 1.0, %v6373_v2  ;;  %v8781_v62 = vadd.f32 %v9686_v58, %v8212_v50  ;;  %v5372_v55 = vpop.f32.mrb[143].mxu1  ;;  %v5489_v58 = vadd.f32 %v8502_v59, %v8208_v51 }
 0x2e7   : > { %v6377_v25 = vpop.eup %6376  ;;  %6396 = vrcp.f32 %v4435_v28  ;;  %v4436_v20 = vadd.f32 1.0, %v6375_v13  ;;  %v8802_v0 = vadd.f32 %v5372_v55, %v5371_v52 }
 0x2e8   : > { %v6379_v35 = vpop.eup %6378  ;;  %6398 = vrcp.f32 %v4434_v46  ;;  %v4440_v60 = vadd.f32 1.0, %v6377_v25  ;;  %v8800_v46 = vadd.f32 %v5369_v42, %v5368_v41  ;;  %v9687_v25 = vld [vmem:[#allocation32_spill] sm:$0xff]  ;;  %v3783_v42 = vsub.f32 0.0, %v8768_v3  ;;  %v5374_v55 = vpop.f32.mrb[144].mxu1 }
 0x2e9   : > { %v6381_v2 = vpop.eup %6380  ;;  %6400 = vrcp.f32 %v4436_v20  ;;  %v4442_v28 = vadd.f32 1.0, %v6379_v35  ;;  %3300 = vmatmul.mubr.bf16.gmra.mrb[184].mxu0 %v9687_v25  ;;  %3626 = vmatmul.mubr.bf16.gmra.mrb[248].mxu1 %v9687_v25  ;;  %v4146_v20 = vmul.f32 1.442695, %v3782_v19  ;;  %v3785_v35 = vsub.f32 0.0, %v8781_v62  ;;  %v5375_v59 = vpop.f32.mrb[145].mxu1 }
 0x2ea   : > { %v6383_v61 = vpop.eup %6382  ;;  %6402 = vrcp.f32 %v4440_v60  ;;  %v4441_v13 = vadd.f32 1.0, %v6381_v2  ;;  %5315 = vmatprep.mubr.msk.bf16.mxu0 %vm2113_vm1, %v9689_v24  ;;  %5331 = vmatprep.mubr.msk.bf16.mxu1 %vm2113_vm1, %v9689_v24  ;;  %v5553_v60 = vadd.f32 %v8504_v54, %v8212_v50  ;;  %v3789_v3 = vsub.f32 0.0, %v8789_v29 }
 0x2eb   : > { %v6385_v12 = vpop.eup %6384  ;;  %6404 = vrcp.f32 %v4442_v28  ;;  %v4443_v49 = vadd.f32 1.0, %v6383_v61  ;;  %v4150_v28 = vmul.f32 1.442695, %v3784_v37  ;;  %v5490_v61 = vadd.f32 %v8521_v22, %v8198_v23 }
 0x2ec   : > { %v6387_v6 = vpop.eup %6386  ;;  %6406 = vrcp.f32 %v4441_v13  ;;  %v4447_v41 = vadd.f32 1.0, %v6385_v12  ;;  %v3791_v62 = vsub.f32 0.0, %v5552_v34  ;;  %v5554_v54 = vadd.f32 %v8523_v1, %v8202_v53  ;;  %v5377_v12 = vpop.f32.mrb[146].mxu1 }
 0x2ed   : > { %v6389_v19 = vpop.eup %6388  ;;  %6408 = vrcp.f32 %v4443_v49  ;;  %v4449_v52 = vadd.f32 1.0, %v6387_v6  ;;  %v8825_v25 = vadd.f32 %v5375_v59, %v5374_v55  ;;  %v4148_v37 = vmul.f32 1.442695, %v3783_v42  ;;  %v5378_v48 = vpop.f32.mrb[147].mxu1 }
 0x2ee   : > { %v6391_v2 = vpop.eup %6390  ;;  %4876 = vst [vmem:[%s8268_s9 + $0x390] sm:$0xff] %v6389_v19  ;;  %6410 = vrcp.f32 %v4447_v41  ;;  %v3790_v29 = vsub.f32 0.0, %v5489_v58  ;;  %v5491_v22 = vadd.f32 %v8526_v56, %v8208_v51  ;;  %v4152_v1 = vmul.f32 1.442695, %v3785_v35  ;;  %v9690_v58 = vld [vmem:[#allocation34_spill] sm:$0xff] }
 0x2ef   : > { %v6393_v13 = vpop.eup %6392  ;;  %4875 = vst [vmem:[%s8268_s9 + $0x388] sm:$0xff] %v6391_v2  ;;  %6412 = vrcp.f32 %v4449_v52  ;;  %v3792_v34 = vsub.f32 0.0, %v5553_v60  ;;  %v8833_v6 = vadd.f32 %v5378_v48, %v5377_v12  ;;  %v3796_v42 = vsub.f32 0.0, %v5490_v61 }
 0x2f0   : > { %v6395_v49 = vpop.eup %6394  ;;  %4877 = vst [vmem:[%s8268_s9 + $0x398] sm:$0xff] %v6393_v13  ;;  %6414 = vpow2.f32 %v8758_v45  ;;  %v4160_v45 = vmul.f32 1.442695, %v3789_v3  ;;  %v3798_v19 = vsub.f32 0.0, %v5554_v54  ;;  %v4162_v35 = vmul.f32 1.442695, %v3790_v29 }
 0x2f1   : > { %v6397_v24 = vpop.eup %6396  ;;  %4881 = vst [vmem:[%s8268_s9 + $0x3b8] sm:$0xff] %v6395_v49  ;;  %6416 = vpow2.f32 %v8764_v4  ;;  %3310 = vmatmul.mubr.bf16.gmra.mrb[188].mxu0 %v9690_v58  ;;  %3634 = vmatmul.mubr.bf16.gmra.mrb[252].mxu1 %v9690_v58  ;;  %v4164_v4 = vmul.f32 1.442695, %v3791_v62  ;;  %v3797_v60 = vsub.f32 0.0, %v5491_v22  ;;  %v4166_v55 = vmul.f32 1.442695, %v3792_v34 }
 0x2f2   : > { %v6399_v41 = vpop.eup %6398  ;;  %4883 = vst [vmem:[%s8268_s9 + $0x3c8] sm:$0xff] %v6397_v24  ;;  %6418 = vpow2.f32 %v4146_v20  ;;  %v5380_v2 = vpop.f32.mrb[148].mxu1  ;;  %v4174_v61 = vmul.f32 1.442695, %v3796_v42  ;;  %v4178_v13 = vmul.f32 1.442695, %v3798_v19  ;;  %v5555_v24 = vadd.f32 %v8528_v47, %v8212_v50 }
 0x2f3   : > { %v6401_v56 = vpop.eup %6400  ;;  %4882 = vst [vmem:[%s8268_s9 + $0x3c0] sm:$0xff] %v6399_v41  ;;  %6420 = vpow2.f32 %v4150_v28  ;;  %v5381_v28 = vpop.f32.mrb[149].mxu1  ;;  %v4176_v49 = vmul.f32 1.442695, %v3797_v60 }
 0x2f4   : > { %v6403_v52 = vpop.eup %6402  ;;  %4884 = vst [vmem:[%s8268_s9 + $0x3d0] sm:$0xff] %v6401_v56  ;;  %6422 = vpow2.f32 %v4148_v37  ;;  %v8843_v62 = vadd.f32 %v5381_v28, %v5380_v2  ;;  %v5383_v54 = vpop.f32.mrb[150].mxu1  ;;  %v3799_v47 = vsub.f32 0.0, %v5555_v24 }
 0x2f5   : > { %v6405_v20 = vpop.eup %6404  ;;  %4888 = vst [vmem:[%s8268_s9 + $0x3f0] sm:$0xff] %v6403_v52  ;;  %6424 = vpow2.f32 %v4152_v1  ;;  %v5384_v37 = vpop.f32.mrb[151].mxu1  ;;  %v5492_v1 = vadd.f32 %v8531_v31, %v8198_v23 }
 0x2f6   : > { %v6407_v3 = vpop.eup %6406  ;;  %4890 = vst [vmem:[%s8268_s9 + $0x400] sm:$0xff] %v6405_v20  ;;  %6426 = vpow2.f32 %v4160_v45  ;;  %v8847_v22 = vadd.f32 %v5384_v37, %v5383_v54  ;;  %v5556_v45 = vadd.f32 %v8533_v27, %v8202_v53  ;;  %v4180_v24 = vmul.f32 1.442695, %v3799_v47 }
 0x2f7   : > { %v6409_v59 = vpop.eup %6408  ;;  %4889 = vst [vmem:[%s8268_s9 + $0x3f8] sm:$0xff] %v6407_v3  ;;  %6428 = vpow2.f32 %v4164_v4  ;;  %v3803_v60 = vsub.f32 0.0, %v5492_v1  ;;  %v5494_v1 = vadd.f32 %v8554_v40, %v8198_v23  ;;  %v5495_v40 = vadd.f32 %v8558_v44, %v8208_v51 }
 0x2f8   : > { %v6411_v12 = vpop.eup %6410  ;;  %4891 = vst [vmem:[%s8268_s9 + $0x408] sm:$0xff] %v6409_v59  ;;  %6430 = vpow2.f32 %v4162_v35  ;;  %v5386_v19 = vpop.f32.mrb[152].mxu1  ;;  %v3805_v2 = vsub.f32 0.0, %v5556_v45  ;;  %v5493_v59 = vadd.f32 %v8536_v10, %v8208_v51 }
 0x2f9   : > { %v6413_v29 = vpop.eup %6412  ;;  %4895 = vst [vmem:[%s8268_s9 + $0x428] sm:$0xff] %v6411_v12  ;;  %6432 = vpow2.f32 %v4166_v55  ;;  %v5387_v20 = vpop.f32.mrb[153].mxu1  ;;  %v4188_v10 = vmul.f32 1.442695, %v3803_v60 }
 0x2fa   : > { %v6415_v48 = vpop.eup %6414  ;;  %4897 = vst [vmem:[%s8268_s9 + $0x438] sm:$0xff] %v6413_v29  ;;  %6434 = vpow2.f32 %v4174_v61  ;;  %v8856_v3 = vadd.f32 %v5387_v20, %v5386_v19  ;;  %v5389_v27 = vpop.f32.mrb[154].mxu1  ;;  %v4192_v45 = vmul.f32 1.442695, %v3805_v2  ;;  %v3810_v20 = vsub.f32 0.0, %v5494_v1 }
 0x2fb   : > { %v6417_v34 = vpop.eup %6416  ;;  %v4448_v41 = vadd.f32 1.0, %v6415_v48  ;;  %6436 = vpow2.f32 %v4178_v13  ;;  %v5390_v13 = vpop.f32.mrb[155].mxu1 }
 0x2fc   : > { %v6419_v42 = vpop.eup %6418  ;;  %v4450_v58 = vadd.f32 1.0, %v6417_v34  ;;  %6438 = vpow2.f32 %v4176_v49  ;;  %v5557_v49 = vadd.f32 %v8538_v8, %v8212_v50  ;;  %v8862_v37 = vadd.f32 %v5390_v13, %v5389_v27 }
 0x2fd   : > { %v6421_v56 = vpop.eup %6420  ;;  %6440 = vrcp.f32 %v4448_v41  ;;  %v4454_v4 = vadd.f32 1.0, %v6419_v42  ;;  %v5558_v8 = vadd.f32 %v8556_v57, %v8202_v53  ;;  %v5496_v27 = vadd.f32 %v8562_v63, %v8198_v23 }
 0x2fe   : > { %v6423_v52 = vpop.eup %6422  ;;  %6442 = vrcp.f32 %v4450_v58  ;;  %v4456_v35 = vadd.f32 1.0, %v6421_v56  ;;  %v3804_v56 = vsub.f32 0.0, %v5493_v59  ;;  %v5497_v63 = vadd.f32 %v8566_v38, %v8208_v51 }
 0x2ff   : > { %v6425_v31 = vpop.eup %6424  ;;  %6444 = vrcp.f32 %v4454_v4  ;;  %v4455_v55 = vadd.f32 1.0, %v6423_v52  ;;  %v3806_v52 = vsub.f32 0.0, %v5557_v49  ;;  %v3812_v13 = vsub.f32 0.0, %v5558_v8 }
 0x300   : > { %v6427_v61 = vpop.eup %6426  ;;  %6446 = vrcp.f32 %v4456_v35  ;;  %v4457_v28 = vadd.f32 1.0, %v6425_v31  ;;  %v5392_v35 = vpop.f32.mrb[156].mxu1  ;;  %v5559_v31 = vadd.f32 %v8560_v32, %v8212_v50  ;;  %v4190_v59 = vmul.f32 1.442695, %v3804_v56 }
 0x301   : > { %v6429_v54 = vpop.eup %6428  ;;  %6448 = vrcp.f32 %v4455_v55  ;;  %v4461_v12 = vadd.f32 1.0, %v6427_v61  ;;  %v5393_v55 = vpop.f32.mrb[157].mxu1  ;;  %v5560_v32 = vadd.f32 %v8564_v43, %v8202_v53  ;;  %v3811_v49 = vsub.f32 0.0, %v5495_v40 }
 0x302   : > { %v6431_v29 = vpop.eup %6430  ;;  %6450 = vrcp.f32 %v4457_v28  ;;  %v4463_v48 = vadd.f32 1.0, %v6429_v54  ;;  %v8874_v61 = vadd.f32 %v5393_v55, %v5392_v35  ;;  %v5395_v44 = vpop.f32.mrb[158].mxu1  ;;  %v4194_v1 = vmul.f32 1.442695, %v3806_v52 }
 0x303   : > { %v6433_v34 = vpop.eup %6432  ;;  %6452 = vrcp.f32 %v4461_v12  ;;  %v4462_v41 = vadd.f32 1.0, %v6431_v29  ;;  %v5396_v54 = vpop.f32.mrb[159].mxu1  ;;  %v3817_v56 = vsub.f32 0.0, %v5496_v27  ;;  %v4206_v38 = vmul.f32 1.442695, %v3812_v13 }
 0x304   : > { %v6435_v42 = vpop.eup %6434  ;;  %6454 = vrcp.f32 %v4463_v48  ;;  %v4464_v58 = vadd.f32 1.0, %v6433_v34  ;;  %v8882_v29 = vadd.f32 %v5396_v54, %v5395_v44  ;;  %v3813_v34 = vsub.f32 0.0, %v5559_v31 }
 0x305   : > { %v6437_v4 = vpop.eup %6436  ;;  %6456 = vrcp.f32 %v4462_v41  ;;  %v4468_v19 = vadd.f32 1.0, %v6435_v42  ;;  %v9691_v41 = vld [vmem:[#allocation11_spill] sm:$0xff]  ;;  %v3818_v52 = vsub.f32 0.0, %v5497_v63  ;;  %v9692_v63 = vld [vmem:[#allocation10_spill] sm:$0xff] }
 0x306   : > { %v6439_v47 = vpop.eup %6438  ;;  %6458 = vrcp.f32 %v4464_v58  ;;  %v4470_v60 = vadd.f32 1.0, %v6437_v4  ;;  %v5561_v43 = vadd.f32 %v9691_v41, %v8212_v50  ;;  %v4202_v58 = vmul.f32 1.442695, %v3810_v20 }
 0x307   : > { %v6441_v2 = vpop.eup %6440  ;;  %6460 = vrcp.f32 %v4468_v19  ;;  %v4469_v57 = vadd.f32 1.0, %v6439_v47  ;;  %v3819_v4 = vsub.f32 0.0, %v5560_v32 }
 0x308   : > { %v6443_v28 = vpop.eup %6442  ;;  %4896 = vst [vmem:[%s8268_s9 + $0x430] sm:$0xff] %v6441_v2  ;;  %6462 = vrcp.f32 %v4470_v60  ;;  %v5398_v40 = vpop.f32.mrb[160].mxu1  ;;  %v3820_v47 = vsub.f32 0.0, %v5561_v43 }
 0x309   : > { %v6445_v12 = vpop.eup %6444  ;;  %4898 = vst [vmem:[%s8268_s9 + $0x440] sm:$0xff] %v6443_v28  ;;  %6464 = vrcp.f32 %v4469_v57  ;;  %v5399_v60 = vpop.f32.mrb[161].mxu1  ;;  %v4220_v57 = vmul.f32 1.442695, %v3819_v4  ;;  %v4218_v28 = vmul.f32 1.442695, %v3818_v52 }
 0x30a   : > { %v6447_v48 = vpop.eup %6446  ;;  %4902 = vst [vmem:[%s8268_s9 + $0x460] sm:$0xff] %v6445_v12  ;;  %6466 = vpow2.f32 %v4180_v24  ;;  %v4204_v24 = vmul.f32 1.442695, %v3811_v49  ;;  %v8892_v31 = vadd.f32 %v5399_v60, %v5398_v40  ;;  %v5401_v55 = vpop.f32.mrb[162].mxu1  ;;  %v4222_v32 = vmul.f32 1.442695, %v3820_v47 }
 0x30b   : > { %v6449_v42 = vpop.eup %6448  ;;  %4904 = vst [vmem:[%s8268_s9 + $0x470] sm:$0xff] %v6447_v48  ;;  %6468 = vpow2.f32 %v4188_v10  ;;  %v4208_v10 = vmul.f32 1.442695, %v3813_v34  ;;  %v5402_v27 = vpop.f32.mrb[163].mxu1  ;;  %v5498_v12 = vadd.f32 %v8584_v18, %v8198_v23  ;;  %v5562_v48 = vadd.f32 %v9692_v63, %v8202_v53  ;;  %v9693_v40 = vld [vmem:[#allocation15_spill] sm:$0xff]  ;;  %v9696_v63 = vld [vmem:[#allocation18_spill] sm:$0xff] }
 0x30c   : > { %v6451_v8 = vpop.eup %6450  ;;  %4903 = vst [vmem:[%s8268_s9 + $0x468] sm:$0xff] %v6449_v42  ;;  %6470 = vpow2.f32 %v4192_v45  ;;  %v4216_v45 = vmul.f32 1.442695, %v3817_v56 }
 0x30d   : > { %v6453_v19 = vpop.eup %6452  ;;  %4905 = vst [vmem:[%s8268_s9 + $0x478] sm:$0xff] %v6451_v8  ;;  %6472 = vpow2.f32 %v4190_v59  ;;  %v8896_v59 = vadd.f32 %v5402_v27, %v5401_v55  ;;  %v3826_v52 = vsub.f32 0.0, %v5562_v48  ;;  %v9695_v27 = vld [vmem:[#allocation19_spill] sm:$0xff]  ;;  %v5564_v48 = vadd.f32 %v9696_v63, %v8202_v53 }
 0x30e   : > { %v6455_v35 = vpop.eup %6454  ;;  %4909 = vst [vmem:[%s8268_s9 + $0x498] sm:$0xff] %v6453_v19  ;;  %6474 = vpow2.f32 %v4194_v1 }
 0x30f   : > { %v6457_v20 = vpop.eup %6456  ;;  %4911 = vst [vmem:[%s8268_s9 + $0x4a8] sm:$0xff] %v6455_v35  ;;  %6476 = vpow2.f32 %v4202_v58  ;;  %v5499_v35 = vadd.f32 %v9693_v40, %v8208_v51  ;;  %v5565_v40 = vadd.f32 %v8604_v15, %v8212_v50 }
 0x310   : > { %v6459_v2 = vpop.eup %6458  ;;  %4910 = vst [vmem:[%s8268_s9 + $0x4a0] sm:$0xff] %v6457_v20  ;;  %6478 = vpow2.f32 %v4206_v38  ;;  %v5404_v41 = vpop.f32.mrb[164].mxu1  ;;  %v3824_v38 = vsub.f32 0.0, %v5498_v12  ;;  %v9694_v20 = vld [vmem:[#allocation14_spill] sm:$0xff] }
 0x311   : > { %v6461_v44 = vpop.eup %6460  ;;  %4912 = vst [vmem:[%s8268_s9 + $0x4b0] sm:$0xff] %v6459_v2  ;;  %6480 = vpow2.f32 %v4204_v24  ;;  %v5405_v58 = vpop.f32.mrb[165].mxu1 }
 0x312   : > { %v6463_v13 = vpop.eup %6462  ;;  %4916 = vst [vmem:[%s8268_s9 + $0x4d0] sm:$0xff] %v6461_v44  ;;  %6482 = vpow2.f32 %v4208_v10  ;;  %v8905_v4 = vadd.f32 %v5405_v58, %v5404_v41  ;;  %v5407_v18 = vpop.f32.mrb[166].mxu1  ;;  %v5500_v44 = vadd.f32 %v9695_v27, %v8198_v23  ;;  %v4234_v41 = vmul.f32 1.442695, %v3826_v52 }
 0x313   : > { %v6465_v54 = vpop.eup %6464  ;;  %4918 = vst [vmem:[%s8268_s9 + $0x4e0] sm:$0xff] %v6463_v13  ;;  %6484 = vpow2.f32 %v4216_v45  ;;  %v5408_v10 = vpop.f32.mrb[167].mxu1  ;;  %v5563_v45 = vadd.f32 %v9694_v20, %v8212_v50  ;;  %v5502_v20 = vadd.f32 %v8624_v26, %v8198_v23 }
 0x314   : > { %v6467_v49 = vpop.eup %6466  ;;  %4917 = vst [vmem:[%s8268_s9 + $0x4d8] sm:$0xff] %v6465_v54  ;;  %6486 = vpow2.f32 %v4220_v57  ;;  %v8911_v55 = vadd.f32 %v5408_v10, %v5407_v18 }
 0x315   : > { %v6469_v1 = vpop.eup %6468  ;;  %v4471_v34 = vadd.f32 1.0, %v6467_v49  ;;  %6488 = vpow2.f32 %v4218_v28  ;;  %v3825_v49 = vsub.f32 0.0, %v5499_v35 }
 0x316   : > { %v6471_v43 = vpop.eup %6470  ;;  %v4475_v42 = vadd.f32 1.0, %v6469_v1  ;;  %6490 = vpow2.f32 %v4222_v32  ;;  %v4230_v32 = vmul.f32 1.442695, %v3824_v38  ;;  %v5501_v38 = vadd.f32 %v8602_v7, %v8208_v51 }
 0x317   : > { %v6473_v56 = vpop.eup %6472  ;;  %6492 = vrcp.f32 %v4471_v34  ;;  %v4477_v8 = vadd.f32 1.0, %v6471_v43  ;;  %v3827_v43 = vsub.f32 0.0, %v5563_v45 }
 0x318   : > { %v6475_v19 = vpop.eup %6474  ;;  %6494 = vrcp.f32 %v4475_v42  ;;  %v4476_v24 = vadd.f32 1.0, %v6473_v56  ;;  %v5410_v42 = vpop.f32.mrb[168].mxu1 }
 0x319   : > { %v6477_v47 = vpop.eup %6476  ;;  %6496 = vrcp.f32 %v4477_v8  ;;  %v4478_v60 = vadd.f32 1.0, %v6475_v19  ;;  %v3831_v8 = vsub.f32 0.0, %v5500_v44  ;;  %v5411_v18 = vpop.f32.mrb[169].mxu1  ;;  %v4232_v44 = vmul.f32 1.442695, %v3825_v49 }
 0x31a   : > { %v6479_v2 = vpop.eup %6478  ;;  %6498 = vrcp.f32 %v4476_v24  ;;  %v4482_v57 = vadd.f32 1.0, %v6477_v47  ;;  %v8921_v35 = vadd.f32 %v5411_v18, %v5410_v42  ;;  %v5413_v52 = vpop.f32.mrb[170].mxu1  ;;  %v3838_v49 = vsub.f32 0.0, %v5502_v20 }
 0x31b   : > { %v6481_v28 = vpop.eup %6480  ;;  %6500 = vrcp.f32 %v4478_v60  ;;  %v4484_v13 = vadd.f32 1.0, %v6479_v2  ;;  %v3833_v60 = vsub.f32 0.0, %v5564_v48  ;;  %v5414_v7 = vpop.f32.mrb[171].mxu1  ;;  %v4244_v48 = vmul.f32 1.442695, %v3831_v8 }
 0x31c   : > { %v6483_v54 = vpop.eup %6482  ;;  %6502 = vrcp.f32 %v4482_v57  ;;  %v4483_v12 = vadd.f32 1.0, %v6481_v28  ;;  %v5566_v57 = vadd.f32 %v8626_v36, %v8202_v53  ;;  %v8927_v15 = vadd.f32 %v5414_v7, %v5413_v52 }
 0x31d   : > { %v6485_v1 = vpop.eup %6484  ;;  %6504 = vrcp.f32 %v4484_v13  ;;  %v4485_v34 = vadd.f32 1.0, %v6483_v54  ;;  %v3832_v28 = vsub.f32 0.0, %v5501_v38  ;;  %v5503_v13 = vadd.f32 %v8629_v39, %v8208_v51 }
 0x31e   : > { %v6487_v58 = vpop.eup %6486  ;;  %6506 = vrcp.f32 %v4483_v12  ;;  %v4489_v56 = vadd.f32 1.0, %v6485_v1  ;;  %v4236_v54 = vmul.f32 1.442695, %v3827_v43  ;;  %v3834_v12 = vsub.f32 0.0, %v5565_v40 }
 0x31f   : > { %v6489_v19 = vpop.eup %6488  ;;  %6508 = vrcp.f32 %v4485_v34  ;;  %v4491_v24 = vadd.f32 1.0, %v6487_v58  ;;  %v5567_v36 = vadd.f32 %v8631_v9, %v8212_v50  ;;  %v5504_v1 = vadd.f32 %v8634_v14, %v8198_v23 }
 0x320   : > { %v6491_v10 = vpop.eup %6490  ;;  %6510 = vrcp.f32 %v4489_v56  ;;  %v4490_v47 = vadd.f32 1.0, %v6489_v19  ;;  %v4248_v39 = vmul.f32 1.442695, %v3833_v60  ;;  %v3840_v42 = vsub.f32 0.0, %v5566_v57  ;;  %v5416_v43 = vpop.f32.mrb[172].mxu1 }
 0x321   : > { %v6493_v45 = vpop.eup %6492  ;;  %6512 = vrcp.f32 %v4491_v24  ;;  %v4492_v2 = vadd.f32 1.0, %v6491_v10  ;;  %v4246_v9 = vmul.f32 1.442695, %v3832_v28  ;;  %v3839_v56 = vsub.f32 0.0, %v5503_v13 }
 0x322   : > { %v6495_v27 = vpop.eup %6494  ;;  %4919 = vst [vmem:[%s8268_s9 + $0x4e8] sm:$0xff] %v6493_v45  ;;  %6514 = vrcp.f32 %v4490_v47  ;;  %v4250_v38 = vmul.f32 1.442695, %v3834_v12  ;;  %v3841_v14 = vsub.f32 0.0, %v5567_v36  ;;  %v4258_v24 = vmul.f32 1.442695, %v3838_v49 }
 0x323   : > { %v6497_v26 = vpop.eup %6496  ;;  %4923 = vst [vmem:[%s8268_s9 + $0x508] sm:$0xff] %v6495_v27  ;;  %6516 = vrcp.f32 %v4492_v2  ;;  %v3845_v40 = vsub.f32 0.0, %v5504_v1  ;;  %v4262_v47 = vmul.f32 1.442695, %v3840_v42  ;;  %v4260_v7 = vmul.f32 1.442695, %v3839_v56 }
 0x324   : > { %v6499_v63 = vpop.eup %6498  ;;  %4925 = vst [vmem:[%s8268_s9 + $0x518] sm:$0xff] %v6497_v26  ;;  %6518 = vpow2.f32 %v4230_v32  ;;  %v5417_v32 = vpop.f32.mrb[173].mxu1  ;;  %v4264_v2 = vmul.f32 1.442695, %v3841_v14 }
 0x325   : > { %v6501_v34 = vpop.eup %6500  ;;  %4924 = vst [vmem:[%s8268_s9 + $0x510] sm:$0xff] %v6499_v63  ;;  %6520 = vpow2.f32 %v4234_v41  ;;  %v8941_v18 = vadd.f32 %v5417_v32, %v5416_v43  ;;  %v5419_v41 = vpop.f32.mrb[174].mxu1  ;;  %v4272_v27 = vmul.f32 1.442695, %v3845_v40 }
 0x326   : > { %v6503_v58 = vpop.eup %6502  ;;  %4926 = vst [vmem:[%s8268_s9 + $0x520] sm:$0xff] %v6501_v34  ;;  %6522 = vpow2.f32 %v4232_v44  ;;  %v5420_v52 = vpop.f32.mrb[175].mxu1  ;;  %v5568_v44 = vadd.f32 %v8636_v30, %v8202_v53 }
 0x327   : > { %v6505_v8 = vpop.eup %6504  ;;  %4930 = vst [vmem:[%s8268_s9 + $0x540] sm:$0xff] %v6503_v58  ;;  %6524 = vpow2.f32 %v4236_v54  ;;  %v8945_v60 = vadd.f32 %v5420_v52, %v5419_v41  ;;  %v9697_v54 = vld [vmem:[#allocation23_spill] sm:$0xff] }
 0x328   : > { %v6507_v19 = vpop.eup %6506  ;;  %4932 = vst [vmem:[%s8268_s9 + $0x550] sm:$0xff] %v6505_v8  ;;  %6526 = vpow2.f32 %v4244_v48  ;;  %v5422_v13 = vpop.f32.mrb[176].mxu1  ;;  %v5505_v12 = vadd.f32 %v9697_v54, %v8208_v51  ;;  %v3847_v30 = vsub.f32 0.0, %v5568_v44  ;;  %v9699_v52 = vld [vmem:[#allocation27_spill] sm:$0xff] }
 0x329   : > { %v6509_v10 = vpop.eup %6508  ;;  %4931 = vst [vmem:[%s8268_s9 + $0x548] sm:$0xff] %v6507_v19  ;;  %6528 = vpow2.f32 %v4248_v39  ;;  %v5423_v36 = vpop.f32.mrb[177].mxu1 }
 0x32a   : > { %v6511_v20 = vpop.eup %6510  ;;  %4933 = vst [vmem:[%s8268_s9 + $0x558] sm:$0xff] %v6509_v10  ;;  %6530 = vpow2.f32 %v4246_v9  ;;  %v8956_v49 = vadd.f32 %v5423_v36, %v5422_v13  ;;  %v5425_v1 = vpop.f32.mrb[178].mxu1  ;;  %v9698_v9 = vld [vmem:[#allocation22_spill] sm:$0xff]  ;;  %v3846_v14 = vsub.f32 0.0, %v5505_v12  ;;  %v5506_v10 = vadd.f32 %v9699_v52, %v8198_v23  ;;  %v9701_v36 = vld [vmem:[#allocation31_spill] sm:$0xff] }
 0x32b   : > { %v6513_v45 = vpop.eup %6512  ;;  %4937 = vst [vmem:[%s8268_s9 + $0x578] sm:$0xff] %v6511_v20  ;;  %6532 = vpow2.f32 %v4250_v38  ;;  %v5426_v42 = vpop.f32.mrb[179].mxu1  ;;  %v5569_v56 = vadd.f32 %v9698_v9, %v8212_v50 }
 0x32c   : > { %v6515_v57 = vpop.eup %6514  ;;  %4939 = vst [vmem:[%s8268_s9 + $0x588] sm:$0xff] %v6513_v45  ;;  %6534 = vpow2.f32 %v4258_v24  ;;  %v8960_v32 = vadd.f32 %v5426_v42, %v5425_v1  ;;  %v4274_v44 = vmul.f32 1.442695, %v3846_v14  ;;  %v9702_v42 = vld [vmem:[#allocation30_spill] sm:$0xff] }
 0x32d   : > { %v6517_v28 = vpop.eup %6516  ;;  %4938 = vst [vmem:[%s8268_s9 + $0x580] sm:$0xff] %v6515_v57  ;;  %6536 = vpow2.f32 %v4262_v47  ;;  %v3848_v45 = vsub.f32 0.0, %v5569_v56 }
 0x32e   : > { %v6519_v26 = vpop.eup %6518  ;;  %4940 = vst [vmem:[%s8268_s9 + $0x590] sm:$0xff] %v6517_v28  ;;  %6538 = vpow2.f32 %v4260_v7  ;;  %v4276_v7 = vmul.f32 1.442695, %v3847_v30  ;;  %v9700_v28 = vld [vmem:[#allocation26_spill] sm:$0xff]  ;;  %v3852_v30 = vsub.f32 0.0, %v5506_v10 }
 0x32f   : > { %v6521_v63 = vpop.eup %6520  ;;  %v4496_v48 = vadd.f32 1.0, %v6519_v26  ;;  %6540 = vpow2.f32 %v4264_v2  ;;  %v5570_v13 = vadd.f32 %v9700_v28, %v8202_v53 }
 0x330   : > { %v6523_v34 = vpop.eup %6522  ;;  %v4498_v39 = vadd.f32 1.0, %v6521_v63  ;;  %6542 = vpow2.f32 %v4272_v27  ;;  %v5428_v2 = vpop.f32.mrb[180].mxu1  ;;  %v5507_v63 = vadd.f32 %v9701_v36, %v8208_v51 }
 0x331   : > { %v6525_v43 = vpop.eup %6524  ;;  %6544 = vrcp.f32 %v4496_v48  ;;  %v4497_v58 = vadd.f32 1.0, %v6523_v34  ;;  %v5429_v26 = vpop.f32.mrb[181].mxu1 }
 0x332   : > { %v6527_v8 = vpop.eup %6526  ;;  %6546 = vrcp.f32 %v4498_v39  ;;  %v4499_v38 = vadd.f32 1.0, %v6525_v43  ;;  %v8968_v48 = vadd.f32 %v5429_v26, %v5428_v2  ;;  %v5431_v1 = vpop.f32.mrb[182].mxu1  ;;  %v5571_v43 = vadd.f32 %v9702_v42, %v8212_v50  ;;  %v9705_v2 = vld [vmem:[#allocation17_spill] sm:$0xff]  ;;  %v9706_v26 = vld [vmem:[#allocation36_spill] sm:$0xff] }
 0x333   : > { %v6529_v41 = vpop.eup %6528  ;;  %6548 = vrcp.f32 %v4497_v58  ;;  %v4503_v19 = vadd.f32 1.0, %v6527_v8  ;;  %v5432_v58 = vpop.f32.mrb[183].mxu1  ;;  %v9703_v8 = vld [vmem:[#allocation13_spill] sm:$0xff] }
 0x334   : > { %v6531_v24 = vpop.eup %6530  ;;  %6550 = vrcp.f32 %v4499_v38  ;;  %v4505_v40 = vadd.f32 1.0, %v6529_v41  ;;  %v5508_v38 = vadd.f32 %v9703_v8, %v8198_v23  ;;  %v8974_v14 = vadd.f32 %v5432_v58, %v5431_v1 }
 0x335   : > { %v6533_v47 = vpop.eup %6532  ;;  %6552 = vrcp.f32 %v4503_v19  ;;  %v4504_v20 = vadd.f32 1.0, %v6531_v24  ;;  %v3854_v24 = vsub.f32 0.0, %v5570_v13  ;;  %v4278_v23 = vmul.f32 1.442695, %v3848_v45 }
 0x336   : > { %v6535_v57 = vpop.eup %6534  ;;  %6554 = vrcp.f32 %v4505_v40  ;;  %v4506_v27 = vadd.f32 1.0, %v6533_v47  ;;  %v9704_v40 = vld [vmem:[#allocation12_spill] sm:$0xff]  ;;  %v3855_v28 = vsub.f32 0.0, %v5571_v43  ;;  %v5573_v13 = vadd.f32 %v9706_v26, %v8212_v50 }
 0x337   : > { %v6537_v54 = vpop.eup %6536  ;;  %6556 = vrcp.f32 %v4504_v20  ;;  %v4510_v12 = vadd.f32 1.0, %v6535_v57  ;;  %v5572_v52 = vadd.f32 %v9704_v40, %v8202_v53  ;;  %v3853_v20 = vsub.f32 0.0, %v5507_v63 }
 0x338   : > { %v6539_v34 = vpop.eup %6538  ;;  %6558 = vrcp.f32 %v4506_v27  ;;  %v4512_v39 = vadd.f32 1.0, %v6537_v54  ;;  %v5509_v57 = vadd.f32 %v9705_v2, %v8208_v51  ;;  %v4286_v53 = vmul.f32 1.442695, %v3852_v30  ;;  %v5434_v36 = vpop.f32.mrb[184].mxu1 }
 0x339   : > { %v6541_v9 = vpop.eup %6540  ;;  %6560 = vrcp.f32 %v4510_v12  ;;  %v4511_v56 = vadd.f32 1.0, %v6539_v34  ;;  %v3859_v12 = vsub.f32 0.0, %v5508_v38  ;;  %v4290_v51 = vmul.f32 1.442695, %v3854_v24  ;;  %v5435_v34 = vpop.f32.mrb[185].mxu1 }
 0x33a   : > { %v6543_v41 = vpop.eup %6542  ;;  %6562 = vrcp.f32 %v4512_v39  ;;  %v4513_v19 = vadd.f32 1.0, %v6541_v9  ;;  %v3861_v1 = vsub.f32 0.0, %v5572_v52  ;;  %v4288_v39 = vmul.f32 1.442695, %v3853_v20  ;;  %v5437_v43 = vpop.f32.mrb[186].mxu1 }
 0x33b   : > { %v6545_v10 = vpop.eup %6544  ;;  %6564 = vrcp.f32 %v4511_v56  ;;  %v4517_v47 = vadd.f32 1.0, %v6543_v41  ;;  %v3860_v50 = vsub.f32 0.0, %v5509_v57  ;;  %v8986_v42 = vadd.f32 %v5435_v34, %v5434_v36  ;;  %v6998_v36 = vld [vmem:[%s9511_s4] sm:$0x7f] }
 0x33c   : > { %v6547_v27 = vpop.eup %6546  ;;  %4944 = vst [vmem:[%s8268_s9 + $0x5b0] sm:$0xff] %v6545_v10  ;;  %6566 = vrcp.f32 %v4513_v19  ;;  %v4292_v58 = vmul.f32 1.442695, %v3855_v28  ;;  %v3862_v9 = vsub.f32 0.0, %v5573_v13  ;;  %v4300_v8 = vmul.f32 1.442695, %v3859_v12 }
 0x33d   : > { %v6549_v54 = vpop.eup %6548  ;;  %4946 = vst [vmem:[%s8268_s9 + $0x5c0] sm:$0xff] %v6547_v27  ;;  %6568 = vrcp.f32 %v4517_v47  ;;  %v4304_v41 = vmul.f32 1.442695, %v3861_v1  ;;  %v4302_v24 = vmul.f32 1.442695, %v3860_v50  ;;  %v9707_v10 = vld [vmem:[#allocation2_spill] sm:$0xff] }
 0x33e   : > { %v6551_v63 = vpop.eup %6550  ;;  %4945 = vst [vmem:[%s8268_s9 + $0x5b8] sm:$0xff] %v6549_v54  ;;  %6570 = vpow2.f32 %v4276_v7  ;;  %v5438_v7 = vpop.f32.mrb[187].mxu1  ;;  %v4306_v52 = vmul.f32 1.442695, %v3862_v9  ;;  %v1204_v47 = vsub.s32 6, %v9707_v10  ;;  %v1200_v54 = vsub.s32 5, %v9707_v10 }
 0x33f   : > { %v6553_v45 = vpop.eup %6552  ;;  %4947 = vst [vmem:[%s8268_s9 + $0x5c8] sm:$0xff] %v6551_v63  ;;  %6572 = vpow2.f32 %v4274_v44  ;;  %v8990_v44 = vadd.f32 %v5438_v7, %v5437_v43 }
 0x340   : > { %v6555_v30 = vpop.eup %6554  ;;  %4951 = vst [vmem:[%s8268_s9 + $0x5e8] sm:$0xff] %v6553_v45  ;;  %6574 = vpow2.f32 %v4278_v23  ;;  %v5440_v2 = vpop.f32.mrb[188].mxu1  ;;  %v1196_v23 = vsub.s32 4, %v9707_v10  ;;  %v9007_v63 = vrot.slane %v6998_v36, %v1204_v47 }
 0x341   : > { %v6557_v56 = vpop.eup %6556  ;;  %4953 = vst [vmem:[%s8268_s9 + $0x5f8] sm:$0xff] %v6555_v30  ;;  %6576 = vpow2.f32 %v4286_v53  ;;  %v5441_v27 = vpop.f32.mrb[189].mxu1 }
 0x342   : > { %v6559_v38 = vpop.eup %6558  ;;  %4952 = vst [vmem:[%s8268_s9 + $0x5f0] sm:$0xff] %v6557_v56  ;;  %6578 = vpow2.f32 %v4290_v51  ;;  %v9000_v26 = vadd.f32 %v5441_v27, %v5440_v2  ;;  %v5443_v13 = vpop.f32.mrb[190].mxu1  ;;  %v9011_v50 = vrot.slane %v6998_v36, %v1196_v23  ;;  %v3355_v56 = vadd.f32 %v8772_v11, %v9007_v63 }
 0x343   : > { %v6561_v19 = vpop.eup %6560  ;;  %4954 = vst [vmem:[%s8268_s9 + $0x600] sm:$0xff] %v6559_v38  ;;  %6580 = vpow2.f32 %v4288_v39  ;;  %v5444_v12 = vpop.f32.mrb[191].mxu1 }
 0x344   : > { %v6563_v40 = vpop.eup %6562  ;;  %4958 = vst [vmem:[%s8268_s9 + $0x620] sm:$0xff] %v6561_v19  ;;  %6582 = vpow2.f32 %v4292_v58  ;;  %v9009_v34 = vadd.f32 %v5444_v12, %v5443_v13  ;;  %v9013_v58 = vrot.slane %v6998_v36, %v1200_v54 }
 0x345   : > { %v6565_v20 = vpop.eup %6564  ;;  %4960 = vst [vmem:[%s8268_s9 + $0x630] sm:$0xff] %v6563_v40  ;;  %6584 = vpow2.f32 %v4300_v8 }
 0x346   : > { %v6567_v57 = vpop.eup %6566  ;;  %4959 = vst [vmem:[%s8268_s9 + $0x628] sm:$0xff] %v6565_v20  ;;  %6586 = vpow2.f32 %v4304_v41 }
 0x347   : > { %v6569_v28 = vpop.eup %6568  ;;  %4961 = vst [vmem:[%s8268_s9 + $0x638] sm:$0xff] %v6567_v57  ;;  %6588 = vpow2.f32 %v4302_v24 }
 0x348   : > { %v6571_v53 = vpop.eup %6570  ;;  %4965 = vst [vmem:[%s8268_s9 + $0x658] sm:$0xff] %v6569_v28  ;;  %6590 = vpow2.f32 %v4306_v52  ;;  %v3161_v41 = vpop.f32.mrb[128].mxu0 }
 0x349   : > { %v6573_v51 = vpop.eup %6572  ;;  %v4519_v1 = vadd.f32 1.0, %v6571_v53  ;;  %v3515_v19 = vpop.f32.mrb[192].mxu1  ;;  %v5574_v52 = vadd.f32 %v3161_v41, %v9011_v50 }
 0x34a   : > { %v6575_v45 = vpop.eup %6574  ;;  %v4518_v39 = vadd.f32 1.0, %v6573_v51  ;;  %v3516_v10 = vadd.f32 %v3515_v19, %v3355_v56  ;;  %v3163_v47 = vpop.f32.mrb[129].mxu0 }
 0x34b   : > { %v6577_v43 = vpop.eup %6576  ;;  %6592 = vrcp.f32 %v4519_v1  ;;  %v4520_v30 = vadd.f32 1.0, %v6575_v45  ;;  %v3517_v20 = vpop.f32.mrb[193].mxu1  ;;  %v5575_v27 = vadd.f32 %v3163_v47, %v9013_v58  ;;  %v3646_v54 = vsub.f32 0.0, %v5574_v52 }
 0x34c   : > { %v6579_v9 = vpop.eup %6578  ;;  %6594 = vrcp.f32 %v4518_v39  ;;  %v4524_v7 = vadd.f32 1.0, %v6577_v43  ;;  %v3165_v23 = vpop.f32.mrb[130].mxu0  ;;  %v3648_v53 = vsub.f32 0.0, %v3516_v10  ;;  %v3363_v47 = vadd.f32 %v8785_v17, %v9007_v63 }
 0x34d   : > { %v6581_v8 = vpop.eup %6580  ;;  %6596 = vrcp.f32 %v4520_v30  ;;  %v4526_v38 = vadd.f32 1.0, %v6579_v9  ;;  %v3518_v11 = vpop.f32.mrb[194].mxu1  ;;  %v3647_v45 = vsub.f32 0.0, %v5575_v27  ;;  %v5576_v39 = vadd.f32 %v3165_v23, %v9011_v50 }
 0x34e   : > { %v6583_v24 = vpop.eup %6582  ;;  %6598 = vrcp.f32 %v4524_v7  ;;  %v4525_v40 = vadd.f32 1.0, %v6581_v8  ;;  %v3167_v12 = vpop.f32.mrb[131].mxu0  ;;  %v3874_v9 = vmul.f32 1.442695, %v3646_v54  ;;  %v3358_v7 = vadd.f32 %v8777_v5, %v9007_v63 }
 0x34f   : > { %v6585_v2 = vpop.eup %6584  ;;  %6600 = vrcp.f32 %v4526_v38  ;;  %v4527_v57 = vadd.f32 1.0, %v6583_v24  ;;  %v3520_v36 = vpop.f32.mrb[195].mxu1  ;;  %v3878_v8 = vmul.f32 1.442695, %v3648_v53  ;;  %v3653_v38 = vsub.f32 0.0, %v5576_v39 }
 0x350   : > { %v6587_v28 = vpop.eup %6586  ;;  %6602 = vrcp.f32 %v4525_v40  ;;  %v4531_v13 = vadd.f32 1.0, %v6585_v2  ;;  %v3876_v41 = vmul.f32 1.442695, %v3647_v45  ;;  %v3519_v19 = vadd.f32 %v3518_v11, %v3358_v7  ;;  %v3171_v10 = vpop.f32.mrb[132].mxu0 }
 0x351   : > { %v6589_v51 = vpop.eup %6588  ;;  %6604 = vrcp.f32 %v4527_v57  ;;  %v4533_v1 = vadd.f32 1.0, %v6587_v28  ;;  %v5577_v24 = vadd.f32 %v3167_v12, %v9013_v58  ;;  %v3888_v52 = vmul.f32 1.442695, %v3653_v38  ;;  %v3523_v20 = vpop.f32.mrb[196].mxu1 }
 0x352   : > { %v6591_v43 = vpop.eup %6590  ;;  %6606 = vrcp.f32 %v4531_v13  ;;  %v4532_v30 = vadd.f32 1.0, %v6589_v51  ;;  %v3655_v2 = vsub.f32 0.0, %v3519_v19  ;;  %v5578_v27 = vadd.f32 %v3171_v10, %v9011_v50  ;;  %v3173_v23 = vpop.f32.mrb[133].mxu0 }
 0x353   : > { %6608 = vrcp.f32 %v4533_v1  ;;  %v4534_v56 = vadd.f32 1.0, %v6591_v43  ;;  %v3654_v57 = vsub.f32 0.0, %v5577_v24  ;;  %v3525_v11 = vpop.f32.mrb[197].mxu1  ;;  %v3524_v13 = vadd.f32 %v3523_v20, %v3363_v47  ;;  %v3175_v53 = vpop.f32.mrb[134].mxu0 }
 0x354   : > { %6610 = vrcp.f32 %v4532_v30  ;;  %v5579_v54 = vadd.f32 %v3173_v23, %v9013_v58  ;;  %v3366_v17 = vadd.f32 %v8793_v21, %v9007_v63  ;;  %v3526_v12 = vpop.f32.mrb[198].mxu1  ;;  %v3892_v51 = vmul.f32 1.442695, %v3655_v2  ;;  %v3177_v39 = vpop.f32.mrb[135].mxu0 }
 0x355   : > { %v6593_v40 = vpop.eup %6592  ;;  %6612 = vrcp.f32 %v4534_v56  ;;  %v3890_v1 = vmul.f32 1.442695, %v3654_v57  ;;  %v3660_v45 = vsub.f32 0.0, %v5578_v27  ;;  %v3662_v30 = vsub.f32 0.0, %v3524_v13  ;;  %v3528_v56 = vpop.f32.mrb[199].mxu1 }
 0x356   : > { %v6595_v5 = vpop.eup %6594  ;;  %4967 = vst [vmem:[%s8268_s9 + $0x668] sm:$0xff] %v6593_v40  ;;  %6614 = vpow2.f32 %v3874_v9  ;;  %v3661_v9 = vsub.f32 0.0, %v5579_v54  ;;  %v5580_v7 = vadd.f32 %v3175_v53, %v9011_v50  ;;  %v3527_v38 = vadd.f32 %v3526_v12, %v3366_v17 }
 0x357   : > { %v6597_v28 = vpop.eup %6596  ;;  %4966 = vst [vmem:[%s8268_s9 + $0x660] sm:$0xff] %v6595_v5  ;;  %6616 = vpow2.f32 %v3878_v8  ;;  %v3902_v8 = vmul.f32 1.442695, %v3660_v45  ;;  %v3906_v24 = vmul.f32 1.442695, %v3662_v30  ;;  %v3371_v27 = vadd.f32 %v8796_v16, %v9007_v63 }
 0x358   : > { %v6599_v36 = vpop.eup %6598  ;;  %4968 = vst [vmem:[%s8268_s9 + $0x670] sm:$0xff] %v6597_v28  ;;  %6618 = vpow2.f32 %v3876_v41  ;;  %v5581_v41 = vadd.f32 %v3177_v39, %v9013_v58  ;;  %v3904_v40 = vmul.f32 1.442695, %v3661_v9  ;;  %v3669_v47 = vsub.f32 0.0, %v3527_v38  ;;  %v3181_v57 = vpop.f32.mrb[136].mxu0 }
 0x359   : > { %v6601_v43 = vpop.eup %6600  ;;  %4972 = vst [vmem:[%s8268_s9 + $0x690] sm:$0xff] %v6599_v36  ;;  %6620 = vpow2.f32 %v3888_v52  ;;  %v3667_v52 = vsub.f32 0.0, %v5580_v7  ;;  %v3531_v23 = vpop.f32.mrb[200].mxu1  ;;  %v3374_v17 = vadd.f32 %v8798_v33, %v9007_v63  ;;  %v5582_v16 = vadd.f32 %v3181_v57, %v9011_v50 }
 0x35a   : > { %v6603_v21 = vpop.eup %6602  ;;  %4974 = vst [vmem:[%s8268_s9 + $0x6a0] sm:$0xff] %v6601_v43  ;;  %6622 = vpow2.f32 %v3892_v51  ;;  %v3668_v20 = vsub.f32 0.0, %v5581_v41  ;;  %v3920_v28 = vmul.f32 1.442695, %v3669_v47  ;;  %v3183_v54 = vpop.f32.mrb[137].mxu0  ;;  %v3532_v36 = vadd.f32 %v3531_v23, %v3371_v27 }
 0x35b   : > { %v6605_v19 = vpop.eup %6604  ;;  %4973 = vst [vmem:[%s8268_s9 + $0x698] sm:$0xff] %v6603_v21  ;;  %6624 = vpow2.f32 %v3890_v1  ;;  %v3916_v2 = vmul.f32 1.442695, %v3667_v52  ;;  %v3533_v53 = vpop.f32.mrb[201].mxu1  ;;  %v5583_v21 = vadd.f32 %v3183_v54, %v9013_v58  ;;  %v3379_v41 = vadd.f32 %v8800_v46, %v9007_v63 }
 0x35c   : > { %v6607_v10 = vpop.eup %6606  ;;  %4975 = vst [vmem:[%s8268_s9 + $0x6a8] sm:$0xff] %v6605_v19  ;;  %6626 = vpow2.f32 %v3902_v8  ;;  %v3918_v13 = vmul.f32 1.442695, %v3668_v20  ;;  %v3185_v51 = vpop.f32.mrb[138].mxu0  ;;  %v3676_v20 = vsub.f32 0.0, %v3532_v36 }
 0x35d   : > { %v6609_v5 = vpop.eup %6608  ;;  %4979 = vst [vmem:[%s8268_s9 + $0x6c8] sm:$0xff] %v6607_v10  ;;  %6628 = vpow2.f32 %v3906_v24  ;;  %v3534_v1 = vpop.f32.mrb[202].mxu1  ;;  %v5584_v52 = vadd.f32 %v3185_v51, %v9011_v50  ;;  %v3675_v23 = vsub.f32 0.0, %v5583_v21 }
 0x35e   : > { %v6611_v11 = vpop.eup %6610  ;;  %4981 = vst [vmem:[%s8268_s9 + $0x6d8] sm:$0xff] %v6609_v5  ;;  %6630 = vpow2.f32 %v3904_v40  ;;  %v9047_v39 = vadd.f32 %v3534_v1, %v3374_v17  ;;  %v3187_v43 = vpop.f32.mrb[139].mxu0  ;;  %v3674_v40 = vsub.f32 0.0, %v5582_v16 }
 0x35f   : > { %v6613_v12 = vpop.eup %6612  ;;  %4980 = vst [vmem:[%s8268_s9 + $0x6d0] sm:$0xff] %v6611_v11  ;;  %6632 = vpow2.f32 %v3916_v2  ;;  %v3536_v30 = vpop.f32.mrb[203].mxu1  ;;  %v5585_v53 = vadd.f32 %v3187_v43, %v9013_v58  ;;  %v3681_v16 = vsub.f32 0.0, %v5584_v52 }
 0x360   : > { %v6615_v45 = vpop.eup %6614  ;;  %4982 = vst [vmem:[%s8268_s9 + $0x6e0] sm:$0xff] %v6613_v12  ;;  %6634 = vpow2.f32 %v3920_v28  ;;  %v3191_v5 = vpop.f32.mrb[140].mxu0  ;;  %v3382_v12 = vadd.f32 %v8802_v0, %v9007_v63  ;;  %v3932_v0 = vmul.f32 1.442695, %v3675_v23 }
 0x361   : > { %v6617_v9 = vpop.eup %6616  ;;  %v4318_v7 = vadd.f32 1.0, %v6615_v45  ;;  %6636 = vpow2.f32 %v3918_v13  ;;  %v3539_v2 = vpop.f32.mrb[204].mxu1  ;;  %v3930_v45 = vmul.f32 1.442695, %v3674_v40  ;;  %v5586_v21 = vadd.f32 %v3191_v5, %v9011_v50 }
 0x362   : > { %v6619_v56 = vpop.eup %6618  ;;  %v4320_v33 = vadd.f32 1.0, %v6617_v9  ;;  %v9053_v11 = vadd.f32 %v3539_v2, %v3379_v41  ;;  %v3193_v28 = vpop.f32.mrb[141].mxu0  ;;  %v3944_v5 = vmul.f32 1.442695, %v3681_v16 }
 0x363   : > { %v6621_v8 = vpop.eup %6620  ;;  %6638 = vrcp.f32 %v4318_v7  ;;  %v4319_v38 = vadd.f32 1.0, %v6619_v56  ;;  %v3541_v46 = vpop.f32.mrb[205].mxu1  ;;  %v5587_v40 = vadd.f32 %v3193_v28, %v9013_v58  ;;  %v3688_v2 = vsub.f32 0.0, %v5586_v21 }
 0x364   : > { %v6623_v19 = vpop.eup %6622  ;;  %6640 = vrcp.f32 %v4320_v33  ;;  %v4325_v24 = vadd.f32 1.0, %v6621_v8  ;;  %v3195_v17 = vpop.f32.mrb[142].mxu0  ;;  %v3683_v33 = vsub.f32 0.0, %v9047_v39  ;;  %v3690_v46 = vsub.f32 0.0, %v9053_v11 }
 0x365   : > { %v6625_v10 = vpop.eup %6624  ;;  %6642 = vrcp.f32 %v4319_v38  ;;  %v4327_v47 = vadd.f32 1.0, %v6623_v19  ;;  %v3542_v36 = vpop.f32.mrb[206].mxu1  ;;  %v3934_v38 = vmul.f32 1.442695, %v3676_v20  ;;  %v3387_v20 = vadd.f32 %v8825_v25, %v9007_v63 }
 0x366   : > { %v6627_v57 = vpop.eup %6626  ;;  %6644 = vrcp.f32 %v4325_v24  ;;  %v4326_v27 = vadd.f32 1.0, %v6625_v10  ;;  %v3197_v30 = vpop.f32.mrb[143].mxu0  ;;  %v3682_v24 = vsub.f32 0.0, %v5585_v53  ;;  %v5588_v10 = vadd.f32 %v3195_v17, %v9011_v50 }
 0x367   : > { %v6629_v13 = vpop.eup %6628  ;;  %6646 = vrcp.f32 %v4327_v47  ;;  %v4332_v54 = vadd.f32 1.0, %v6627_v57  ;;  %v3544_v9 = vpop.f32.mrb[207].mxu1  ;;  %v3543_v47 = vadd.f32 %v3542_v36, %v3382_v12  ;;  %v3948_v28 = vmul.f32 1.442695, %v3683_v33 }
 0x368   : > { %v6631_v51 = vpop.eup %6630  ;;  %6648 = vrcp.f32 %v4326_v27  ;;  %v4334_v1 = vadd.f32 1.0, %v6629_v13  ;;  %v3201_v57 = vpop.f32.mrb[144].mxu0  ;;  %v5589_v13 = vadd.f32 %v3197_v30, %v9013_v58  ;;  %v3689_v12 = vsub.f32 0.0, %v5587_v40 }
 0x369   : > { %v6633_v7 = vpop.eup %6632  ;;  %6650 = vrcp.f32 %v4332_v54  ;;  %v4333_v56 = vadd.f32 1.0, %v6631_v51  ;;  %v3547_v27 = vpop.f32.mrb[208].mxu1  ;;  %v5590_v25 = vadd.f32 %v3201_v57, %v9011_v50  ;;  %v3946_v16 = vmul.f32 1.442695, %v3682_v24 }
 0x36a   : > { %v6635_v43 = vpop.eup %6634  ;;  %6652 = vrcp.f32 %v4334_v1  ;;  %v4339_v8 = vadd.f32 1.0, %v6633_v7  ;;  %v9067_v54 = vpop.f32.mrb[145].mxu0  ;;  %v9072_v36 = vadd.f32 %v3547_v27, %v3387_v20  ;;  %v3695_v30 = vsub.f32 0.0, %v5588_v10 }
 0x36b   : > { %v6637_v41 = vpop.eup %6636  ;;  %6654 = vrcp.f32 %v4333_v56  ;;  %v4341_v19 = vadd.f32 1.0, %v6635_v43  ;;  %v3549_v53 = vpop.f32.mrb[209].mxu1  ;;  %v3390_v9 = vadd.f32 %v8833_v6, %v9007_v63  ;;  %v3958_v56 = vmul.f32 1.442695, %v3688_v2 }
 0x36c   : > { %6656 = vrcp.f32 %v4339_v8  ;;  %v4340_v52 = vadd.f32 1.0, %v6637_v41  ;;  %v9074_v51 = vpop.f32.mrb[146].mxu0  ;;  %v3550_v1 = vpop.f32.mrb[210].mxu1  ;;  %v3697_v33 = vsub.f32 0.0, %v3543_v47  ;;  %v3962_v8 = vmul.f32 1.442695, %v3690_v46 }
 0x36d   : > { %v6639_v39 = vpop.eup %6638  ;;  %6658 = vrcp.f32 %v4341_v19  ;;  %v9079_v7 = vpop.f32.mrb[147].mxu0  ;;  %v9084_v41 = vadd.f32 %v3550_v1, %v3390_v9  ;;  %v3960_v6 = vmul.f32 1.442695, %v3689_v12  ;;  %v3702_v24 = vsub.f32 0.0, %v5590_v25 }
 0x36e   : > { %v6641_v23 = vpop.eup %6640  ;;  %4766 = vst [vmem:[%s8268_s9 + $0x20] sm:$0xff] %v6639_v39  ;;  %6660 = vrcp.f32 %v4340_v52  ;;  %v3552_v21 = vpop.f32.mrb[211].mxu1  ;;  %v3972_v40 = vmul.f32 1.442695, %v3695_v30  ;;  %v3976_v10 = vmul.f32 1.442695, %v3697_v33  ;;  %v3395_v39 = vadd.f32 %v8843_v62, %v9007_v63 }
 0x36f   : > { %v6643_v17 = vpop.eup %6642  ;;  %4768 = vst.msk [vmem:[%s8268_s9 + $0x30] sm:$0xff] %vm2113_vm1, %v6641_v23  ;;  %6662 = vpow2.f32 %v3930_v45  ;;  %v3398_v23 = vadd.f32 %v8847_v22, %v9007_v63  ;;  %v3986_v46 = vmul.f32 1.442695, %v3702_v24 }
 0x370   : > { %v6645_v11 = vpop.eup %6644  ;;  %4767 = vst [vmem:[%s8268_s9 + $0x28] sm:$0xff] %v6643_v17  ;;  %6664 = vpow2.f32 %v3934_v38  ;;  %v3696_v38 = vsub.f32 0.0, %v5589_v13  ;;  %v9090_v47 = vpop.f32.mrb[148].mxu0 }
 0x371   : > { %v6647_v45 = vpop.eup %6646  ;;  %4773 = vst [vmem:[%s8268_s9 + $0x58] sm:$0xff] %v6645_v11  ;;  %6666 = vpow2.f32 %v3932_v0  ;;  %v9095_v20 = vpop.f32.mrb[149].mxu0 }
 0x372   : > { %v6649_v43 = vpop.eup %6648  ;;  %4775 = vst.msk [vmem:[%s8268_s9 + $0x68] sm:$0xff] %vm2113_vm1, %v6647_v45  ;;  %6668 = vpow2.f32 %v3944_v5  ;;  %v3555_v5 = vpop.f32.mrb[212].mxu1  ;;  %v3974_v57 = vmul.f32 1.442695, %v3696_v38  ;;  %v5591_v45 = vadd.f32 %v9067_v54, %v9013_v58  ;;  %v5592_v54 = vadd.f32 %v9074_v51, %v9011_v50 }
 0x373   : > { %v6651_v19 = vpop.eup %6650  ;;  %4774 = vst [vmem:[%s8268_s9 + $0x60] sm:$0xff] %v6649_v43  ;;  %6670 = vpow2.f32 %v3948_v28  ;;  %v3557_v27 = vpop.f32.mrb[213].mxu1  ;;  %v9100_v13 = vadd.f32 %v3555_v5, %v3395_v39 }
 0x374   : > { %v6653_v0 = vpop.eup %6652  ;;  %4780 = vst [vmem:[%s8268_s9 + $0x90] sm:$0xff] %v6651_v19  ;;  %6672 = vpow2.f32 %v3946_v16  ;;  %v9102_v62 = vpop.f32.mrb[150].mxu0  ;;  %v3403_v19 = vadd.f32 %v8856_v3, %v9007_v63  ;;  %v3703_v5 = vsub.f32 0.0, %v5591_v45 }
 0x375   : > { %v6655_v52 = vpop.eup %6654  ;;  %4782 = vst.msk [vmem:[%s8268_s9 + $0xa0] sm:$0xff] %vm2113_vm1, %v6653_v0  ;;  %6674 = vpow2.f32 %v3958_v56  ;;  %v3558_v53 = vpop.f32.mrb[214].mxu1 }
 0x376   : > { %v6657_v2 = vpop.eup %6656  ;;  %4781 = vst [vmem:[%s8268_s9 + $0x98] sm:$0xff] %v6655_v52  ;;  %6676 = vpow2.f32 %v3962_v8  ;;  %v9106_v12 = vadd.f32 %v3558_v53, %v3398_v23  ;;  %v9108_v25 = vpop.f32.mrb[151].mxu0  ;;  %v3704_v8 = vsub.f32 0.0, %v9072_v36 }
 0x377   : > { %v6659_v28 = vpop.eup %6658  ;;  %4787 = vst [vmem:[%s8268_s9 + $0xc8] sm:$0xff] %v6657_v2  ;;  %6678 = vpow2.f32 %v3960_v6  ;;  %v3560_v1 = vpop.f32.mrb[215].mxu1 }
 0x378   : > { %v6661_v17 = vpop.eup %6660  ;;  %4789 = vst.msk [vmem:[%s8268_s9 + $0xd8] sm:$0xff] %vm2113_vm1, %v6659_v28  ;;  %6680 = vpow2.f32 %v3972_v40  ;;  %v9114_v38 = vpop.f32.mrb[152].mxu0  ;;  %v3990_v1 = vmul.f32 1.442695, %v3704_v8 }
 0x379   : > { %v6663_v11 = vpop.eup %6662  ;;  %4788 = vst [vmem:[%s8268_s9 + $0xd0] sm:$0xff] %v6661_v17  ;;  %6682 = vpow2.f32 %v3976_v10  ;;  %v3563_v6 = vpop.f32.mrb[216].mxu1  ;;  %v3406_v10 = vadd.f32 %v8862_v37, %v9007_v63  ;;  %v3414_v37 = vadd.f32 %v8882_v29, %v9007_v63  ;;  %v3711_v29 = vsub.f32 0.0, %v9084_v41 }
 0x37a   : > { %v6665_v22 = vpop.eup %6664  ;;  %v4346_v16 = vadd.f32 1.0, %v6663_v11  ;;  %6684 = vpow2.f32 %v3974_v57  ;;  %v9120_v40 = vpop.f32.mrb[153].mxu0  ;;  %v9124_v2 = vadd.f32 %v3563_v6, %v3403_v19  ;;  %v5593_v11 = vadd.f32 %v9079_v7, %v9013_v58 }
 0x37b   : > { %v6667_v30 = vpop.eup %6666  ;;  %v4348_v9 = vadd.f32 1.0, %v6665_v22  ;;  %6686 = vpow2.f32 %v3986_v46  ;;  %v3565_v52 = vpop.f32.mrb[217].mxu1  ;;  %v3411_v46 = vadd.f32 %v8874_v61, %v9007_v63 }
 0x37c   : > { %v6669_v56 = vpop.eup %6668  ;;  %6688 = vrcp.f32 %v4346_v16  ;;  %v4347_v33 = vadd.f32 1.0, %v6667_v30  ;;  %v9126_v3 = vpop.f32.mrb[154].mxu0  ;;  %v3709_v30 = vsub.f32 0.0, %v5592_v54  ;;  %v3710_v6 = vsub.f32 0.0, %v5593_v11 }
 0x37d   : > { %v6671_v21 = vpop.eup %6670  ;;  %6690 = vrcp.f32 %v4348_v9  ;;  %v4353_v43 = vadd.f32 1.0, %v6669_v56  ;;  %v3566_v57 = vpop.f32.mrb[218].mxu1  ;;  %v5594_v9 = vadd.f32 %v9090_v47, %v9011_v50  ;;  %v3988_v56 = vmul.f32 1.442695, %v3703_v5 }
 0x37e   : > { %v6673_v24 = vpop.eup %6672  ;;  %6692 = vrcp.f32 %v4347_v33  ;;  %v4355_v0 = vadd.f32 1.0, %v6671_v21  ;;  %v9128_v28 = vpop.f32.mrb[155].mxu0  ;;  %v9141_v7 = vadd.f32 %v3566_v57, %v3406_v10  ;;  %v5596_v47 = vadd.f32 %v9102_v62, %v9011_v50 }
 0x37f   : > { %v6675_v39 = vpop.eup %6674  ;;  %6694 = vrcp.f32 %v4353_v43  ;;  %v4354_v36 = vadd.f32 1.0, %v6673_v24  ;;  %v3568_v51 = vpop.f32.mrb[219].mxu1  ;;  %v5595_v43 = vadd.f32 %v9095_v20, %v9013_v58  ;;  %v4000_v52 = vmul.f32 1.442695, %v3709_v30 }
 0x380   : > { %v6677_v27 = vpop.eup %6676  ;;  %6696 = vrcp.f32 %v4355_v0  ;;  %v4360_v23 = vadd.f32 1.0, %v6675_v39  ;;  %v9145_v24 = vpop.f32.mrb[156].mxu0  ;;  %v3716_v39 = vsub.f32 0.0, %v5594_v9  ;;  %v3718_v5 = vsub.f32 0.0, %v9100_v13 }
 0x381   : > { %v6679_v53 = vpop.eup %6678  ;;  %6698 = vrcp.f32 %v4354_v36  ;;  %v4362_v17 = vadd.f32 1.0, %v6677_v27  ;;  %v3571_v0 = vpop.f32.mrb[220].mxu1  ;;  %v5597_v62 = vadd.f32 %v9108_v25, %v9013_v58  ;;  %v5598_v11 = vadd.f32 %v9114_v38, %v9011_v50 }
 0x382   : > { %v6681_v22 = vpop.eup %6680  ;;  %6700 = vrcp.f32 %v4360_v23  ;;  %v4361_v16 = vadd.f32 1.0, %v6679_v53  ;;  %v9147_v20 = vpop.f32.mrb[157].mxu0  ;;  %v9153_v57 = vadd.f32 %v3571_v0, %v3411_v46  ;;  %v4004_v53 = vmul.f32 1.442695, %v3711_v29 }
 0x383   : > { %v6683_v45 = vpop.eup %6682  ;;  %6702 = vrcp.f32 %v4362_v17  ;;  %v4367_v61 = vadd.f32 1.0, %v6681_v22  ;;  %v3573_v10 = vpop.f32.mrb[221].mxu1  ;;  %v3717_v17 = vsub.f32 0.0, %v5595_v43  ;;  %v4002_v46 = vmul.f32 1.442695, %v3710_v6 }
 0x384   : > { %v6685_v33 = vpop.eup %6684  ;;  %6704 = vrcp.f32 %v4361_v16  ;;  %v4369_v21 = vadd.f32 1.0, %v6683_v45  ;;  %v9155_v27 = vpop.f32.mrb[158].mxu0  ;;  %v3723_v16 = vsub.f32 0.0, %v5596_v47  ;;  %v4014_v9 = vmul.f32 1.442695, %v3716_v39 }
 0x385   : > { %v6687_v8 = vpop.eup %6686  ;;  %6706 = vrcp.f32 %v4367_v61  ;;  %v4368_v19 = vadd.f32 1.0, %v6685_v33  ;;  %v3574_v23 = vpop.f32.mrb[222].mxu1  ;;  %v3725_v45 = vsub.f32 0.0, %v9106_v12  ;;  %v4018_v38 = vmul.f32 1.442695, %v3718_v5 }
 0x386   : > { %v6689_v41 = vpop.eup %6688  ;;  %6708 = vrcp.f32 %v4369_v21  ;;  %v4374_v54 = vadd.f32 1.0, %v6687_v8  ;;  %v9161_v13 = vpop.f32.mrb[159].mxu0  ;;  %v9166_v61 = vadd.f32 %v3574_v23, %v3414_v37  ;;  %v3724_v33 = vsub.f32 0.0, %v5597_v62 }
 0x387   : > { %v6691_v36 = vpop.eup %6690  ;;  %4794 = vst [vmem:[%s8268_s9 + $0x100] sm:$0xff] %v6689_v41  ;;  %6710 = vrcp.f32 %v4368_v19  ;;  %v3576_v22 = vpop.f32.mrb[223].mxu1  ;;  %v3730_v43 = vsub.f32 0.0, %v5598_v11  ;;  %v4028_v12 = vmul.f32 1.442695, %v3723_v16  ;;  %v3732_v37 = vsub.f32 0.0, %v9124_v2 }
 0x388   : > { %v6693_v51 = vpop.eup %6692  ;;  %4796 = vst.msk [vmem:[%s8268_s9 + $0x110] sm:$0xff] %vm2113_vm1, %v6691_v36  ;;  %6712 = vrcp.f32 %v4374_v54  ;;  %v9175_v19 = vpop.f32.mrb[160].mxu0  ;;  %v4032_v0 = vmul.f32 1.442695, %v3725_v45  ;;  %v4030_v39 = vmul.f32 1.442695, %v3724_v33  ;;  %v3422_v10 = vadd.f32 %v8896_v59, %v9007_v63 }
 0x389   : > { %v6695_v25 = vpop.eup %6694  ;;  %4795 = vst [vmem:[%s8268_s9 + $0x108] sm:$0xff] %v6693_v51  ;;  %6714 = vpow2.f32 %v3990_v1  ;;  %v4016_v1 = vmul.f32 1.442695, %v3717_v17  ;;  %v3579_v6 = vpop.f32.mrb[224].mxu1  ;;  %v4042_v62 = vmul.f32 1.442695, %v3730_v43 }
 0x38a   : > { %v6697_v30 = vpop.eup %6696  ;;  %4801 = vst [vmem:[%s8268_s9 + $0x138] sm:$0xff] %v6695_v25  ;;  %6716 = vpow2.f32 %v3988_v56  ;;  %v3419_v56 = vadd.f32 %v8892_v31, %v9007_v63  ;;  %v9181_v54 = vpop.f32.mrb[161].mxu0  ;;  %v4046_v17 = vmul.f32 1.442695, %v3732_v37  ;;  %v5599_v25 = vadd.f32 %v9120_v40, %v9013_v58 }
 0x38b   : > { %v6699_v29 = vpop.eup %6698  ;;  %4803 = vst.msk [vmem:[%s8268_s9 + $0x148] sm:$0xff] %vm2113_vm1, %v6697_v30  ;;  %6718 = vpow2.f32 %v4000_v52  ;;  %v3581_v31 = vpop.f32.mrb[225].mxu1  ;;  %v5600_v30 = vadd.f32 %v9126_v3, %v9011_v50 }
 0x38c   : > { %v6701_v21 = vpop.eup %6700  ;;  %4802 = vst [vmem:[%s8268_s9 + $0x140] sm:$0xff] %v6699_v29  ;;  %6720 = vpow2.f32 %v4004_v53  ;;  %v9179_v41 = vadd.f32 %v3579_v6, %v3419_v56  ;;  %v9184_v2 = vpop.f32.mrb[162].mxu0 }
 0x38d   : > { %v6703_v8 = vpop.eup %6702  ;;  %4808 = vst [vmem:[%s8268_s9 + $0x170] sm:$0xff] %v6701_v21  ;;  %6722 = vpow2.f32 %v4002_v46  ;;  %v3582_v36 = vpop.f32.mrb[226].mxu1 }
 0x38e   : > { %v6705_v47 = vpop.eup %6704  ;;  %4810 = vst.msk [vmem:[%s8268_s9 + $0x180] sm:$0xff] %vm2113_vm1, %v6703_v8  ;;  %6724 = vpow2.f32 %v4014_v9  ;;  %v9189_v23 = vpop.f32.mrb[163].mxu0  ;;  %v9193_v11 = vadd.f32 %v3582_v36, %v3422_v10  ;;  %v3731_v8 = vsub.f32 0.0, %v5599_v25  ;;  %v3430_v10 = vadd.f32 %v8911_v55, %v9007_v63 }
 0x38f   : > { %v6707_v52 = vpop.eup %6706  ;;  %4809 = vst [vmem:[%s8268_s9 + $0x178] sm:$0xff] %v6705_v47  ;;  %6726 = vpow2.f32 %v4018_v38  ;;  %v3584_v51 = vpop.f32.mrb[227].mxu1  ;;  %v3427_v38 = vadd.f32 %v8905_v4, %v9007_v63  ;;  %v5602_v55 = vadd.f32 %v9145_v24, %v9011_v50 }
 0x390   : > { %v6709_v5 = vpop.eup %6708  ;;  %4815 = vst [vmem:[%s8268_s9 + $0x1a8] sm:$0xff] %v6707_v52  ;;  %6728 = vpow2.f32 %v4016_v1  ;;  %v4044_v25 = vmul.f32 1.442695, %v3731_v8 }
 0x391   : > { %v6711_v53 = vpop.eup %6710  ;;  %4817 = vst.msk [vmem:[%s8268_s9 + $0x1b8] sm:$0xff] %vm2113_vm1, %v6709_v5  ;;  %6730 = vpow2.f32 %v4028_v12  ;;  %v3435_v5 = vadd.f32 %v8921_v35, %v9007_v63 }
 0x392   : > { %v6713_v22 = vpop.eup %6712  ;;  %4816 = vst [vmem:[%s8268_s9 + $0x1b0] sm:$0xff] %v6711_v53  ;;  %6732 = vpow2.f32 %v4032_v0  ;;  %v3737_v0 = vsub.f32 0.0, %v5600_v30  ;;  %v5601_v53 = vadd.f32 %v9128_v28, %v9013_v58  ;;  %v3739_v28 = vsub.f32 0.0, %v9141_v7 }
 0x393   : > { %v6715_v59 = vpop.eup %6714  ;;  %4822 = vst [vmem:[%s8268_s9 + $0x1e0] sm:$0xff] %v6713_v22  ;;  %6734 = vpow2.f32 %v4030_v39  ;;  %v9201_v29 = vpop.f32.mrb[164].mxu0 }
 0x394   : > { %v6717_v46 = vpop.eup %6716  ;;  %v4376_v16 = vadd.f32 1.0, %v6715_v59  ;;  %6736 = vpow2.f32 %v4042_v62  ;;  %v3587_v1 = vpop.f32.mrb[228].mxu1  ;;  %v4056_v35 = vmul.f32 1.442695, %v3737_v0 }
 0x395   : > { %v6719_v9 = vpop.eup %6718  ;;  %v4375_v45 = vadd.f32 1.0, %v6717_v46  ;;  %6738 = vpow2.f32 %v4046_v17  ;;  %v9205_v43 = vpop.f32.mrb[165].mxu0  ;;  %v9207_v12 = vadd.f32 %v3587_v1, %v3427_v38  ;;  %v3438_v17 = vadd.f32 %v8927_v15, %v9007_v63 }
 0x396   : > { %v6721_v33 = vpop.eup %6720  ;;  %6740 = vrcp.f32 %v4376_v16  ;;  %v4381_v21 = vadd.f32 1.0, %v6719_v9  ;;  %v3589_v3 = vpop.f32.mrb[229].mxu1  ;;  %v5603_v15 = vadd.f32 %v9147_v20, %v9013_v58  ;;  %v3738_v1 = vsub.f32 0.0, %v5601_v53 }
 0x397   : > { %v6723_v40 = vpop.eup %6722  ;;  %6742 = vrcp.f32 %v4375_v45  ;;  %v4383_v56 = vadd.f32 1.0, %v6721_v33  ;;  %v9209_v37 = vpop.f32.mrb[166].mxu0  ;;  %v5606_v53 = vadd.f32 %v9175_v19, %v9011_v50 }
 0x398   : > { %v6725_v6 = vpop.eup %6724  ;;  %6744 = vrcp.f32 %v4381_v21  ;;  %v4382_v47 = vadd.f32 1.0, %v6723_v40  ;;  %v3590_v4 = vpop.f32.mrb[230].mxu1  ;;  %v5604_v40 = vadd.f32 %v9155_v27, %v9011_v50  ;;  %v5605_v27 = vadd.f32 %v9161_v13, %v9013_v58 }
 0x399   : > { %v9211_v31 = vpop.f32.mrb[167].mxu0  ;;  %v6727_v52 = vpop.eup %6726  ;;  %6746 = vrcp.f32 %v4383_v56  ;;  %v4388_v39 = vadd.f32 1.0, %v6725_v6  ;;  %v9223_v30 = vadd.f32 %v3590_v4, %v3430_v10  ;;  %v3744_v6 = vsub.f32 0.0, %v5602_v55 }
 0x39a   : > { %v3592_v36 = vpop.f32.mrb[231].mxu1  ;;  %v6729_v62 = vpop.eup %6728  ;;  %6748 = vrcp.f32 %v4382_v47  ;;  %v4390_v51 = vadd.f32 1.0, %v6727_v52  ;;  %v3751_v13 = vsub.f32 0.0, %v5604_v40 }
 0x39b   : > { %v6731_v22 = vpop.eup %6730  ;;  %6750 = vrcp.f32 %v4388_v39  ;;  %v4389_v59 = vadd.f32 1.0, %v6729_v62  ;;  %v9228_v38 = vpop.f32.mrb[168].mxu0  ;;  %v3746_v39 = vsub.f32 0.0, %v9153_v57  ;;  %v4058_v57 = vmul.f32 1.442695, %v3738_v1 }
 0x39c   : > { %v6733_v46 = vpop.eup %6732  ;;  %6752 = vrcp.f32 %v4390_v51  ;;  %v4395_v16 = vadd.f32 1.0, %v6731_v22  ;;  %v3595_v33 = vpop.f32.mrb[232].mxu1  ;;  %v3745_v51 = vsub.f32 0.0, %v5603_v15 }
 0x39d   : > { %v6735_v9 = vpop.eup %6734  ;;  %6754 = vrcp.f32 %v4389_v59  ;;  %v4397_v45 = vadd.f32 1.0, %v6733_v46  ;;  %v9232_v56 = vpop.f32.mrb[169].mxu0  ;;  %v9234_v47 = vadd.f32 %v3595_v33, %v3435_v5  ;;  %v4060_v5 = vmul.f32 1.442695, %v3739_v28 }
 0x39e   : > { %v6737_v21 = vpop.eup %6736  ;;  %6756 = vrcp.f32 %v4395_v16  ;;  %v4396_v24 = vadd.f32 1.0, %v6735_v9  ;;  %v3597_v8 = vpop.f32.mrb[233].mxu1  ;;  %v4070_v46 = vmul.f32 1.442695, %v3744_v6  ;;  %v3753_v16 = vsub.f32 0.0, %v9166_v61 }
 0x39f   : > { %v6739_v3 = vpop.eup %6738  ;;  %6758 = vrcp.f32 %v4397_v45  ;;  %v4402_v7 = vadd.f32 1.0, %v6737_v21  ;;  %v9236_v20 = vpop.f32.mrb[170].mxu0  ;;  %v5607_v9 = vadd.f32 %v9181_v54, %v9013_v58  ;;  %v4074_v19 = vmul.f32 1.442695, %v3746_v39 }
 0x3a0   : > { %v3598_v0 = vpop.f32.mrb[234].mxu1  ;;  %v6741_v4 = vpop.eup %6740  ;;  %6760 = vrcp.f32 %v4396_v24  ;;  %v4404_v52 = vadd.f32 1.0, %v6739_v3  ;;  %v3752_v28 = vsub.f32 0.0, %v5605_v27  ;;  %v3758_v33 = vsub.f32 0.0, %v5606_v53 }
 0x3a1   : > { %v9241_v10 = vpop.f32.mrb[171].mxu0  ;;  %v3600_v36 = vpop.f32.mrb[235].mxu1  ;;  %4824 = vst.msk [vmem:[%s8268_s9 + $0x1f0] sm:$0xff] %vm2113_vm1, %v6741_v4  ;;  %6762 = vrcp.f32 %v4402_v7  ;;  %v9248_v59 = vadd.f32 %v3598_v0, %v3438_v17  ;;  %v4072_v17 = vmul.f32 1.442695, %v3745_v51  ;;  %v3443_v61 = vadd.f32 %v8941_v18, %v9007_v63 }
 0x3a2   : > { %v6743_v62 = vpop.eup %6742  ;;  %6764 = vrcp.f32 %v4404_v52  ;;  %v4084_v54 = vmul.f32 1.442695, %v3751_v13  ;;  %v3446_v8 = vadd.f32 %v8945_v60, %v9007_v63  ;;  %v4088_v18 = vmul.f32 1.442695, %v3753_v16 }
 0x3a3   : > { %v6745_v22 = vpop.eup %6744  ;;  %4823 = vst [vmem:[%s8268_s9 + $0x1e8] sm:$0xff] %v6743_v62  ;;  %6766 = vpow2.f32 %v4044_v25  ;;  %v3759_v7 = vsub.f32 0.0, %v5607_v9  ;;  %v4086_v52 = vmul.f32 1.442695, %v3752_v28  ;;  %v4098_v62 = vmul.f32 1.442695, %v3758_v33 }
 0x3a4   : > { %v6747_v55 = vpop.eup %6746  ;;  %4829 = vst [vmem:[%s8268_s9 + $0x218] sm:$0xff] %v6745_v22  ;;  %6768 = vpow2.f32 %v4056_v35  ;;  %v9257_v25 = vpop.f32.mrb[172].mxu0  ;;  %v3760_v35 = vsub.f32 0.0, %v9179_v41  ;;  %v3451_v13 = vadd.f32 %v8956_v49, %v9007_v63 }
 0x3a5   : > { %v6749_v45 = vpop.eup %6748  ;;  %4831 = vst.msk [vmem:[%s8268_s9 + $0x228] sm:$0xff] %vm2113_vm1, %v6747_v55  ;;  %6770 = vpow2.f32 %v4060_v5  ;;  %v3603_v21 = vpop.f32.mrb[236].mxu1  ;;  %v4100_v22 = vmul.f32 1.442695, %v3759_v7 }
 0x3a6   : > { %v6751_v15 = vpop.eup %6750  ;;  %4830 = vst [vmem:[%s8268_s9 + $0x220] sm:$0xff] %v6749_v45  ;;  %6772 = vpow2.f32 %v4058_v57  ;;  %v9263_v1 = vpop.f32.mrb[173].mxu0  ;;  %v9269_v6 = vadd.f32 %v3603_v21, %v3443_v61  ;;  %v4102_v51 = vmul.f32 1.442695, %v3760_v35 }
 0x3a7   : > { %v6753_v24 = vpop.eup %6752  ;;  %4836 = vst [vmem:[%s8268_s9 + $0x250] sm:$0xff] %v6751_v15  ;;  %v3605_v40 = vpop.f32.mrb[237].mxu1  ;;  %6774 = vpow2.f32 %v4070_v46 }
 0x3a8   : > { %v6755_v3 = vpop.eup %6754  ;;  %4838 = vst.msk [vmem:[%s8268_s9 + $0x260] sm:$0xff] %vm2113_vm1, %v6753_v24  ;;  %v9271_v0 = vpop.f32.mrb[174].mxu0  ;;  %6776 = vpow2.f32 %v4074_v19  ;;  %v5608_v19 = vadd.f32 %v9184_v2, %v9011_v50 }
 0x3a9   : > { %v3606_v4 = vpop.f32.mrb[238].mxu1  ;;  %v6757_v41 = vpop.eup %6756  ;;  %4837 = vst [vmem:[%s8268_s9 + $0x258] sm:$0xff] %v6755_v3  ;;  %6778 = vpow2.f32 %v4072_v17  ;;  %v5609_v3 = vadd.f32 %v9189_v23, %v9013_v58 }
 0x3aa   : > { %v9274_v39 = vadd.f32 %v3606_v4, %v3446_v8  ;;  %v9276_v60 = vpop.f32.mrb[175].mxu0  ;;  %v3608_v27 = vpop.f32.mrb[239].mxu1  ;;  %4843 = vst [vmem:[%s8268_s9 + $0x288] sm:$0xff] %v6757_v41  ;;  %6780 = vpow2.f32 %v4084_v54  ;;  %v3765_v41 = vsub.f32 0.0, %v5608_v19 }
 0x3ab   : > { %v6759_v36 = vpop.eup %6758  ;;  %6782 = vpow2.f32 %v4088_v18  ;;  %v3454_v18 = vadd.f32 %v8960_v32, %v9007_v63  ;;  %v5610_v32 = vadd.f32 %v9201_v29, %v9011_v50  ;;  %v5611_v29 = vadd.f32 %v9205_v43, %v9013_v58 }
 0x3ac   : > { %v6761_v5 = vpop.eup %6760  ;;  %4845 = vst.msk [vmem:[%s8268_s9 + $0x298] sm:$0xff] %vm2113_vm1, %v6759_v36  ;;  %6784 = vpow2.f32 %v4086_v52  ;;  %v9287_v46 = vpop.f32.mrb[176].mxu0  ;;  %v3459_v52 = vadd.f32 %v8968_v48, %v9007_v63  ;;  %v3766_v48 = vsub.f32 0.0, %v5609_v3 }
 0x3ad   : > { %v6763_v53 = vpop.eup %6762  ;;  %4844 = vst [vmem:[%s8268_s9 + $0x290] sm:$0xff] %v6761_v5  ;;  %6786 = vpow2.f32 %v4098_v62  ;;  %v3611_v16 = vpop.f32.mrb[240].mxu1  ;;  %v3767_v62 = vsub.f32 0.0, %v9193_v11  ;;  %v3462_v5 = vadd.f32 %v8974_v14, %v9007_v63  ;;  %v9316_v11 = vadd.f32 %v8986_v42, %v9007_v63 }
 0x3ae   : > { %v6765_v57 = vpop.eup %6764  ;;  %4850 = vst [vmem:[%s8268_s9 + $0x2c0] sm:$0xff] %v6763_v53  ;;  %6788 = vpow2.f32 %v4102_v51  ;;  %v9291_v28 = vadd.f32 %v3611_v16, %v3451_v13  ;;  %v9293_v15 = vpop.f32.mrb[177].mxu0  ;;  %v3772_v43 = vsub.f32 0.0, %v5610_v32 }
 0x3af   : > { %v6767_v55 = vpop.eup %6766  ;;  %4852 = vst.msk [vmem:[%s8268_s9 + $0x2d0] sm:$0xff] %vm2113_vm1, %v6765_v57  ;;  %v3613_v17 = vpop.f32.mrb[241].mxu1  ;;  %6790 = vpow2.f32 %v4100_v22 }
 0x3b0   : > { %v6769_v9 = vpop.eup %6768  ;;  %v4403_v45 = vadd.f32 1.0, %v6767_v55  ;;  %v9295_v61 = vpop.f32.mrb[178].mxu0 }
 0x3b1   : > { %v6771_v33 = vpop.eup %6770  ;;  %v4409_v49 = vadd.f32 1.0, %v6769_v9  ;;  %v3614_v21 = vpop.f32.mrb[242].mxu1  ;;  %v4112_v9 = vmul.f32 1.442695, %v3765_v41 }
 0x3b2   : > { %v6773_v24 = vpop.eup %6772  ;;  %6792 = vrcp.f32 %v4403_v45  ;;  %v4411_v54 = vadd.f32 1.0, %v6771_v33  ;;  %v9297_v35 = vpop.f32.mrb[179].mxu0  ;;  %v9310_v53 = vadd.f32 %v3614_v21, %v3454_v18 }
 0x3b3   : > { %v3616_v40 = vpop.f32.mrb[243].mxu1  ;;  %v6775_v8 = vpop.eup %6774  ;;  %6794 = vrcp.f32 %v4409_v49  ;;  %v4410_v2 = vadd.f32 1.0, %v6773_v24  ;;  %v5612_v49 = vadd.f32 %v9209_v37, %v9011_v50  ;;  %v5613_v37 = vadd.f32 %v9211_v31, %v9013_v58 }
 0x3b4   : > { %v6777_v7 = vpop.eup %6776  ;;  %6796 = vrcp.f32 %v4411_v54  ;;  %v4416_v4 = vadd.f32 1.0, %v6775_v8  ;;  %v9312_v13 = vpop.f32.mrb[180].mxu0  ;;  %v4116_v8 = vmul.f32 1.442695, %v3767_v62  ;;  %v4126_v31 = vmul.f32 1.442695, %v3772_v43 }
 0x3b5   : > { %v6779_v27 = vpop.eup %6778  ;;  %6798 = vrcp.f32 %v4410_v2  ;;  %v4418_v36 = vadd.f32 1.0, %v6777_v7  ;;  %v3619_v55 = vpop.f32.mrb[244].mxu1  ;;  %v3774_v7 = vsub.f32 0.0, %v9207_v12 }
 0x3b6   : > { %v6781_v51 = vpop.eup %6780  ;;  %6800 = vrcp.f32 %v4416_v4  ;;  %v4417_v23 = vadd.f32 1.0, %v6779_v27  ;;  %v9320_v45 = vpop.f32.mrb[181].mxu0  ;;  %v9324_v21 = vadd.f32 %v3619_v55, %v3459_v52  ;;  %v3773_v27 = vsub.f32 0.0, %v5611_v29 }
 0x3b7   : > { %v6783_v22 = vpop.eup %6782  ;;  %6802 = vrcp.f32 %v4418_v36  ;;  %v4423_v57 = vadd.f32 1.0, %v6781_v51  ;;  %v3621_v19 = vpop.f32.mrb[245].mxu1  ;;  %v5614_v36 = vadd.f32 %v9228_v38, %v9011_v50  ;;  %v4114_v51 = vmul.f32 1.442695, %v3766_v48 }
 0x3b8   : > { %v6785_v14 = vpop.eup %6784  ;;  %6804 = vrcp.f32 %v4417_v23  ;;  %v4425_v16 = vadd.f32 1.0, %v6783_v22  ;;  %v9326_v42 = vpop.f32.mrb[182].mxu0  ;;  %v3779_v23 = vsub.f32 0.0, %v5612_v49  ;;  %v3781_v22 = vsub.f32 0.0, %v9223_v30 }
 0x3b9   : > { %v6787_v17 = vpop.eup %6786  ;;  %6806 = vrcp.f32 %v4423_v57  ;;  %v4424_v33 = vadd.f32 1.0, %v6785_v14  ;;  %v3622_v24 = vpop.f32.mrb[246].mxu1  ;;  %v5615_v57 = vadd.f32 %v9232_v56, %v9013_v58  ;;  %v4130_v38 = vmul.f32 1.442695, %v3774_v7 }
 0x3ba   : > { %v6789_v54 = vpop.eup %6788  ;;  %6808 = vrcp.f32 %v4425_v16  ;;  %v4430_v40 = vadd.f32 1.0, %v6787_v17  ;;  %v9328_v2 = vpop.f32.mrb[183].mxu0  ;;  %v9336_v32 = vadd.f32 %v3622_v24, %v3462_v5  ;;  %v3780_v48 = vsub.f32 0.0, %v5613_v37 }
 0x3bb   : > { %v6791_v3 = vpop.eup %6790  ;;  %6810 = vrcp.f32 %v4424_v33  ;;  %v4432_v18 = vadd.f32 1.0, %v6789_v54  ;;  %v3624_v4 = vpop.f32.mrb[247].mxu1  ;;  %v5616_v5 = vadd.f32 %v9236_v20, %v9011_v50  ;;  %v4128_v30 = vmul.f32 1.442695, %v3773_v27 }
 0x3bc   : > { %v6793_v41 = vpop.eup %6792  ;;  %6812 = vrcp.f32 %v4430_v40  ;;  %v4431_v52 = vadd.f32 1.0, %v6791_v3  ;;  %v9346_v14 = vpop.f32.mrb[184].mxu0  ;;  %v3786_v19 = vsub.f32 0.0, %v5614_v36  ;;  %v3470_v17 = vadd.f32 %v8990_v44, %v9007_v63 }
 0x3bd   : > { %v6795_v62 = vpop.eup %6794  ;;  %4851 = vst [vmem:[%s8268_s9 + $0x2c8] sm:$0xff] %v6793_v41  ;;  %6814 = vrcp.f32 %v4432_v18  ;;  %v3627_v16 = vpop.f32.mrb[248].mxu1  ;;  %v4140_v33 = vmul.f32 1.442695, %v3779_v23  ;;  %v3788_v20 = vsub.f32 0.0, %v9234_v47  ;;  %v3787_v44 = vsub.f32 0.0, %v5615_v57 }
 0x3be   : > { %v6797_v12 = vpop.eup %6796  ;;  %4857 = vst [vmem:[%s8268_s9 + $0x2f8] sm:$0xff] %v6795_v62  ;;  %6816 = vrcp.f32 %v4431_v52  ;;  %v9349_v56 = vpop.f32.mrb[185].mxu0  ;;  %v9356_v49 = vadd.f32 %v3627_v16, %v9316_v11  ;;  %v4142_v47 = vmul.f32 1.442695, %v3780_v48  ;;  %v3793_v11 = vsub.f32 0.0, %v5616_v5 }
 0x3bf   : > { %v6799_v55 = vpop.eup %6798  ;;  %4859 = vst.msk [vmem:[%s8268_s9 + $0x308] sm:$0xff] %vm2113_vm1, %v6797_v12  ;;  %6818 = vpow2.f32 %v4112_v9  ;;  %v3629_v24 = vpop.f32.mrb[249].mxu1  ;;  %v4154_v41 = vmul.f32 1.442695, %v3786_v19  ;;  %v4158_v27 = vmul.f32 1.442695, %v3788_v20 }
 0x3c0   : > { %v6801_v29 = vpop.eup %6800  ;;  %4858 = vst [vmem:[%s8268_s9 + $0x300] sm:$0xff] %v6799_v55  ;;  %6820 = vpow2.f32 %v4116_v8  ;;  %v9358_v54 = vpop.f32.mrb[186].mxu0  ;;  %v4144_v8 = vmul.f32 1.442695, %v3781_v22  ;;  %v4156_v62 = vmul.f32 1.442695, %v3787_v44 }
 0x3c1   : > { %v6803_v9 = vpop.eup %6802  ;;  %4864 = vst [vmem:[%s8268_s9 + $0x330] sm:$0xff] %v6801_v29  ;;  %6822 = vpow2.f32 %v4114_v51  ;;  %v3630_v43 = vpop.f32.mrb[250].mxu1  ;;  %v3475_v51 = vadd.f32 %v9000_v26, %v9007_v63  ;;  %v4168_v12 = vmul.f32 1.442695, %v3793_v11 }
 0x3c2   : > { %v6805_v40 = vpop.eup %6804  ;;  %4866 = vst.msk [vmem:[%s8268_s9 + $0x340] sm:$0xff] %vm2113_vm1, %v6803_v9  ;;  %6824 = vpow2.f32 %v4126_v31  ;;  %v9362_v3 = vpop.f32.mrb[187].mxu0  ;;  %v9365_v7 = vadd.f32 %v3630_v43, %v3470_v17 }
 0x3c3   : > { %v6807_v18 = vpop.eup %6806  ;;  %4865 = vst [vmem:[%s8268_s9 + $0x338] sm:$0xff] %v6805_v40  ;;  %6826 = vpow2.f32 %v4130_v38  ;;  %v3632_v37 = vpop.f32.mrb[251].mxu1  ;;  %v3478_v40 = vadd.f32 %v9009_v34, %v9007_v63 }
 0x3c4   : > { %v6809_v4 = vpop.eup %6808  ;;  %4871 = vst [vmem:[%s8268_s9 + $0x368] sm:$0xff] %v6807_v18  ;;  %6828 = vpow2.f32 %v4128_v30  ;;  %v9374_v31 = vpop.f32.mrb[188].mxu0 }
 0x3c5   : > { %v6811_v52 = vpop.eup %6810  ;;  %4873 = vst.msk [vmem:[%s8268_s9 + $0x378] sm:$0xff] %vm2113_vm1, %v6809_v4  ;;  %6830 = vpow2.f32 %v4140_v33  ;;  %v3635_v22 = vpop.f32.mrb[252].mxu1 }
 0x3c6   : > { %v6813_v36 = vpop.eup %6812  ;;  %4872 = vst [vmem:[%s8268_s9 + $0x370] sm:$0xff] %v6811_v52  ;;  %6832 = vpow2.f32 %v4144_v8  ;;  %v9378_v55 = vadd.f32 %v3635_v22, %v3475_v51  ;;  %v9380_v38 = vpop.f32.mrb[189].mxu0  ;;  %v5618_v52 = vadd.f32 %v9257_v25, %v9011_v50 }
 0x3c7   : > { %v6815_v23 = vpop.eup %6814  ;;  %4878 = vst [vmem:[%s8268_s9 + $0x3a0] sm:$0xff] %v6813_v36  ;;  %6834 = vpow2.f32 %v4142_v47  ;;  %v3637_v48 = vpop.f32.mrb[253].mxu1  ;;  %v5617_v47 = vadd.f32 %v9241_v10, %v9013_v58 }
 0x3c8   : > { %v6817_v57 = vpop.eup %6816  ;;  %4880 = vst.msk [vmem:[%s8268_s9 + $0x3b0] sm:$0xff] %vm2113_vm1, %v6815_v23  ;;  %6836 = vpow2.f32 %v4154_v41  ;;  %v9383_v26 = vpop.f32.mrb[190].mxu0  ;;  %v3795_v41 = vsub.f32 0.0, %v9248_v59 }
 0x3c9   : > { %v6819_v5 = vpop.eup %6818  ;;  %4879 = vst [vmem:[%s8268_s9 + $0x3a8] sm:$0xff] %v6817_v57  ;;  %6838 = vpow2.f32 %v4158_v27  ;;  %v3638_v16 = vpop.f32.mrb[254].mxu1  ;;  %v3794_v23 = vsub.f32 0.0, %v5617_v47  ;;  %v3800_v57 = vsub.f32 0.0, %v5618_v52 }
 0x3ca   : > { %v6821_v29 = vpop.eup %6820  ;;  %v4437_v30 = vadd.f32 1.0, %v6819_v5  ;;  %6840 = vpow2.f32 %v4156_v62  ;;  %v9385_v19 = vpop.f32.mrb[191].mxu0  ;;  %v9391_v11 = vadd.f32 %v3638_v16, %v3478_v40  ;;  %v5619_v62 = vadd.f32 %v9263_v1, %v9013_v58 }
 0x3cb   : > { %v3640_v17 = vpop.f32.mrb[255].mxu1  ;;  %v6823_v9 = vpop.eup %6822  ;;  %v4439_v33 = vadd.f32 1.0, %v6821_v29  ;;  %6842 = vpow2.f32 %v4168_v12  ;;  %v5620_v12 = vadd.f32 %v9271_v0, %v9011_v50  ;;  %v4172_v25 = vmul.f32 1.442695, %v3795_v41 }
 0x3cc   : > { %v6825_v20 = vpop.eup %6824  ;;  %6844 = vrcp.f32 %v4437_v30  ;;  %v4438_v24 = vadd.f32 1.0, %v6823_v9  ;;  %v3802_v16 = vsub.f32 0.0, %v9269_v6  ;;  %v5621_v1 = vadd.f32 %v9276_v60, %v9013_v58 }
 0x3cd   : > { %v6827_v8 = vpop.eup %6826  ;;  %6846 = vrcp.f32 %v4439_v33  ;;  %v4444_v44 = vadd.f32 1.0, %v6825_v20  ;;  %v3801_v17 = vsub.f32 0.0, %v5619_v62  ;;  %v5622_v0 = vadd.f32 %v9287_v46, %v9011_v50 }
 0x3ce   : > { %v6829_v43 = vpop.eup %6828  ;;  %6848 = vrcp.f32 %v4438_v24  ;;  %v4446_v18 = vadd.f32 1.0, %v6827_v8  ;;  %v4170_v20 = vmul.f32 1.442695, %v3794_v23  ;;  %v3807_v24 = vsub.f32 0.0, %v5620_v12 }
 0x3cf   : > { %v6831_v37 = vpop.eup %6830  ;;  %6850 = vrcp.f32 %v4444_v44  ;;  %v4445_v4 = vadd.f32 1.0, %v6829_v43  ;;  %v4182_v6 = vmul.f32 1.442695, %v3800_v57  ;;  %v3809_v60 = vsub.f32 0.0, %v9274_v39 }
 0x3d0   : > { %v6833_v63 = vpop.eup %6832  ;;  %6852 = vrcp.f32 %v4446_v18  ;;  %v4451_v34 = vadd.f32 1.0, %v6831_v37  ;;  %v5623_v8 = vadd.f32 %v9293_v15, %v9013_v58  ;;  %v4186_v46 = vmul.f32 1.442695, %v3802_v16 }
 0x3d1   : > { %v6835_v27 = vpop.eup %6834  ;;  %6854 = vrcp.f32 %v4445_v4  ;;  %v4453_v36 = vadd.f32 1.0, %v6833_v63  ;;  %v3808_v43 = vsub.f32 0.0, %v5621_v1  ;;  %v5624_v18 = vadd.f32 %v9295_v61, %v9011_v50 }
 0x3d2   : > { %v6837_v10 = vpop.eup %6836  ;;  %6856 = vrcp.f32 %v4451_v34  ;;  %v4452_v51 = vadd.f32 1.0, %v6835_v27  ;;  %v4184_v37 = vmul.f32 1.442695, %v3801_v17  ;;  %v3814_v4 = vsub.f32 0.0, %v5622_v0 }
 0x3d3   : > { %v6839_v59 = vpop.eup %6838  ;;  %6858 = vrcp.f32 %v4453_v36  ;;  %v4458_v22 = vadd.f32 1.0, %v6837_v10  ;;  %v4196_v15 = vmul.f32 1.442695, %v3807_v24  ;;  %v3816_v41 = vsub.f32 0.0, %v9291_v28 }
 0x3d4   : > { %v6841_v48 = vpop.eup %6840  ;;  %6860 = vrcp.f32 %v4452_v51  ;;  %v4460_v5 = vadd.f32 1.0, %v6839_v59  ;;  %v4200_v63 = vmul.f32 1.442695, %v3809_v60  ;;  %v3815_v61 = vsub.f32 0.0, %v5623_v8 }
 0x3d5   : > { %v6843_v29 = vpop.eup %6842  ;;  %6862 = vrcp.f32 %v4458_v22  ;;  %v4459_v30 = vadd.f32 1.0, %v6841_v48  ;;  %v4198_v27 = vmul.f32 1.442695, %v3808_v43  ;;  %v3821_v36 = vsub.f32 0.0, %v5624_v18 }
 0x3d6   : > { %v6845_v9 = vpop.eup %6844  ;;  %6864 = vrcp.f32 %v4460_v5  ;;  %v4465_v33 = vadd.f32 1.0, %v6843_v29  ;;  %v4210_v10 = vmul.f32 1.442695, %v3814_v4  ;;  %v3823_v28 = vsub.f32 0.0, %v9310_v53 }
 0x3d7   : > { %v6847_v40 = vpop.eup %6846  ;;  %4885 = vst [vmem:[%s8268_s9 + $0x3d8] sm:$0xff] %v6845_v9  ;;  %6866 = vrcp.f32 %v4459_v30  ;;  %v4214_v23 = vmul.f32 1.442695, %v3816_v41  ;;  %v4212_v59 = vmul.f32 1.442695, %v3815_v61  ;;  %v5625_v29 = vadd.f32 %v9297_v35, %v9013_v58 }
 0x3d8   : > { %v6849_v44 = vpop.eup %6848  ;;  %4887 = vst.msk [vmem:[%s8268_s9 + $0x3e8] sm:$0xff] %vm2113_vm1, %v6847_v40  ;;  %6868 = vrcp.f32 %v4465_v33  ;;  %v4228_v53 = vmul.f32 1.442695, %v3823_v28  ;;  %v5626_v24 = vadd.f32 %v9312_v13, %v9011_v50  ;;  %v5627_v43 = vadd.f32 %v9320_v45, %v9013_v58 }
 0x3d9   : > { %v6851_v47 = vpop.eup %6850  ;;  %4886 = vst [vmem:[%s8268_s9 + $0x3e0] sm:$0xff] %v6849_v44  ;;  %6870 = vpow2.f32 %v4172_v25  ;;  %v4224_v25 = vmul.f32 1.442695, %v3821_v36  ;;  %v3822_v60 = vsub.f32 0.0, %v5625_v29  ;;  %v5628_v13 = vadd.f32 %v9326_v42, %v9011_v50 }
 0x3da   : > { %v6853_v39 = vpop.eup %6852  ;;  %4892 = vst [vmem:[%s8268_s9 + $0x410] sm:$0xff] %v6851_v47  ;;  %6872 = vpow2.f32 %v4170_v20  ;;  %v5629_v61 = vadd.f32 %v9328_v2, %v9013_v58  ;;  %v5630_v42 = vadd.f32 %v9346_v14, %v9011_v50  ;;  %v3837_v2 = vsub.f32 0.0, %v9336_v32 }
 0x3db   : > { %v6855_v52 = vpop.eup %6854  ;;  %4894 = vst.msk [vmem:[%s8268_s9 + $0x420] sm:$0xff] %vm2113_vm1, %v6853_v39  ;;  %6874 = vpow2.f32 %v4182_v6  ;;  %v3835_v28 = vsub.f32 0.0, %v5628_v13 }
 0x3dc   : > { %v6857_v34 = vpop.eup %6856  ;;  %4893 = vst [vmem:[%s8268_s9 + $0x418] sm:$0xff] %v6855_v52  ;;  %6876 = vpow2.f32 %v4186_v46 }
 0x3dd   : > { %v6859_v62 = vpop.eup %6858  ;;  %4899 = vst [vmem:[%s8268_s9 + $0x448] sm:$0xff] %v6857_v34  ;;  %6878 = vpow2.f32 %v4184_v37  ;;  %v3828_v37 = vsub.f32 0.0, %v5626_v24 }
 0x3de   : > { %v6861_v51 = vpop.eup %6860  ;;  %4901 = vst.msk [vmem:[%s8268_s9 + $0x458] sm:$0xff] %vm2113_vm1, %v6859_v62  ;;  %6880 = vpow2.f32 %v4196_v15  ;;  %v4226_v15 = vmul.f32 1.442695, %v3822_v60 }
 0x3df   : > { %v6863_v12 = vpop.eup %6862  ;;  %4900 = vst [vmem:[%s8268_s9 + $0x450] sm:$0xff] %v6861_v51  ;;  %6882 = vpow2.f32 %v4200_v63  ;;  %v3830_v63 = vsub.f32 0.0, %v9324_v21 }
 0x3e0   : > { %v6865_v22 = vpop.eup %6864  ;;  %4906 = vst [vmem:[%s8268_s9 + $0x480] sm:$0xff] %v6863_v12  ;;  %6884 = vpow2.f32 %v4198_v27  ;;  %v3829_v27 = vsub.f32 0.0, %v5627_v43 }
 0x3e1   : > { %v6867_v57 = vpop.eup %6866  ;;  %4908 = vst.msk [vmem:[%s8268_s9 + $0x490] sm:$0xff] %vm2113_vm1, %v6865_v22  ;;  %6886 = vpow2.f32 %v4210_v10  ;;  %v4238_v10 = vmul.f32 1.442695, %v3828_v37  ;;  %v4242_v14 = vmul.f32 1.442695, %v3830_v63  ;;  %v5632_v22 = vadd.f32 %v9358_v54, %v9011_v50 }
 0x3e2   : > { %v6869_v48 = vpop.eup %6868  ;;  %4907 = vst [vmem:[%s8268_s9 + $0x488] sm:$0xff] %v6867_v57  ;;  %6888 = vpow2.f32 %v4214_v23  ;;  %v5631_v23 = vadd.f32 %v9349_v56, %v9013_v58  ;;  %v4240_v57 = vmul.f32 1.442695, %v3829_v27  ;;  %v4252_v56 = vmul.f32 1.442695, %v3835_v28 }
 0x3e3   : > { %v6871_v5 = vpop.eup %6870  ;;  %4913 = vst [vmem:[%s8268_s9 + $0x4b8] sm:$0xff] %v6869_v48  ;;  %6890 = vpow2.f32 %v4212_v59  ;;  %v3836_v59 = vsub.f32 0.0, %v5629_v61  ;;  %v3844_v48 = vsub.f32 0.0, %v9356_v49  ;;  %v4256_v54 = vmul.f32 1.442695, %v3837_v2 }
 0x3e4   : > { %v6873_v16 = vpop.eup %6872  ;;  %v4467_v1 = vadd.f32 1.0, %v6871_v5  ;;  %6892 = vpow2.f32 %v4224_v25  ;;  %v5633_v5 = vadd.f32 %v9362_v3, %v9013_v58  ;;  %v3851_v3 = vsub.f32 0.0, %v9365_v7 }
 0x3e5   : > { %v6875_v30 = vpop.eup %6874  ;;  %v4466_v17 = vadd.f32 1.0, %v6873_v16  ;;  %6894 = vpow2.f32 %v4228_v53  ;;  %v3842_v53 = vsub.f32 0.0, %v5630_v42  ;;  %v5635_v27 = vadd.f32 %v9380_v38, %v9013_v58 }
 0x3e6   : > { %v6877_v0 = vpop.eup %6876  ;;  %6896 = vrcp.f32 %v4467_v1  ;;  %v4472_v9 = vadd.f32 1.0, %v6875_v30  ;;  %v3843_v1 = vsub.f32 0.0, %v5631_v23  ;;  %v4254_v30 = vmul.f32 1.442695, %v3836_v59 }
 0x3e7   : > { %v6879_v33 = vpop.eup %6878  ;;  %6898 = vrcp.f32 %v4466_v17  ;;  %v4474_v20 = vadd.f32 1.0, %v6877_v0  ;;  %v3849_v17 = vsub.f32 0.0, %v5632_v22  ;;  %v4266_v49 = vmul.f32 1.442695, %v3842_v53 }
 0x3e8   : > { %v6881_v40 = vpop.eup %6880  ;;  %6900 = vrcp.f32 %v4472_v9  ;;  %v4473_v6 = vadd.f32 1.0, %v6879_v33  ;;  %v4270_v33 = vmul.f32 1.442695, %v3844_v48  ;;  %v4284_v7 = vmul.f32 1.442695, %v3851_v3 }
 0x3e9   : > { %v6883_v8 = vpop.eup %6882  ;;  %6902 = vrcp.f32 %v4474_v20  ;;  %v4479_v44 = vadd.f32 1.0, %v6881_v40  ;;  %v3850_v20 = vsub.f32 0.0, %v5633_v5  ;;  %v4268_v40 = vmul.f32 1.442695, %v3843_v1 }
 0x3ea   : > { %v6885_v35 = vpop.eup %6884  ;;  %6904 = vrcp.f32 %v4473_v6  ;;  %v4481_v46 = vadd.f32 1.0, %v6883_v8  ;;  %v4280_v60 = vmul.f32 1.442695, %v3849_v17  ;;  %v3858_v2 = vsub.f32 0.0, %v9378_v55 }
 0x3eb   : > { %v6887_v18 = vpop.eup %6886  ;;  %6906 = vrcp.f32 %v4479_v44  ;;  %v4480_v47 = vadd.f32 1.0, %v6885_v35  ;;  %v4282_v35 = vmul.f32 1.442695, %v3850_v20  ;;  %v5637_v23 = vadd.f32 %v9385_v19, %v9013_v58 }
 0x3ec   : > { %v6889_v4 = vpop.eup %6888  ;;  %6908 = vrcp.f32 %v4481_v46  ;;  %v4486_v39 = vadd.f32 1.0, %v6887_v18  ;;  %v3865_v55 = vsub.f32 0.0, %v9391_v11  ;;  %v4298_v19 = vmul.f32 1.442695, %v3858_v2 }
 0x3ed   : > { %v6891_v41 = vpop.eup %6890  ;;  %6910 = vrcp.f32 %v4480_v47  ;;  %v4488_v52 = vadd.f32 1.0, %v6889_v4 }
 0x3ee   : > { %v6893_v45 = vpop.eup %6892  ;;  %6912 = vrcp.f32 %v4486_v39  ;;  %v4487_v34 = vadd.f32 1.0, %v6891_v41  ;;  %v4312_v11 = vmul.f32 1.442695, %v3865_v55 }
 0x3ef   : > { %v6895_v36 = vpop.eup %6894  ;;  %6914 = vrcp.f32 %v4488_v52  ;;  %v4493_v62 = vadd.f32 1.0, %v6893_v45  ;;  %v5634_v52 = vadd.f32 %v9374_v31, %v9011_v50 }
 0x3f0   : > { %v6897_v51 = vpop.eup %6896  ;;  %6916 = vrcp.f32 %v4487_v34  ;;  %v4495_v21 = vadd.f32 1.0, %v6895_v36 }
 0x3f1   : > { %v6899_v12 = vpop.eup %6898  ;;  %4915 = vst.msk [vmem:[%s8268_s9 + $0x4c8] sm:$0xff] %vm2113_vm1, %v6897_v51  ;;  %6918 = vrcp.f32 %v4493_v62  ;;  %v5636_v62 = vadd.f32 %v9383_v26, %v9011_v50  ;;  %v3856_v51 = vsub.f32 0.0, %v5634_v52 }
 0x3f2   : > { %v6901_v25 = vpop.eup %6900  ;;  %4914 = vst [vmem:[%s8268_s9 + $0x4c0] sm:$0xff] %v6899_v12  ;;  %6920 = vrcp.f32 %v4495_v21 }
 0x3f3   : > { %v6903_v32 = vpop.eup %6902  ;;  %4920 = vst [vmem:[%s8268_s9 + $0x4f0] sm:$0xff] %v6901_v25  ;;  %6922 = vpow2.f32 %v4226_v15  ;;  %v3863_v26 = vsub.f32 0.0, %v5636_v62 }
 0x3f4   : > { %v6905_v16 = vpop.eup %6904  ;;  %4922 = vst.msk [vmem:[%s8268_s9 + $0x500] sm:$0xff] %vm2113_vm1, %v6903_v32  ;;  %6924 = vpow2.f32 %v4238_v10  ;;  %v3864_v32 = vsub.f32 0.0, %v5637_v23 }
 0x3f5   : > { %v6907_v29 = vpop.eup %6906  ;;  %4921 = vst [vmem:[%s8268_s9 + $0x4f8] sm:$0xff] %v6905_v16  ;;  %6926 = vpow2.f32 %v4242_v14  ;;  %v3857_v14 = vsub.f32 0.0, %v5635_v27  ;;  %v4308_v16 = vmul.f32 1.442695, %v3863_v26 }
 0x3f6   : > { %v6909_v0 = vpop.eup %6908  ;;  %4927 = vst [vmem:[%s8268_s9 + $0x528] sm:$0xff] %v6907_v29  ;;  %6928 = vpow2.f32 %v4240_v57  ;;  %v4294_v57 = vmul.f32 1.442695, %v3856_v51  ;;  %v4310_v29 = vmul.f32 1.442695, %v3864_v32 }
 0x3f7   : > { %v6911_v9 = vpop.eup %6910  ;;  %4929 = vst.msk [vmem:[%s8268_s9 + $0x538] sm:$0xff] %vm2113_vm1, %v6909_v0  ;;  %6930 = vpow2.f32 %v4252_v56  ;;  %v4296_v48 = vmul.f32 1.442695, %v3857_v14 }
 0x3f8   : > { %v6913_v24 = vpop.eup %6912  ;;  %4928 = vst [vmem:[%s8268_s9 + $0x530] sm:$0xff] %v6911_v9  ;;  %6932 = vpow2.f32 %v4256_v54 }
 0x3f9   : > { %v6915_v6 = vpop.eup %6914  ;;  %4934 = vst [vmem:[%s8268_s9 + $0x560] sm:$0xff] %v6913_v24  ;;  %6934 = vpow2.f32 %v4254_v30 }
 0x3fa   : > { %v6917_v8 = vpop.eup %6916  ;;  %4936 = vst.msk [vmem:[%s8268_s9 + $0x570] sm:$0xff] %vm2113_vm1, %v6915_v6  ;;  %6936 = vpow2.f32 %v4266_v49 }
 0x3fb   : > { %v6919_v44 = vpop.eup %6918  ;;  %4935 = vst [vmem:[%s8268_s9 + $0x568] sm:$0xff] %v6917_v8  ;;  %6938 = vpow2.f32 %v4270_v33 }
 0x3fc   : > { %v6921_v46 = vpop.eup %6920  ;;  %4941 = vst [vmem:[%s8268_s9 + $0x598] sm:$0xff] %v6919_v44  ;;  %6940 = vpow2.f32 %v4268_v40 }
 0x3fd   : > { %v6923_v43 = vpop.eup %6922  ;;  %4943 = vst.msk [vmem:[%s8268_s9 + $0x5a8] sm:$0xff] %vm2113_vm1, %v6921_v46  ;;  %6942 = vpow2.f32 %v4280_v60 }
 0x3fe   : > { %v6925_v18 = vpop.eup %6924  ;;  %v4494_v47 = vadd.f32 1.0, %v6923_v43  ;;  %6944 = vpow2.f32 %v4284_v7 }
 0x3ff   : > { %v6927_v37 = vpop.eup %6926  ;;  %v4500_v13 = vadd.f32 1.0, %v6925_v18  ;;  %6946 = vpow2.f32 %v4282_v35 }
 0x400   : > { %v6929_v4 = vpop.eup %6928  ;;  %6948 = vrcp.f32 %v4494_v47  ;;  %v4502_v39 = vadd.f32 1.0, %v6927_v37 }
 0x401   : > { %v6931_v15 = vpop.eup %6930  ;;  %6950 = vrcp.f32 %v4500_v13  ;;  %v4501_v41 = vadd.f32 1.0, %v6929_v4 }
 0x402   : > { %v6933_v63 = vpop.eup %6932  ;;  %6952 = vrcp.f32 %v4502_v39  ;;  %v4507_v61 = vadd.f32 1.0, %v6931_v15 }
 0x403   : > { %v6935_v45 = vpop.eup %6934  ;;  %6954 = vrcp.f32 %v4501_v41  ;;  %v4509_v34 = vadd.f32 1.0, %v6933_v63 }
 0x404   : > { %v6937_v42 = vpop.eup %6936  ;;  %6956 = vrcp.f32 %v4507_v61  ;;  %v4508_v36 = vadd.f32 1.0, %v6935_v45 }
 0x405   : > { %v6939_v10 = vpop.eup %6938  ;;  %6958 = vrcp.f32 %v4509_v34  ;;  %v4514_v28 = vadd.f32 1.0, %v6937_v42 }
 0x406   : > { %v6941_v31 = vpop.eup %6940  ;;  %6960 = vrcp.f32 %v4508_v36  ;;  %v4516_v21 = vadd.f32 1.0, %v6939_v10 }
 0x407   : > { %v6943_v12 = vpop.eup %6942  ;;  %6962 = vrcp.f32 %v4514_v28  ;;  %v4515_v38 = vadd.f32 1.0, %v6941_v31 }
 0x408   : > { %v6945_v59 = vpop.eup %6944  ;;  %6964 = vrcp.f32 %v4516_v21  ;;  %v4521_v50 = vadd.f32 1.0, %v6943_v12 }
 0x409   : > { %v6947_v22 = vpop.eup %6946  ;;  %6966 = vrcp.f32 %v4515_v38  ;;  %v4523_v25 = vadd.f32 1.0, %v6945_v59 }
 0x40a   : > { %v6949_v53 = vpop.eup %6948  ;;  %6968 = vrcp.f32 %v4521_v50  ;;  %v4522_v58 = vadd.f32 1.0, %v6947_v22 }
 0x40b   : > { %v6951_v56 = vpop.eup %6950  ;;  %4942 = vst [vmem:[%s8268_s9 + $0x5a0] sm:$0xff] %v6949_v53  ;;  %6970 = vrcp.f32 %v4523_v25 }
 0x40c   : > { %v6953_v5 = vpop.eup %6952  ;;  %4948 = vst [vmem:[%s8268_s9 + $0x5d0] sm:$0xff] %v6951_v56  ;;  %6972 = vrcp.f32 %v4522_v58 }
 0x40d   : > { %v6955_v54 = vpop.eup %6954  ;;  %4950 = vst.msk [vmem:[%s8268_s9 + $0x5e0] sm:$0xff] %vm2113_vm1, %v6953_v5  ;;  %6974 = vpow2.f32 %v4294_v57 }
 0x40e   : > { %v6957_v1 = vpop.eup %6956  ;;  %4949 = vst [vmem:[%s8268_s9 + $0x5d8] sm:$0xff] %v6955_v54  ;;  %6976 = vpow2.f32 %v4298_v19 }
 0x40f   : > { %v6959_v30 = vpop.eup %6958  ;;  %4955 = vst [vmem:[%s8268_s9 + $0x608] sm:$0xff] %v6957_v1  ;;  %6978 = vpow2.f32 %v4296_v48 }
 0x410   : > { %v6961_v17 = vpop.eup %6960  ;;  %4957 = vst.msk [vmem:[%s8268_s9 + $0x618] sm:$0xff] %vm2113_vm1, %v6959_v30  ;;  %6980 = vpow2.f32 %v4308_v16 }
 0x411   : > { %v6963_v0 = vpop.eup %6962  ;;  %4956 = vst [vmem:[%s8268_s9 + $0x610] sm:$0xff] %v6961_v17  ;;  %6982 = vpow2.f32 %v4312_v11 }
 0x412   : > { %v6965_v49 = vpop.eup %6964  ;;  %4962 = vst [vmem:[%s8268_s9 + $0x640] sm:$0xff] %v6963_v0  ;;  %6984 = vpow2.f32 %v4310_v29 }
 0x413   : > { %v6967_v3 = vpop.eup %6966  ;;  %4964 = vst.msk [vmem:[%s8268_s9 + $0x650] sm:$0xff] %vm2113_vm1, %v6965_v49 }
 0x414   : > { %v6969_v9 = vpop.eup %6968  ;;  %4963 = vst [vmem:[%s8268_s9 + $0x648] sm:$0xff] %v6967_v3 }
 0x415   : > { %v6971_v33 = vpop.eup %6970  ;;  %4969 = vst [vmem:[%s8268_s9 + $0x678] sm:$0xff] %v6969_v9 }
 0x416   : > { %v6973_v20 = vpop.eup %6972  ;;  %4971 = vst.msk [vmem:[%s8268_s9 + $0x688] sm:$0xff] %vm2113_vm1, %v6971_v33 }
 0x417   : > { %v6975_v24 = vpop.eup %6974  ;;  %4970 = vst [vmem:[%s8268_s9 + $0x680] sm:$0xff] %v6973_v20 }
 0x418   : > { %v6977_v40 = vpop.eup %6976  ;;  %v4528_v6 = vadd.f32 1.0, %v6975_v24 }
 0x419   : > { %v6979_v60 = vpop.eup %6978  ;;  %v4530_v8 = vadd.f32 1.0, %v6977_v40 }
 0x41a   : > { %v6981_v7 = vpop.eup %6980  ;;  %6986 = vrcp.f32 %v4528_v6  ;;  %v4529_v44 = vadd.f32 1.0, %v6979_v60 }
 0x41b   : > { %v6983_v35 = vpop.eup %6982  ;;  %6988 = vrcp.f32 %v4530_v8  ;;  %v4535_v46 = vadd.f32 1.0, %v6981_v7 }
 0x41c   : > { %v6985_v43 = vpop.eup %6984  ;;  %6990 = vrcp.f32 %v4529_v44  ;;  %v4537_v18 = vadd.f32 1.0, %v6983_v35 }
 0x41d   : > { %6992 = vrcp.f32 %v4535_v46  ;;  %v4536_v47 = vadd.f32 1.0, %v6985_v43 }
 0x41e   : > { %6994 = vrcp.f32 %v4537_v18 }
 0x41f   : > { %6996 = vrcp.f32 %v4536_v47 }
 0x424   : > { %v6987_v37 = vpop.eup %6986 }
 0x425   : > { %v6989_v13 = vpop.eup %6988  ;;  %4976 = vst [vmem:[%s8268_s9 + $0x6b0] sm:$0xff] %v6987_v37 }
 0x426   : > { %v6991_v4 = vpop.eup %6990  ;;  %4978 = vst.msk [vmem:[%s8268_s9 + $0x6c0] sm:$0xff] %vm2113_vm1, %v6989_v13 }
 0x427   : > { %v6993_v39 = vpop.eup %6992  ;;  %4977 = vst [vmem:[%s8268_s9 + $0x6b8] sm:$0xff] %v6991_v4 }
 0x428   : > { %v6995_v15 = vpop.eup %6994  ;;  %4983 = vst [vmem:[%s8268_s9 + $0x6e8] sm:$0xff] %v6993_v39 }
 0x429   : > { %v6997_v41 = vpop.eup %6996  ;;  %4985 = vst.msk [vmem:[%s8268_s9 + $0x6f8] sm:$0xff] %vm2113_vm1, %v6995_v15 }
 0x42a   : > { %4984 = vst [vmem:[%s8268_s9 + $0x6f0] sm:$0xff] %v6997_v41 }
 0x42b PF: > { %s15_s18 = sadd.s32 1, %s7005_s18  }
 0x42c   : > { %p12_p4 = scmp.ge.s32.totalorder %s15_s18, 4  }
 0x42e   :  { %14 = sbr.rel (!%p12_p4) target bundleno = 1 (0x1), region = 70 }

</bundles_post_ra>
